<compile_context>
chip_gen: v7x
topology: tpu7x:2x2x1
jax: 0.10.0
libtpu: 0.0.40
codegen_flags: <defaults>
</compile_context>

<pallas_src>
import functools

import jax
import jax.numpy as jnp
from jax.experimental import pallas as pl
from jax.experimental.pallas import tpu as pltpu


# ----------------------------------------------------------------------------
# Fused kernel: B_t images per grid step, stacked along sublanes.
# Activation layout: (B_t*H, W*C) with W*C == 128 at every stage.
# ----------------------------------------------------------------------------
def simple_net_kernel(x_ref, w_ref, b_ref, ph1_ref, ph2_ref, rsum_ref,
                      fcw_ref, fcb_ref, o_ref, *, s, c):
    H1, H2, H3 = s, s // 2, s // 4
    C3 = 4 * c
    W3 = 128 // C3

    def masks(rows, H):
        # Row-within-image index (H is a power of two; rows = B_t * H).
        ridx = jax.lax.broadcasted_iota(jnp.int32, (rows, 128), 0) & (H - 1)
        return ridx != 0, ridx != (H - 1)

    def conv_bn_relu(x, i, m_top, m_bot):
        # One fused (rows, 384) x (384, 128) matmul: [row h-1 | row h | row h+1] taps.
        rows = x.shape[0]
        dn = jnp.where(m_top, pltpu.roll(x, shift=1, axis=0), 0.0)          # row h-1
        up = jnp.where(m_bot, pltpu.roll(x, shift=rows - 1, axis=0), 0.0)   # row h+1
        xb = x.astype(jnp.bfloat16)
        x3 = jnp.concatenate(
            [dn.astype(jnp.bfloat16), xb, up.astype(jnp.bfloat16)], axis=-1)
        acc = jnp.dot(x3, w_ref[i], preferred_element_type=jnp.float32) + b_ref[i]
        return jnp.maximum(acc, 0.0)

    def hpool(x, ph_ref):
        # H-direction half of AvgPool2d(2,2); the W-half is folded into the next conv.
        return jnp.dot(ph_ref[...], x.astype(jnp.bfloat16),
                       preferred_element_type=jnp.float32)

    x = x_ref[...]                                  # (B_t*H1, 128) f32, lanes 48..127 = 0

    # Stage 1 @ HxW = 16x16, C = c
    m_top, m_bot = masks(x.shape[0], H1)
    for i in range(3):
        x = conv_bn_relu(x, i, m_top, m_bot)
    x = hpool(x, ph1_ref)                           # (B_t*H2, 128), W-pool folded into layer 3

    # Stage 2 @ 8x8, C = 2c
    m_top, m_bot = masks(x.shape[0], H2)
    for i in range(3, 6):
        x = conv_bn_relu(x, i, m_top, m_bot)
    x = hpool(x, ph2_ref)                           # (B_t*H3, 128), W-pool folded into layer 6

    # Stage 3 @ 4x4, C = 4c
    m_top, m_bot = masks(x.shape[0], H3)
    for i in range(6, 9):
        x = conv_bn_relu(x, i, m_top, m_bot)

    # MaxPool2d(3, stride=1, padding=1).  Zero-filled shifts are exact because the
    # preceding ReLU guarantees x >= 0 (matches -inf padding semantics).
    rows = x.shape[0]
    dn = jnp.where(m_top, pltpu.roll(x, shift=1, axis=0), 0.0)
    up = jnp.where(m_bot, pltpu.roll(x, shift=rows - 1, axis=0), 0.0)
    mv = jnp.maximum(x, jnp.maximum(dn, up))
    l_idx = jax.lax.broadcasted_iota(jnp.int32, (rows, 128), 1)
    right = jnp.where(l_idx < (W3 - 1) * C3,
                      pltpu.roll(mv, shift=128 - C3, axis=1), 0.0)          # col w+1
    left = jnp.where(l_idx >= C3,
                     pltpu.roll(mv, shift=C3, axis=1), 0.0)                 # col w-1
    mh = jnp.maximum(mv, jnp.maximum(right, left))                          # (B_t*H3, 128)

    # Global average pool (per image) + Linear (pool scale folded into fcw).
    rowsum = jnp.dot(rsum_ref[...], mh.astype(jnp.bfloat16),
                     preferred_element_type=jnp.float32)                    # (B_t, 128)
    logits = jnp.dot(rowsum.astype(jnp.bfloat16), fcw_ref[...],
                     preferred_element_type=jnp.float32) + fcb_ref[...]     # (B_t, 128)
    o_ref[...] = logits.astype(o_ref.dtype)


# ----------------------------------------------------------------------------
# Wrapper: single pallas_call, B_t images per grid step, lane-dense output slab.
# ----------------------------------------------------------------------------
@functools.partial(jax.jit, static_argnames=("inner_channels", "block_batch"))
def fused_forward(x_nchw, params, *, inner_channels, block_batch):
    w_stack, b_stack, ph1, ph2, rsum, fcw, fcb = params
    n, cin0, hh, ww = x_nchw.shape
    c, bt = inner_channels, block_batch
    assert ww == hh and hh * c == 128 and ww * cin0 <= 128
    assert bt % 8 == 0                              # (8,128)-aligned output block
    assert ph1.shape == (bt * hh // 2, bt * hh)     # params were built for this B_t

    n_pad = pl.cdiv(n, bt) * bt
    # NCHW -> NHWC -> lane layout (N, H, W*Cin); zero-pad lanes to 128 and batch to a
    # multiple of B_t; stack images along the sublane axis.
    x = jnp.transpose(x_nchw, (0, 2, 3, 1)).astype(jnp.float32).reshape(n, hh, ww * cin0)
    x = jnp.pad(x, ((0, n_pad - n), (0, 0), (0, 128 - ww * cin0)))
    x = x.reshape(n_pad * hh, 128)

    const2 = lambda b: (0, 0)
    in_specs = [
        pl.BlockSpec((bt * hh, 128), lambda b: (b, 0)),
        pl.BlockSpec(w_stack.shape, lambda b: (0, 0, 0)),
        pl.BlockSpec(b_stack.shape, lambda b: (0, 0, 0)),
        pl.BlockSpec(ph1.shape, const2),
        pl.BlockSpec(ph2.shape, const2),
        pl.BlockSpec(rsum.shape, const2),
        pl.BlockSpec(fcw.shape, const2),
        pl.BlockSpec(fcb.shape, const2),
    ]
    out = pl.pallas_call(
        functools.partial(simple_net_kernel, s=hh, c=c),
        out_shape=jax.ShapeDtypeStruct((n_pad, 128), jnp.float32),
        grid_spec=pltpu.PrefetchScalarGridSpec(
            num_scalar_prefetch=0,
            grid=(n_pad // bt,),
            in_specs=in_specs,
            out_specs=pl.BlockSpec((bt, 128), lambda b: (b, 0)),
        ),
        compiler_params=pltpu.CompilerParams(
            dimension_semantics=("parallel",)),
    )(x, w_stack, b_stack, ph1, ph2, rsum, fcw, fcb)

    # Lane-dense logits slab -> 10 classes -> softmax (part of the module's forward).
    return jax.nn.softmax(out[:n, :10], axis=-1)


# ----------------------------------------------------------------------------
# Parameters: raw (PyTorch-equivalent) params + folding into the kernel layout.
# ----------------------------------------------------------------------------
def make_raw_params(key, c):
    conv_cfg = [(3, c), (c, c), (c, c),
                (c, 2 * c), (2 * c, 2 * c), (2 * c, 2 * c),
                (2 * c, 4 * c), (4 * c, 4 * c), (4 * c, 4 * c)]
    conv_ws = []
    for (cin, cout) in conv_cfg:
        key, sub = jax.random.split(key)
        # kaiming_normal_(mode='fan_out', relu): std = sqrt(2 / (Cout*3*3)); HWIO layout.
        std = (2.0 / (cout * 9)) ** 0.5
        conv_ws.append(jax.random.normal(sub, (3, 3, cin, cout), jnp.float32) * std)
    key, sub = jax.random.split(key)
    fc_std = (2.0 / (4 * c + 10)) ** 0.5            # xavier_normal_, bias = 0
    fc_w = jax.random.normal(sub, (4 * c, 10), jnp.float32) * fc_std
    fc_b = jnp.zeros((10,), jnp.float32)
    return conv_ws, fc_w, fc_b


def fold_params(raw, c, s, bt):
    """Fold BN (inference stats), spatial padding and pooling into bf16 matrices."""
    conv_ws, fc_w, fc_b = raw
    eps = 1e-5
    bn_scale = 1.0 / ((1.0 + eps) ** 0.5)           # gamma=1, var=1, mean=0, beta=0
    # Input width of each conv AFTER the W-pool fold (layers 3 and 6 built at pooled W).
    spatial = [s, s, s, s // 2, s // 2, s // 2, s // 4, s // 4, s // 4]

    def row_mats(w, W):
        """(3,3,Cin,Cout) -> 3 block-tridiagonal (W*Cin, W*Cout) horizontal-tap mats."""
        cin, cout = w.shape[2], w.shape[3]
        u = jnp.arange(W)[:, None]                  # source column
        v = jnp.arange(W)[None, :]                  # output column
        mats = []
        for ky in range(3):
            M = jnp.zeros((W, cin, W, cout), jnp.float32)
            for kx in range(3):
                mask = (u - v == (kx - 1)).astype(jnp.float32)
                M = M + mask[:, None, :, None] * (w[ky, kx] * bn_scale)[None, :, None, :]
            mats.append(M.reshape(W * cin, W * cout))
        return mats

    def pw_mat(W, C):
        # W-direction pair-sum (0.25 lives in ph); (W*C, (W//2)*C).
        Wo = W // 2
        weq = ((jnp.arange(W)[:, None] // 2) == jnp.arange(Wo)[None, :]).astype(jnp.float32)
        return (weq[:, None, :, None] *
                jnp.eye(C, dtype=jnp.float32)[None, :, None, :]).reshape(W * C, Wo * C)

    big_ws = []
    for i, (w, W) in enumerate(zip(conv_ws, spatial)):
        mats = row_mats(w, W)
        if i == 0:
            # Pad K from W*Cin (=48) to 128; input lanes 48..127 are zero-padded too.
            mats = [jnp.pad(m, ((0, 128 - m.shape[0]), (0, 0))) for m in mats]
        elif i == 3:
            mats = [pw_mat(s, c) @ m for m in mats]            # fold stage-1 W-pool
        elif i == 6:
            mats = [pw_mat(s // 2, 2 * c) @ m for m in mats]   # fold stage-2 W-pool
        big_ws.append(jnp.concatenate(mats, axis=0))           # (384, 128)
    w_stack = jnp.stack(big_ws).astype(jnp.bfloat16)           # (9, 384, 128)

    # Folded BN shift beta - gamma*mean/sqrt(var+eps) = 0 at init.
    b_stack = jnp.zeros((9, 1, 128), jnp.float32)

    # H-direction avg-pool, block-diagonal over the bt stacked images (0.25 folded in).
    def ph_mat(H):
        ph = ((jnp.arange(H)[None, :] // 2) ==
              jnp.arange(H // 2)[:, None]).astype(jnp.float32) * 0.25
        return jnp.kron(jnp.eye(bt, dtype=jnp.float32), ph)
    ph1 = ph_mat(s).astype(jnp.bfloat16)                       # (bt*s/2, bt*s)
    ph2 = ph_mat(s // 2).astype(jnp.bfloat16)                  # (bt*s/4, bt*s/2)

    # Per-image row-sum for the global average pool head.
    Hf = Wf = s // 4
    rsum = jnp.kron(jnp.eye(bt, dtype=jnp.float32),
                    jnp.ones((1, Hf), jnp.float32)).astype(jnp.bfloat16)   # (bt, bt*Hf)

    # FC with 1/(Hf*Wf) global-pool scale and W-tiling folded, lane-padded to 128.
    fc_big = jnp.tile(fc_w, (Wf, 1)) * (1.0 / (Hf * Wf))       # (Wf*4c = 128, 10)
    fcw = jnp.zeros((Wf * 4 * c, 128), jnp.float32).at[:, :10].set(fc_big).astype(jnp.bfloat16)
    fcb = jnp.zeros((1, 128), jnp.float32).at[:, :10].set(fc_b)
    return (w_stack, b_stack, ph1, ph2, rsum, fcw, fcb)


# ----------------------------------------------------------------------------
# Pure-JAX reference (same raw weights) for the correctness check.
# ----------------------------------------------------------------------------
@jax.jit
def reference_forward(x_nchw, raw):
    conv_ws, fc_w, fc_b = raw
    eps = 1e-5
    scale = 1.0 / jnp.sqrt(jnp.float32(1.0 + eps))
    hi = jax.lax.Precision.HIGHEST

    def block(x, w):
        y = jax.lax.conv_general_dilated(
            x, w, window_strides=(1, 1), padding=((1, 1), (1, 1)),
            dimension_numbers=("NHWC", "HWIO", "NHWC"), precision=hi)
        return jnp.maximum(y * scale, 0.0)

    def avgpool(x):
        return jax.lax.reduce_window(x, 0.0, jax.lax.add,
                                     (1, 2, 2, 1), (1, 2, 2, 1), "VALID") * 0.25

    def maxpool3(x):
        return jax.lax.reduce_window(x, -jnp.inf, jax.lax.max,
                                     (1, 3, 3, 1), (1, 1, 1, 1),
                                     ((0, 0), (1, 1), (1, 1), (0, 0)))

    x = jnp.transpose(x_nchw, (0, 2, 3, 1)).astype(jnp.float32)
    for i in range(3):
        x = block(x, conv_ws[i])
    x = avgpool(x)
    for i in range(3, 6):
        x = block(x, conv_ws[i])
    x = avgpool(x)
    for i in range(6, 9):
        x = block(x, conv_ws[i])
    x = maxpool3(x)
    pooled = jnp.mean(x, axis=(1, 2))
    logits = jnp.dot(pooled, fc_w, precision=hi) + fc_b[None, :]
    return jax.nn.softmax(logits, axis=-1)


if __name__ == "__main__":
    key = jax.random.PRNGKey(0)
    key, pkey, xkey = jax.random.split(key, 3)

    inner_channels = 8          # "innter_channnels" in the PyTorch module
    batch, in_ch, spatial = 16, 3, 16
    block_batch = 8             # images per grid step -> 2 grid steps
                                # (use 16-32 on v6e for maximum MXU fill)

    raw = make_raw_params(pkey, inner_channels)
    params = fold_params(raw, inner_channels, spatial, block_batch)
    x = jax.random.normal(xkey, (batch, in_ch, spatial, spatial), jnp.float32)

    out = jax.block_until_ready(
        fused_forward(x, params, inner_channels=inner_channels,
                      block_batch=block_batch))

    assert out.shape == (batch, 10), out.shape
    assert bool(jnp.all(jnp.isfinite(out)))
    assert bool(jnp.allclose(jnp.sum(out, axis=-1), 1.0, atol=1e-5))

    ref = jax.block_until_ready(reference_forward(x, raw))
    assert bool(jnp.allclose(out, ref, atol=3e-2)), (out, ref)

    print("KERNEL_OK")
</pallas_src>

<mosaic_0001>
module attributes {stable_mosaic.version = 11 : i64} {
  func.func @simple_net_kernel(%arg0: i32, %arg1: memref<128x128xf32, #tpu.memory_space<vmem>>, %arg2: memref<9x384x128xbf16, #tpu.memory_space<vmem>>, %arg3: memref<9x1x128xf32, #tpu.memory_space<vmem>>, %arg4: memref<64x128xbf16, #tpu.memory_space<vmem>>, %arg5: memref<32x64xbf16, #tpu.memory_space<vmem>>, %arg6: memref<8x32xbf16, #tpu.memory_space<vmem>>, %arg7: memref<128x128xbf16, #tpu.memory_space<vmem>>, %arg8: memref<1x128xf32, #tpu.memory_space<vmem>>, %arg9: memref<8x128xf32, #tpu.memory_space<vmem>>) attributes {dimension_semantics = [#tpu.dimension_semantics<parallel>], iteration_bounds = array<i64: 2>, scalar_prefetch = 0 : i64, scratch_operands = 0 : i64, tpu.core_type = #tpu.core_type<tc>, window_params = [{transform_indices = @transform_0, window_bounds = array<i64: 128, 128>}, {pipeline_mode = #tpu.pipeline_mode<synchronous>, transform_indices = @transform_1, window_bounds = array<i64: 9, 384, 128>}, {pipeline_mode = #tpu.pipeline_mode<synchronous>, transform_indices = @transform_2, window_bounds = array<i64: 9, 1, 128>}, {pipeline_mode = #tpu.pipeline_mode<synchronous>, transform_indices = @transform_3, window_bounds = array<i64: 64, 128>}, {pipeline_mode = #tpu.pipeline_mode<synchronous>, transform_indices = @transform_4, window_bounds = array<i64: 32, 64>}, {pipeline_mode = #tpu.pipeline_mode<synchronous>, transform_indices = @transform_5, window_bounds = array<i64: 8, 32>}, {pipeline_mode = #tpu.pipeline_mode<synchronous>, transform_indices = @transform_6, window_bounds = array<i64: 128, 128>}, {pipeline_mode = #tpu.pipeline_mode<synchronous>, transform_indices = @transform_7, window_bounds = array<i64: 1, 128>}, {transform_indices = @transform_8, window_bounds = array<i64: 8, 128>}]} {
    %c0 = arith.constant 0 : index
    %c0_0 = arith.constant 0 : index
    %0 = vector.load %arg1[%c0, %c0_0] : memref<128x128xf32, #tpu.memory_space<vmem>>, vector<128x128xf32>
    %1 = tpu.iota {dimensions = array<i32: 0>} : vector<128x128xi32>
    %c15_i32 = arith.constant 15 : i32
    %2 = vector.broadcast %c15_i32 : i32 to vector<128x128xi32>
    %3 = arith.andi %1, %2 : vector<128x128xi32>
    %c0_i32 = arith.constant 0 : i32
    %4 = vector.broadcast %c0_i32 : i32 to vector<128x128xi32>
    %5 = arith.cmpi ne, %3, %4 : vector<128x128xi32>
    %c15_i32_1 = arith.constant 15 : i32
    %6 = vector.broadcast %c15_i32_1 : i32 to vector<128x128xi32>
    %7 = arith.cmpi ne, %3, %6 : vector<128x128xi32>
    %c1_i32 = arith.constant 1 : i32
    %8 = tpu.dynamic_rotate %0 by %c1_i32 dim 0 : vector<128x128xf32>, i32 -> vector<128x128xf32>
    %cst = arith.constant 0.000000e+00 : f32
    %9 = vector.broadcast %cst : f32 to vector<128x128xf32>
    %10 = arith.select %5, %8, %9 : vector<128x128xi1>, vector<128x128xf32>
    %c127_i32 = arith.constant 127 : i32
    %11 = tpu.dynamic_rotate %0 by %c127_i32 dim 0 : vector<128x128xf32>, i32 -> vector<128x128xf32>
    %cst_2 = arith.constant 0.000000e+00 : f32
    %12 = vector.broadcast %cst_2 : f32 to vector<128x128xf32>
    %13 = arith.select %7, %11, %12 : vector<128x128xi1>, vector<128x128xf32>
    %14 = arith.truncf %0 : vector<128x128xf32> to vector<128x128xbf16>
    %15 = arith.truncf %10 : vector<128x128xf32> to vector<128x128xbf16>
    %16 = arith.truncf %13 : vector<128x128xf32> to vector<128x128xbf16>
    %17 = tpu.concatenate %15, %14, %16 in 1 : vector<128x128xbf16>, vector<128x128xbf16>, vector<128x128xbf16> -> vector<128x384xbf16>
    %c0_3 = arith.constant 0 : index
    %c0_4 = arith.constant 0 : index
    %c0_5 = arith.constant 0 : index
    %18 = vector.load %arg2[%c0_3, %c0_4, %c0_5] : memref<9x384x128xbf16, #tpu.memory_space<vmem>>, vector<1x384x128xbf16>
    %19 = vector.shape_cast %18 : vector<1x384x128xbf16> to vector<384x128xbf16>
    %cst_6 = arith.constant dense<0.000000e+00> : vector<128x128xf32>
    %20 = tpu.matmul %17, %19, %cst_6 {dimension_numbers = #tpu.dot_dimension_numbers<[1], [0], [0], [1], [0, 0, 1, 1], [], []>} : vector<128x384xbf16>, vector<384x128xbf16>, vector<128x128xf32> -> vector<128x128xf32>
    %c0_7 = arith.constant 0 : index
    %c0_8 = arith.constant 0 : index
    %c0_9 = arith.constant 0 : index
    %21 = vector.load %arg3[%c0_7, %c0_8, %c0_9] : memref<9x1x128xf32, #tpu.memory_space<vmem>>, vector<1x1x128xf32>
    %22 = vector.shape_cast %21 : vector<1x1x128xf32> to vector<1x128xf32>
    %23 = vector.broadcast %22 : vector<1x128xf32> to vector<128x128xf32>
    %24 = arith.addf %20, %23 : vector<128x128xf32>
    %cst_10 = arith.constant 0.000000e+00 : f32
    %25 = vector.broadcast %cst_10 : f32 to vector<128x128xf32>
    %26 = arith.maximumf %24, %25 : vector<128x128xf32>
    %c1_i32_11 = arith.constant 1 : i32
    %27 = tpu.dynamic_rotate %26 by %c1_i32_11 dim 0 : vector<128x128xf32>, i32 -> vector<128x128xf32>
    %cst_12 = arith.constant 0.000000e+00 : f32
    %28 = vector.broadcast %cst_12 : f32 to vector<128x128xf32>
    %29 = arith.select %5, %27, %28 : vector<128x128xi1>, vector<128x128xf32>
    %c127_i32_13 = arith.constant 127 : i32
    %30 = tpu.dynamic_rotate %26 by %c127_i32_13 dim 0 : vector<128x128xf32>, i32 -> vector<128x128xf32>
    %cst_14 = arith.constant 0.000000e+00 : f32
    %31 = vector.broadcast %cst_14 : f32 to vector<128x128xf32>
    %32 = arith.select %7, %30, %31 : vector<128x128xi1>, vector<128x128xf32>
    %33 = arith.truncf %26 : vector<128x128xf32> to vector<128x128xbf16>
    %34 = arith.truncf %29 : vector<128x128xf32> to vector<128x128xbf16>
    %35 = arith.truncf %32 : vector<128x128xf32> to vector<128x128xbf16>
    %36 = tpu.concatenate %34, %33, %35 in 1 : vector<128x128xbf16>, vector<128x128xbf16>, vector<128x128xbf16> -> vector<128x384xbf16>
    %c1 = arith.constant 1 : index
    %c0_15 = arith.constant 0 : index
    %c0_16 = arith.constant 0 : index
    %37 = vector.load %arg2[%c1, %c0_15, %c0_16] : memref<9x384x128xbf16, #tpu.memory_space<vmem>>, vector<1x384x128xbf16>
    %38 = vector.shape_cast %37 : vector<1x384x128xbf16> to vector<384x128xbf16>
    %cst_17 = arith.constant dense<0.000000e+00> : vector<128x128xf32>
    %39 = tpu.matmul %36, %38, %cst_17 {dimension_numbers = #tpu.dot_dimension_numbers<[1], [0], [0], [1], [0, 0, 1, 1], [], []>} : vector<128x384xbf16>, vector<384x128xbf16>, vector<128x128xf32> -> vector<128x128xf32>
    %c1_18 = arith.constant 1 : index
    %c0_19 = arith.constant 0 : index
    %c0_20 = arith.constant 0 : index
    %40 = vector.load %arg3[%c1_18, %c0_19, %c0_20] : memref<9x1x128xf32, #tpu.memory_space<vmem>>, vector<1x1x128xf32>
    %41 = vector.shape_cast %40 : vector<1x1x128xf32> to vector<1x128xf32>
    %42 = vector.broadcast %41 : vector<1x128xf32> to vector<128x128xf32>
    %43 = arith.addf %39, %42 : vector<128x128xf32>
    %cst_21 = arith.constant 0.000000e+00 : f32
    %44 = vector.broadcast %cst_21 : f32 to vector<128x128xf32>
    %45 = arith.maximumf %43, %44 : vector<128x128xf32>
    %c1_i32_22 = arith.constant 1 : i32
    %46 = tpu.dynamic_rotate %45 by %c1_i32_22 dim 0 : vector<128x128xf32>, i32 -> vector<128x128xf32>
    %cst_23 = arith.constant 0.000000e+00 : f32
    %47 = vector.broadcast %cst_23 : f32 to vector<128x128xf32>
    %48 = arith.select %5, %46, %47 : vector<128x128xi1>, vector<128x128xf32>
    %c127_i32_24 = arith.constant 127 : i32
    %49 = tpu.dynamic_rotate %45 by %c127_i32_24 dim 0 : vector<128x128xf32>, i32 -> vector<128x128xf32>
    %cst_25 = arith.constant 0.000000e+00 : f32
    %50 = vector.broadcast %cst_25 : f32 to vector<128x128xf32>
    %51 = arith.select %7, %49, %50 : vector<128x128xi1>, vector<128x128xf32>
    %52 = arith.truncf %45 : vector<128x128xf32> to vector<128x128xbf16>
    %53 = arith.truncf %48 : vector<128x128xf32> to vector<128x128xbf16>
    %54 = arith.truncf %51 : vector<128x128xf32> to vector<128x128xbf16>
    %55 = tpu.concatenate %53, %52, %54 in 1 : vector<128x128xbf16>, vector<128x128xbf16>, vector<128x128xbf16> -> vector<128x384xbf16>
    %c2 = arith.constant 2 : index
    %c0_26 = arith.constant 0 : index
    %c0_27 = arith.constant 0 : index
    %56 = vector.load %arg2[%c2, %c0_26, %c0_27] : memref<9x384x128xbf16, #tpu.memory_space<vmem>>, vector<1x384x128xbf16>
    %57 = vector.shape_cast %56 : vector<1x384x128xbf16> to vector<384x128xbf16>
    %cst_28 = arith.constant dense<0.000000e+00> : vector<128x128xf32>
    %58 = tpu.matmul %55, %57, %cst_28 {dimension_numbers = #tpu.dot_dimension_numbers<[1], [0], [0], [1], [0, 0, 1, 1], [], []>} : vector<128x384xbf16>, vector<384x128xbf16>, vector<128x128xf32> -> vector<128x128xf32>
    %c2_29 = arith.constant 2 : index
    %c0_30 = arith.constant 0 : index
    %c0_31 = arith.constant 0 : index
    %59 = vector.load %arg3[%c2_29, %c0_30, %c0_31] : memref<9x1x128xf32, #tpu.memory_space<vmem>>, vector<1x1x128xf32>
    %60 = vector.shape_cast %59 : vector<1x1x128xf32> to vector<1x128xf32>
    %61 = vector.broadcast %60 : vector<1x128xf32> to vector<128x128xf32>
    %62 = arith.addf %58, %61 : vector<128x128xf32>
    %cst_32 = arith.constant 0.000000e+00 : f32
    %63 = vector.broadcast %cst_32 : f32 to vector<128x128xf32>
    %64 = arith.maximumf %62, %63 : vector<128x128xf32>
    %c0_33 = arith.constant 0 : index
    %c0_34 = arith.constant 0 : index
    %65 = vector.load %arg4[%c0_33, %c0_34] : memref<64x128xbf16, #tpu.memory_space<vmem>>, vector<64x128xbf16>
    %66 = arith.truncf %64 : vector<128x128xf32> to vector<128x128xbf16>
    %cst_35 = arith.constant dense<0.000000e+00> : vector<64x128xf32>
    %67 = tpu.matmul %65, %66, %cst_35 {dimension_numbers = #tpu.dot_dimension_numbers<[1], [0], [0], [1], [0, 0, 1, 1], [], []>} : vector<64x128xbf16>, vector<128x128xbf16>, vector<64x128xf32> -> vector<64x128xf32>
    %68 = tpu.iota {dimensions = array<i32: 0>} : vector<64x128xi32>
    %c7_i32 = arith.constant 7 : i32
    %69 = vector.broadcast %c7_i32 : i32 to vector<64x128xi32>
    %70 = arith.andi %68, %69 : vector<64x128xi32>
    %c0_i32_36 = arith.constant 0 : i32
    %71 = vector.broadcast %c0_i32_36 : i32 to vector<64x128xi32>
    %72 = arith.cmpi ne, %70, %71 : vector<64x128xi32>
    %c7_i32_37 = arith.constant 7 : i32
    %73 = vector.broadcast %c7_i32_37 : i32 to vector<64x128xi32>
    %74 = arith.cmpi ne, %70, %73 : vector<64x128xi32>
    %c1_i32_38 = arith.constant 1 : i32
    %75 = tpu.dynamic_rotate %67 by %c1_i32_38 dim 0 : vector<64x128xf32>, i32 -> vector<64x128xf32>
    %cst_39 = arith.constant 0.000000e+00 : f32
    %76 = vector.broadcast %cst_39 : f32 to vector<64x128xf32>
    %77 = arith.select %72, %75, %76 : vector<64x128xi1>, vector<64x128xf32>
    %c63_i32 = arith.constant 63 : i32
    %78 = tpu.dynamic_rotate %67 by %c63_i32 dim 0 : vector<64x128xf32>, i32 -> vector<64x128xf32>
    %cst_40 = arith.constant 0.000000e+00 : f32
    %79 = vector.broadcast %cst_40 : f32 to vector<64x128xf32>
    %80 = arith.select %74, %78, %79 : vector<64x128xi1>, vector<64x128xf32>
    %81 = arith.truncf %67 : vector<64x128xf32> to vector<64x128xbf16>
    %82 = arith.truncf %77 : vector<64x128xf32> to vector<64x128xbf16>
    %83 = arith.truncf %80 : vector<64x128xf32> to vector<64x128xbf16>
    %84 = tpu.concatenate %82, %81, %83 in 1 : vector<64x128xbf16>, vector<64x128xbf16>, vector<64x128xbf16> -> vector<64x384xbf16>
    %c3 = arith.constant 3 : index
    %c0_41 = arith.constant 0 : index
    %c0_42 = arith.constant 0 : index
    %85 = vector.load %arg2[%c3, %c0_41, %c0_42] : memref<9x384x128xbf16, #tpu.memory_space<vmem>>, vector<1x384x128xbf16>
    %86 = vector.shape_cast %85 : vector<1x384x128xbf16> to vector<384x128xbf16>
    %cst_43 = arith.constant dense<0.000000e+00> : vector<64x128xf32>
    %87 = tpu.matmul %84, %86, %cst_43 {dimension_numbers = #tpu.dot_dimension_numbers<[1], [0], [0], [1], [0, 0, 1, 1], [], []>} : vector<64x384xbf16>, vector<384x128xbf16>, vector<64x128xf32> -> vector<64x128xf32>
    %c3_44 = arith.constant 3 : index
    %c0_45 = arith.constant 0 : index
    %c0_46 = arith.constant 0 : index
    %88 = vector.load %arg3[%c3_44, %c0_45, %c0_46] : memref<9x1x128xf32, #tpu.memory_space<vmem>>, vector<1x1x128xf32>
    %89 = vector.shape_cast %88 : vector<1x1x128xf32> to vector<1x128xf32>
    %90 = vector.broadcast %89 : vector<1x128xf32> to vector<64x128xf32>
    %91 = arith.addf %87, %90 : vector<64x128xf32>
    %cst_47 = arith.constant 0.000000e+00 : f32
    %92 = vector.broadcast %cst_47 : f32 to vector<64x128xf32>
    %93 = arith.maximumf %91, %92 : vector<64x128xf32>
    %c1_i32_48 = arith.constant 1 : i32
    %94 = tpu.dynamic_rotate %93 by %c1_i32_48 dim 0 : vector<64x128xf32>, i32 -> vector<64x128xf32>
    %cst_49 = arith.constant 0.000000e+00 : f32
    %95 = vector.broadcast %cst_49 : f32 to vector<64x128xf32>
    %96 = arith.select %72, %94, %95 : vector<64x128xi1>, vector<64x128xf32>
    %c63_i32_50 = arith.constant 63 : i32
    %97 = tpu.dynamic_rotate %93 by %c63_i32_50 dim 0 : vector<64x128xf32>, i32 -> vector<64x128xf32>
    %cst_51 = arith.constant 0.000000e+00 : f32
    %98 = vector.broadcast %cst_51 : f32 to vector<64x128xf32>
    %99 = arith.select %74, %97, %98 : vector<64x128xi1>, vector<64x128xf32>
    %100 = arith.truncf %93 : vector<64x128xf32> to vector<64x128xbf16>
    %101 = arith.truncf %96 : vector<64x128xf32> to vector<64x128xbf16>
    %102 = arith.truncf %99 : vector<64x128xf32> to vector<64x128xbf16>
    %103 = tpu.concatenate %101, %100, %102 in 1 : vector<64x128xbf16>, vector<64x128xbf16>, vector<64x128xbf16> -> vector<64x384xbf16>
    %c4 = arith.constant 4 : index
    %c0_52 = arith.constant 0 : index
    %c0_53 = arith.constant 0 : index
    %104 = vector.load %arg2[%c4, %c0_52, %c0_53] : memref<9x384x128xbf16, #tpu.memory_space<vmem>>, vector<1x384x128xbf16>
    %105 = vector.shape_cast %104 : vector<1x384x128xbf16> to vector<384x128xbf16>
    %cst_54 = arith.constant dense<0.000000e+00> : vector<64x128xf32>
    %106 = tpu.matmul %103, %105, %cst_54 {dimension_numbers = #tpu.dot_dimension_numbers<[1], [0], [0], [1], [0, 0, 1, 1], [], []>} : vector<64x384xbf16>, vector<384x128xbf16>, vector<64x128xf32> -> vector<64x128xf32>
    %c4_55 = arith.constant 4 : index
    %c0_56 = arith.constant 0 : index
    %c0_57 = arith.constant 0 : index
    %107 = vector.load %arg3[%c4_55, %c0_56, %c0_57] : memref<9x1x128xf32, #tpu.memory_space<vmem>>, vector<1x1x128xf32>
    %108 = vector.shape_cast %107 : vector<1x1x128xf32> to vector<1x128xf32>
    %109 = vector.broadcast %108 : vector<1x128xf32> to vector<64x128xf32>
    %110 = arith.addf %106, %109 : vector<64x128xf32>
    %cst_58 = arith.constant 0.000000e+00 : f32
    %111 = vector.broadcast %cst_58 : f32 to vector<64x128xf32>
    %112 = arith.maximumf %110, %111 : vector<64x128xf32>
    %c1_i32_59 = arith.constant 1 : i32
    %113 = tpu.dynamic_rotate %112 by %c1_i32_59 dim 0 : vector<64x128xf32>, i32 -> vector<64x128xf32>
    %cst_60 = arith.constant 0.000000e+00 : f32
    %114 = vector.broadcast %cst_60 : f32 to vector<64x128xf32>
    %115 = arith.select %72, %113, %114 : vector<64x128xi1>, vector<64x128xf32>
    %c63_i32_61 = arith.constant 63 : i32
    %116 = tpu.dynamic_rotate %112 by %c63_i32_61 dim 0 : vector<64x128xf32>, i32 -> vector<64x128xf32>
    %cst_62 = arith.constant 0.000000e+00 : f32
    %117 = vector.broadcast %cst_62 : f32 to vector<64x128xf32>
    %118 = arith.select %74, %116, %117 : vector<64x128xi1>, vector<64x128xf32>
    %119 = arith.truncf %112 : vector<64x128xf32> to vector<64x128xbf16>
    %120 = arith.truncf %115 : vector<64x128xf32> to vector<64x128xbf16>
    %121 = arith.truncf %118 : vector<64x128xf32> to vector<64x128xbf16>
    %122 = tpu.concatenate %120, %119, %121 in 1 : vector<64x128xbf16>, vector<64x128xbf16>, vector<64x128xbf16> -> vector<64x384xbf16>
    %c5 = arith.constant 5 : index
    %c0_63 = arith.constant 0 : index
    %c0_64 = arith.constant 0 : index
    %123 = vector.load %arg2[%c5, %c0_63, %c0_64] : memref<9x384x128xbf16, #tpu.memory_space<vmem>>, vector<1x384x128xbf16>
    %124 = vector.shape_cast %123 : vector<1x384x128xbf16> to vector<384x128xbf16>
    %cst_65 = arith.constant dense<0.000000e+00> : vector<64x128xf32>
    %125 = tpu.matmul %122, %124, %cst_65 {dimension_numbers = #tpu.dot_dimension_numbers<[1], [0], [0], [1], [0, 0, 1, 1], [], []>} : vector<64x384xbf16>, vector<384x128xbf16>, vector<64x128xf32> -> vector<64x128xf32>
    %c5_66 = arith.constant 5 : index
    %c0_67 = arith.constant 0 : index
    %c0_68 = arith.constant 0 : index
    %126 = vector.load %arg3[%c5_66, %c0_67, %c0_68] : memref<9x1x128xf32, #tpu.memory_space<vmem>>, vector<1x1x128xf32>
    %127 = vector.shape_cast %126 : vector<1x1x128xf32> to vector<1x128xf32>
    %128 = vector.broadcast %127 : vector<1x128xf32> to vector<64x128xf32>
    %129 = arith.addf %125, %128 : vector<64x128xf32>
    %cst_69 = arith.constant 0.000000e+00 : f32
    %130 = vector.broadcast %cst_69 : f32 to vector<64x128xf32>
    %131 = arith.maximumf %129, %130 : vector<64x128xf32>
    %c0_70 = arith.constant 0 : index
    %c0_71 = arith.constant 0 : index
    %132 = vector.load %arg5[%c0_70, %c0_71] : memref<32x64xbf16, #tpu.memory_space<vmem>>, vector<32x64xbf16>
    %133 = arith.truncf %131 : vector<64x128xf32> to vector<64x128xbf16>
    %cst_72 = arith.constant dense<0.000000e+00> : vector<32x128xf32>
    %134 = tpu.matmul %132, %133, %cst_72 {dimension_numbers = #tpu.dot_dimension_numbers<[1], [0], [0], [1], [0, 0, 1, 1], [], []>} : vector<32x64xbf16>, vector<64x128xbf16>, vector<32x128xf32> -> vector<32x128xf32>
    %135 = tpu.iota {dimensions = array<i32: 0>} : vector<32x128xi32>
    %c3_i32 = arith.constant 3 : i32
    %136 = vector.broadcast %c3_i32 : i32 to vector<32x128xi32>
    %137 = arith.andi %135, %136 : vector<32x128xi32>
    %c0_i32_73 = arith.constant 0 : i32
    %138 = vector.broadcast %c0_i32_73 : i32 to vector<32x128xi32>
    %139 = arith.cmpi ne, %137, %138 : vector<32x128xi32>
    %c3_i32_74 = arith.constant 3 : i32
    %140 = vector.broadcast %c3_i32_74 : i32 to vector<32x128xi32>
    %141 = arith.cmpi ne, %137, %140 : vector<32x128xi32>
    %c1_i32_75 = arith.constant 1 : i32
    %142 = tpu.dynamic_rotate %134 by %c1_i32_75 dim 0 : vector<32x128xf32>, i32 -> vector<32x128xf32>
    %cst_76 = arith.constant 0.000000e+00 : f32
    %143 = vector.broadcast %cst_76 : f32 to vector<32x128xf32>
    %144 = arith.select %139, %142, %143 : vector<32x128xi1>, vector<32x128xf32>
    %c31_i32 = arith.constant 31 : i32
    %145 = tpu.dynamic_rotate %134 by %c31_i32 dim 0 : vector<32x128xf32>, i32 -> vector<32x128xf32>
    %cst_77 = arith.constant 0.000000e+00 : f32
    %146 = vector.broadcast %cst_77 : f32 to vector<32x128xf32>
    %147 = arith.select %141, %145, %146 : vector<32x128xi1>, vector<32x128xf32>
    %148 = arith.truncf %134 : vector<32x128xf32> to vector<32x128xbf16>
    %149 = arith.truncf %144 : vector<32x128xf32> to vector<32x128xbf16>
    %150 = arith.truncf %147 : vector<32x128xf32> to vector<32x128xbf16>
    %151 = tpu.concatenate %149, %148, %150 in 1 : vector<32x128xbf16>, vector<32x128xbf16>, vector<32x128xbf16> -> vector<32x384xbf16>
    %c6 = arith.constant 6 : index
    %c0_78 = arith.constant 0 : index
    %c0_79 = arith.constant 0 : index
    %152 = vector.load %arg2[%c6, %c0_78, %c0_79] : memref<9x384x128xbf16, #tpu.memory_space<vmem>>, vector<1x384x128xbf16>
    %153 = vector.shape_cast %152 : vector<1x384x128xbf16> to vector<384x128xbf16>
    %cst_80 = arith.constant dense<0.000000e+00> : vector<32x128xf32>
    %154 = tpu.matmul %151, %153, %cst_80 {dimension_numbers = #tpu.dot_dimension_numbers<[1], [0], [0], [1], [0, 0, 1, 1], [], []>} : vector<32x384xbf16>, vector<384x128xbf16>, vector<32x128xf32> -> vector<32x128xf32>
    %c6_81 = arith.constant 6 : index
    %c0_82 = arith.constant 0 : index
    %c0_83 = arith.constant 0 : index
    %155 = vector.load %arg3[%c6_81, %c0_82, %c0_83] : memref<9x1x128xf32, #tpu.memory_space<vmem>>, vector<1x1x128xf32>
    %156 = vector.shape_cast %155 : vector<1x1x128xf32> to vector<1x128xf32>
    %157 = vector.broadcast %156 : vector<1x128xf32> to vector<32x128xf32>
    %158 = arith.addf %154, %157 : vector<32x128xf32>
    %cst_84 = arith.constant 0.000000e+00 : f32
    %159 = vector.broadcast %cst_84 : f32 to vector<32x128xf32>
    %160 = arith.maximumf %158, %159 : vector<32x128xf32>
    %c1_i32_85 = arith.constant 1 : i32
    %161 = tpu.dynamic_rotate %160 by %c1_i32_85 dim 0 : vector<32x128xf32>, i32 -> vector<32x128xf32>
    %cst_86 = arith.constant 0.000000e+00 : f32
    %162 = vector.broadcast %cst_86 : f32 to vector<32x128xf32>
    %163 = arith.select %139, %161, %162 : vector<32x128xi1>, vector<32x128xf32>
    %c31_i32_87 = arith.constant 31 : i32
    %164 = tpu.dynamic_rotate %160 by %c31_i32_87 dim 0 : vector<32x128xf32>, i32 -> vector<32x128xf32>
    %cst_88 = arith.constant 0.000000e+00 : f32
    %165 = vector.broadcast %cst_88 : f32 to vector<32x128xf32>
    %166 = arith.select %141, %164, %165 : vector<32x128xi1>, vector<32x128xf32>
    %167 = arith.truncf %160 : vector<32x128xf32> to vector<32x128xbf16>
    %168 = arith.truncf %163 : vector<32x128xf32> to vector<32x128xbf16>
    %169 = arith.truncf %166 : vector<32x128xf32> to vector<32x128xbf16>
    %170 = tpu.concatenate %168, %167, %169 in 1 : vector<32x128xbf16>, vector<32x128xbf16>, vector<32x128xbf16> -> vector<32x384xbf16>
    %c7 = arith.constant 7 : index
    %c0_89 = arith.constant 0 : index
    %c0_90 = arith.constant 0 : index
    %171 = vector.load %arg2[%c7, %c0_89, %c0_90] : memref<9x384x128xbf16, #tpu.memory_space<vmem>>, vector<1x384x128xbf16>
    %172 = vector.shape_cast %171 : vector<1x384x128xbf16> to vector<384x128xbf16>
    %cst_91 = arith.constant dense<0.000000e+00> : vector<32x128xf32>
    %173 = tpu.matmul %170, %172, %cst_91 {dimension_numbers = #tpu.dot_dimension_numbers<[1], [0], [0], [1], [0, 0, 1, 1], [], []>} : vector<32x384xbf16>, vector<384x128xbf16>, vector<32x128xf32> -> vector<32x128xf32>
    %c7_92 = arith.constant 7 : index
    %c0_93 = arith.constant 0 : index
    %c0_94 = arith.constant 0 : index
    %174 = vector.load %arg3[%c7_92, %c0_93, %c0_94] : memref<9x1x128xf32, #tpu.memory_space<vmem>>, vector<1x1x128xf32>
    %175 = vector.shape_cast %174 : vector<1x1x128xf32> to vector<1x128xf32>
    %176 = vector.broadcast %175 : vector<1x128xf32> to vector<32x128xf32>
    %177 = arith.addf %173, %176 : vector<32x128xf32>
    %cst_95 = arith.constant 0.000000e+00 : f32
    %178 = vector.broadcast %cst_95 : f32 to vector<32x128xf32>
    %179 = arith.maximumf %177, %178 : vector<32x128xf32>
    %c1_i32_96 = arith.constant 1 : i32
    %180 = tpu.dynamic_rotate %179 by %c1_i32_96 dim 0 : vector<32x128xf32>, i32 -> vector<32x128xf32>
    %cst_97 = arith.constant 0.000000e+00 : f32
    %181 = vector.broadcast %cst_97 : f32 to vector<32x128xf32>
    %182 = arith.select %139, %180, %181 : vector<32x128xi1>, vector<32x128xf32>
    %c31_i32_98 = arith.constant 31 : i32
    %183 = tpu.dynamic_rotate %179 by %c31_i32_98 dim 0 : vector<32x128xf32>, i32 -> vector<32x128xf32>
    %cst_99 = arith.constant 0.000000e+00 : f32
    %184 = vector.broadcast %cst_99 : f32 to vector<32x128xf32>
    %185 = arith.select %141, %183, %184 : vector<32x128xi1>, vector<32x128xf32>
    %186 = arith.truncf %179 : vector<32x128xf32> to vector<32x128xbf16>
    %187 = arith.truncf %182 : vector<32x128xf32> to vector<32x128xbf16>
    %188 = arith.truncf %185 : vector<32x128xf32> to vector<32x128xbf16>
    %189 = tpu.concatenate %187, %186, %188 in 1 : vector<32x128xbf16>, vector<32x128xbf16>, vector<32x128xbf16> -> vector<32x384xbf16>
    %c8 = arith.constant 8 : index
    %c0_100 = arith.constant 0 : index
    %c0_101 = arith.constant 0 : index
    %190 = vector.load %arg2[%c8, %c0_100, %c0_101] : memref<9x384x128xbf16, #tpu.memory_space<vmem>>, vector<1x384x128xbf16>
    %191 = vector.shape_cast %190 : vector<1x384x128xbf16> to vector<384x128xbf16>
    %cst_102 = arith.constant dense<0.000000e+00> : vector<32x128xf32>
    %192 = tpu.matmul %189, %191, %cst_102 {dimension_numbers = #tpu.dot_dimension_numbers<[1], [0], [0], [1], [0, 0, 1, 1], [], []>} : vector<32x384xbf16>, vector<384x128xbf16>, vector<32x128xf32> -> vector<32x128xf32>
    %c8_103 = arith.constant 8 : index
    %c0_104 = arith.constant 0 : index
    %c0_105 = arith.constant 0 : index
    %193 = vector.load %arg3[%c8_103, %c0_104, %c0_105] : memref<9x1x128xf32, #tpu.memory_space<vmem>>, vector<1x1x128xf32>
    %194 = vector.shape_cast %193 : vector<1x1x128xf32> to vector<1x128xf32>
    %195 = vector.broadcast %194 : vector<1x128xf32> to vector<32x128xf32>
    %196 = arith.addf %192, %195 : vector<32x128xf32>
    %cst_106 = arith.constant 0.000000e+00 : f32
    %197 = vector.broadcast %cst_106 : f32 to vector<32x128xf32>
    %198 = arith.maximumf %196, %197 : vector<32x128xf32>
    %c1_i32_107 = arith.constant 1 : i32
    %199 = tpu.dynamic_rotate %198 by %c1_i32_107 dim 0 : vector<32x128xf32>, i32 -> vector<32x128xf32>
    %cst_108 = arith.constant 0.000000e+00 : f32
    %200 = vector.broadcast %cst_108 : f32 to vector<32x128xf32>
    %201 = arith.select %139, %199, %200 : vector<32x128xi1>, vector<32x128xf32>
    %c31_i32_109 = arith.constant 31 : i32
    %202 = tpu.dynamic_rotate %198 by %c31_i32_109 dim 0 : vector<32x128xf32>, i32 -> vector<32x128xf32>
    %cst_110 = arith.constant 0.000000e+00 : f32
    %203 = vector.broadcast %cst_110 : f32 to vector<32x128xf32>
    %204 = arith.select %141, %202, %203 : vector<32x128xi1>, vector<32x128xf32>
    %205 = arith.maximumf %201, %204 : vector<32x128xf32>
    %206 = arith.maximumf %198, %205 : vector<32x128xf32>
    %207 = tpu.iota {dimensions = array<i32: 1>} : vector<32x128xi32>
    %c96_i32 = arith.constant 96 : i32
    %208 = vector.broadcast %c96_i32 : i32 to vector<32x128xi32>
    %209 = arith.cmpi slt, %207, %208 : vector<32x128xi32>
    %c96_i32_111 = arith.constant 96 : i32
    %210 = tpu.dynamic_rotate %206 by %c96_i32_111 dim 1 : vector<32x128xf32>, i32 -> vector<32x128xf32>
    %cst_112 = arith.constant 0.000000e+00 : f32
    %211 = vector.broadcast %cst_112 : f32 to vector<32x128xf32>
    %212 = arith.select %209, %210, %211 : vector<32x128xi1>, vector<32x128xf32>
    %c32_i32 = arith.constant 32 : i32
    %213 = vector.broadcast %c32_i32 : i32 to vector<32x128xi32>
    %214 = arith.cmpi sge, %207, %213 : vector<32x128xi32>
    %c32_i32_113 = arith.constant 32 : i32
    %215 = tpu.dynamic_rotate %206 by %c32_i32_113 dim 1 : vector<32x128xf32>, i32 -> vector<32x128xf32>
    %cst_114 = arith.constant 0.000000e+00 : f32
    %216 = vector.broadcast %cst_114 : f32 to vector<32x128xf32>
    %217 = arith.select %214, %215, %216 : vector<32x128xi1>, vector<32x128xf32>
    %218 = arith.maximumf %212, %217 : vector<32x128xf32>
    %219 = arith.maximumf %206, %218 : vector<32x128xf32>
    %c0_115 = arith.constant 0 : index
    %c0_116 = arith.constant 0 : index
    %220 = vector.load %arg6[%c0_115, %c0_116] : memref<8x32xbf16, #tpu.memory_space<vmem>>, vector<8x32xbf16>
    %221 = arith.truncf %219 : vector<32x128xf32> to vector<32x128xbf16>
    %cst_117 = arith.constant dense<0.000000e+00> : vector<8x128xf32>
    %222 = tpu.matmul %220, %221, %cst_117 {dimension_numbers = #tpu.dot_dimension_numbers<[1], [0], [0], [1], [0, 0, 1, 1], [], []>} : vector<8x32xbf16>, vector<32x128xbf16>, vector<8x128xf32> -> vector<8x128xf32>
    %223 = arith.truncf %222 : vector<8x128xf32> to vector<8x128xbf16>
    %c0_118 = arith.constant 0 : index
    %c0_119 = arith.constant 0 : index
    %224 = vector.load %arg7[%c0_118, %c0_119] : memref<128x128xbf16, #tpu.memory_space<vmem>>, vector<128x128xbf16>
    %cst_120 = arith.constant dense<0.000000e+00> : vector<8x128xf32>
    %225 = tpu.matmul %223, %224, %cst_120 {dimension_numbers = #tpu.dot_dimension_numbers<[1], [0], [0], [1], [0, 0, 1, 1], [], []>} : vector<8x128xbf16>, vector<128x128xbf16>, vector<8x128xf32> -> vector<8x128xf32>
    %c0_121 = arith.constant 0 : index
    %c0_122 = arith.constant 0 : index
    %226 = vector.load %arg8[%c0_121, %c0_122] : memref<1x128xf32, #tpu.memory_space<vmem>>, vector<1x128xf32>
    %227 = vector.broadcast %226 : vector<1x128xf32> to vector<8x128xf32>
    %228 = arith.addf %225, %227 : vector<8x128xf32>
    %c0_123 = arith.constant 0 : index
    %c0_124 = arith.constant 0 : index
    %229 = vector.load %arg9[%c0_123, %c0_124] : memref<8x128xf32, #tpu.memory_space<vmem>>, vector<8x128xf32>
    tpu.vector_store %arg9[%c0_123, %c0_124], %228 {strides = array<i32>} : memref<8x128xf32, #tpu.memory_space<vmem>>, vector<8x128xf32>,
    return
  }
  func.func @transform_0(%arg0: i32) -> (i32, i32) {
    %c0_i32 = arith.constant 0 : i32
    %c0_i32_0 = arith.constant 0 : i32
    return %arg0, %c0_i32 : i32, i32
  }
  func.func @transform_1(%arg0: i32) -> (i32, i32, i32) {
    %c0_i32 = arith.constant 0 : i32
    %c0_i32_0 = arith.constant 0 : i32
    %c0_i32_1 = arith.constant 0 : i32
    %c0_i32_2 = arith.constant 0 : i32
    return %c0_i32, %c0_i32_0, %c0_i32_1 : i32, i32, i32
  }
  func.func @transform_2(%arg0: i32) -> (i32, i32, i32) {
    %c0_i32 = arith.constant 0 : i32
    %c0_i32_0 = arith.constant 0 : i32
    %c0_i32_1 = arith.constant 0 : i32
    %c0_i32_2 = arith.constant 0 : i32
    return %c0_i32, %c0_i32_0, %c0_i32_1 : i32, i32, i32
  }
  func.func @transform_3(%arg0: i32) -> (i32, i32) {
    %c0_i32 = arith.constant 0 : i32
    %c0_i32_0 = arith.constant 0 : i32
    %c0_i32_1 = arith.constant 0 : i32
    return %c0_i32, %c0_i32_0 : i32, i32
  }
  func.func @transform_4(%arg0: i32) -> (i32, i32) {
    %c0_i32 = arith.constant 0 : i32
    %c0_i32_0 = arith.constant 0 : i32
    %c0_i32_1 = arith.constant 0 : i32
    return %c0_i32, %c0_i32_0 : i32, i32
  }
  func.func @transform_5(%arg0: i32) -> (i32, i32) {
    %c0_i32 = arith.constant 0 : i32
    %c0_i32_0 = arith.constant 0 : i32
    %c0_i32_1 = arith.constant 0 : i32
    return %c0_i32, %c0_i32_0 : i32, i32
  }
  func.func @transform_6(%arg0: i32) -> (i32, i32) {
    %c0_i32 = arith.constant 0 : i32
    %c0_i32_0 = arith.constant 0 : i32
    %c0_i32_1 = arith.constant 0 : i32
    return %c0_i32, %c0_i32_0 : i32, i32
  }
  func.func @transform_7(%arg0: i32) -> (i32, i32) {
    %c0_i32 = arith.constant 0 : i32
    %c0_i32_0 = arith.constant 0 : i32
    %c0_i32_1 = arith.constant 0 : i32
    return %c0_i32, %c0_i32_0 : i32, i32
  }
  func.func @transform_8(%arg0: i32) -> (i32, i32) {
    %c0_i32 = arith.constant 0 : i32
    %c0_i32_0 = arith.constant 0 : i32
    return %arg0, %c0_i32 : i32, i32
  }
}

</mosaic_0001>

<bundles_post_ra>
// kernel: fused_forward.1
= control target key start
LH: loop header
LB: loop body
LE: loop exit
PB: predicated region body
PF: predicated region fallthrough
CT: control target
= control target key end

     0   :  { %s6723_s27 = smov 0   ;;  %s8969_s0 = inlined_call_operand.vmem [shape: f32[256,128], index: 0, kind: input, shape index: {}]   ;;  %s8970_s1 = inlined_call_operand.vmem [shape: bf16[9,384,128], index: 1, kind: input, shape index: {}]   ;;  %s8971_s2 = inlined_call_operand.vmem [shape: f32[9,1,128], index: 2, kind: input, shape index: {}]   ;;  %s8972_s3 = inlined_call_operand.vmem [shape: bf16[64,128], index: 3, kind: input, shape index: {}]   ;;  %s8973_s4 = inlined_call_operand.vmem [shape: bf16[32,64], index: 4, kind: input, shape index: {}]   ;;  %s8974_s5 = inlined_call_operand.vmem [shape: bf16[8,32], index: 5, kind: input, shape index: {}]   ;;  %s8975_s6 = inlined_call_operand.vmem [shape: bf16[128,128], index: 6, kind: input, shape index: {}]   ;;  %s8976_s7 = inlined_call_operand.vmem [shape: f32[1,128], index: 7, kind: input, shape index: {}]   ;;  %s8977_s8 = inlined_call_operand.vmem [shape: f32[16,128], index: 8, kind: output, shape index: {}]  }
   0x1 LB: > { %s6729_s28 = sadd.s32 4294967295, %s6671_s27   ;;  %p4677_p0 = scmp.ge.s32.totalorder %s6671_s27, 1  ;;  %s6671_s27 = sphi %s6723_s27, %s18_s27  }
   0x2   : > { %p263_p1 = scmp.lt.s32.totalorder %s6671_s27, 3 }
   0x4   : > { %p264_p2 = pnand %p4677_p0, %p263_p1 }
   0x6   : > { %267 = sbr.rel (%p264_p2) target bundleno = 3382 (0xd36), region = 52 }
   0xd   : > { %v6435_v0 = vld [vmem:[%s8970_s1 + $0x40] sm:$0xff]   ;;  %v6437_v2 = vld [vmem:[%s8970_s1 + $0x48] sm:$0xff]   ;;  %v6440_v5 = vld [vmem:[%s8970_s1 + $0x50] sm:$0xff]   ;;  %s4678_s21 = sshll.u32 %s6729_s28, 4  ;;  %v8990_v11 = vlaneseq  ;;  %vm6673_vm5 = vmmov 1   ;;  %s6675_s14 = smov 96  }
   0xe   : > { %v6436_v1 = vld [vmem:[%s8970_s1] sm:$0xff]   ;;  %5570 = vmatprep.subr.bf16.mxu0 %v6435_v0  ;;  %v6439_v4 = vld [vmem:[%s8970_s1 + $0x8] sm:$0xff]   ;;  %v6442_v7 = vld [vmem:[%s8970_s1 + $0x10] sm:$0xff]   ;;  %p297_p3 = scmp.lt.s32.totalorder %s4678_s21, 31  ;;  %s6676_s15 = smov 32  }
   0xf   : > { %5571 = vmatpush3.bf16.msra.mxu0 %v6436_v1  ;;  %v6438_v3 = vld [vmem:[%s8970_s1 + $0x80] sm:$0xff]   ;;  %v6441_v6 = vld [vmem:[%s8970_s1 + $0x88] sm:$0xff]   ;;  %v6443_v8 = vld [vmem:[%s8970_s1 + $0x58] sm:$0xff]   ;;  %v6777_v15 = vshrl.u32 %v8990_v11, 7  ;;  %p302_p4 = scmp.lt.s32.totalorder %s6729_s28, 1 }
  0x10   : > { %5572 = vmatprep.subr.bf16.mxu0 %v6437_v2  ;;  %6110 = vmatprep.subr.bf16.mxu1 %v6438_v3  ;;  %v6444_v9 = vld [vmem:[%s8970_s1 + $0x90] sm:$0xff]   ;;  %v6445_v10 = vld [vmem:[%s8970_s1 + $0x18] sm:$0xff]   ;;  %v6446_v12 = vld [vmem:[%s8970_s1 + $0x60] sm:$0xff]   ;;  %s9289_s21 = smov (!%p297_p3, %s4678_s21), 31 }
  0x11   : > { %6111 = vmatpush3.bf16.msra.mxu1 %v6438_v3  ;;  %v6447_v13 = vld [vmem:[%s8970_s1 + $0x98] sm:$0xff]   ;;  %v6448_v14 = vld [vmem:[%s8970_s1 + $0x20] sm:$0xff]   ;;  %v6449_v17 = vld [vmem:[%s8970_s1 + $0x68] sm:$0xff]   ;;  %s4679_s20 = sshll.u32 %s9289_s21, 3  ;;  %v6789_v19 = vadd.s32 8, %v6777_v15  ;;  %v6795_v21 = vadd.s32 24, %v6777_v15 }
  0x12   : > { %6112 = vmatprep.subr.bf16.mxu1 %v6441_v6  ;;  %v6450_v16 = vld [vmem:[%s8970_s1 + $0xa0] sm:$0xff]   ;;  %v6451_v18 = vld [vmem:[%s8970_s1 + $0x28] sm:$0xff]   ;;  %v6452_v22 = vld [vmem:[%s8970_s1 + $0x70] sm:$0xff]   ;;  %s6803_s9 = scalar_lea.vmem %s8969_s0, %s4679_s20  ;;  %v340_v23 = vand.u32 15, %v6777_v15  ;;  %vm8979_vm0 = vcmp.lt.s32.totalorder %v6777_v15, 1  ;;  %vm8978_vm1 = vcmp.lt.s32.totalorder %v6777_v15, 7 }
  0x13   : > { %5573 = vmatpush3.bf16.msra.mxu0 %v6439_v4  ;;  %v6453_v20 = vld [vmem:[%s8970_s1 + $0xa8] sm:$0xff]   ;;  %9006 = vst [vmem:[#allocation2_spill] sm:$0xff] %v6795_v21  ;;  %v6454_v24 = vld [vmem:[%s8970_s1 + $0x30] sm:$0xff]   ;;  %v6455_v25 = vld [vmem:[%s8970_s1 + $0x78] sm:$0xff]   ;;  %v341_v27 = vand.u32 15, %v6789_v19  ;;  %v343_v31 = vand.u32 15, %v6795_v21 }
  0x14   : > { %5574 = vmatprep.subr.bf16.mxu0 %v6440_v5  ;;  %v6456_v26 = vld [vmem:[%s8970_s1 + $0xb0] sm:$0xff]   ;;  %v6818_v28 = vld [vmem:[%s6803_s9] sm:$0xff]  ;;  %v6821_v29 = vld [vmem:[%s6803_s9 + $0x8] sm:$0xff]  ;;  %v6829_v32 = vadd.s32 40, %v6777_v15  ;;  %vm6837_vm2 = vcmp.ne.s32.totalorder %v340_v23, 0  ;;  %v6844_v41 = vadd.s32 16, %v6777_v15 }
  0x15   : > { %6113 = vmatpush3.bf16.msra.mxu1 %v6441_v6  ;;  %v6824_v30 = vld [vmem:[%s6803_s9 + $0x78] sm:$0xff]  ;;  %v388_v33 = vrot.slane %v6818_v28, 7  ;;  %v389_v34 = vrot.slane %v6821_v29, 7  ;;  %v437_v35 = vrot.slane %v6818_v28, 1  ;;  %v438_v36 = vrot.slane %v6821_v29, 1  ;;  %v309_v40 = vld [vmem:[%s6803_s9 + $0x10] sm:$0xff]  ;;  %vm6901_vm7 = vmpackc.low %vm6673_vm5, %vm6837_vm2 }
  0x16   : > { %6114 = vmatprep.subr.bf16.mxu1 %v6444_v9  ;;  %9007 = vst [vmem:[#allocation3_spill] sm:$0xff] %v6829_v32  ;;  %v486_v37 = vpack.c.bf16 %v6821_v29, %v6818_v28  ;;  %v403_v39 = vrot.slane %v6824_v30, 7  ;;  %vm6848_vm3 = vcmp.ne.s32.totalorder %v341_v27, 15  ;;  %v439_v44 = vrot.slane %v309_v40, 1  ;;  %v6857_v46 = vld [vmem:[%s6803_s9 + $0x18] sm:$0xff]  ;;  %v6860_v47 = vld [vmem:[%s6803_s9 + $0x20] sm:$0xff] }
  0x17   : > { %5575 = vmatpush3.bf16.msra.mxu0 %v6442_v7  ;;  %v419_v42 = vsel %vm8979_vm0, %v388_v33, %v389_v34  ;;  %v468_v45 = vsel %vm8978_vm1, %v437_v35, %v438_v36  ;;  %v6457_v48 = vld [vmem:[%s8970_s1 + $0x38] sm:$0xff]   ;;  %v440_v51 = vrot.slane %v6857_v46, 1  ;;  %v441_v52 = vrot.slane %v6860_v47, 1  ;;  %v6884_v56 = vld [vmem:[%s6803_s9 + $0x30] sm:$0xff]  ;;  %vm6890_vm6 = vmpackc.low %vm6848_vm3, %vm6673_vm5  ;;  %s9291_s28 = smov (!%p302_p4, %s6729_s28), 1 }
  0x18   : > { %5576 = vmatprep.subr.bf16.mxu0 %v6443_v8  ;;  %v420_v49 = vsel %vm8979_vm0, %v403_v39, %v388_v33  ;;  %v6458_v50 = vld [vmem:[%s8970_s1 + $0xb8] sm:$0xff]   ;;  %741 = vmatprep.mubr.bf16.mxu0 %v486_v37  ;;  %v467_v53 = vsel %vm8978_vm1, %v438_v36, %v439_v44  ;;  %vm6876_vm4 = vcmp.ne.s32.totalorder %v343_v31, 15  ;;  %v6881_v55 = vadd.s32 32, %v6777_v15  ;;  %v6896_v63 = vld [vmem:[%s6803_s9 + $0x28] sm:$0xff]  ;;  %v6917_v8 = vld [vmem:[%s6803_s9 + $0x40] sm:$0xff] }
  0x19   : > { %6115 = vmatpush3.bf16.msra.mxu1 %v6444_v9  ;;  %v345_v57 = vand.u32 15, %v6829_v32  ;;  %v4707_v58 = vpack.c.bf16 %v419_v42, %v420_v49  ;;  %v390_v59 = vrot.slane %v309_v40, 7  ;;  %v4731_v61 = vpack.c.bf16 %v467_v53, %v468_v45  ;;  %v6914_v7 = vld [vmem:[%s6803_s9 + $0x38] sm:$0xff]  ;;  %vm6946_vm9 = vmpackc.low %vm6876_vm4, %vm6673_vm5 }
  0x1a   : > { %6116 = vmatprep.subr.bf16.mxu1 %v6447_v13  ;;  %9014 = vst [vmem:[#allocation4_spill] sm:$0xff] %v6881_v55  ;;  %v342_v62 = vand.u32 15, %v6844_v41  ;;  %v465_v1 = vsel %vm8978_vm1, %v440_v51, %v441_v52  ;;  %v466_v2 = vsel %vm8978_vm1, %v439_v44, %v440_v51  ;;  %v391_v3 = vrot.slane %v6857_v46, 7 }
  0x1b   : > { %5577 = vmatpush3.bf16.msra.mxu0 %v6445_v10  ;;  %v442_v4 = vrot.slane %v6896_v63, 1  ;;  %v487_v5 = vpack.c.bf16 %v6857_v46, %v309_v40  ;;  %v443_v6 = vrot.slane %v6884_v56, 1  ;;  %v6920_v9 = vadd.s32 56, %v6777_v15  ;;  %6126 = vmatprep.mubr.msk.bf16.mxu1 %vm6890_vm6, %v4731_v61 }
  0x1c   : > { %5578 = vmatprep.subr.bf16.mxu0 %v6446_v12  ;;  %v344_v10 = vand.u32 15, %v6881_v55  ;;  %vm6925_vm8 = vcmp.ne.s32.totalorder %v345_v57, 15  ;;  %v417_v23 = vsel %vm8979_vm0, %v390_v59, %v391_v3  ;;  %vm6954_vm10 = vcmp.ne.s32.totalorder %v342_v62, 0 }
  0x1d   : > { %6117 = vmatpush3.bf16.msra.mxu1 %v6447_v13  ;;  %9019 = vst [vmem:[#allocation5_spill] sm:$0xff] %v6920_v9  ;;  %v464_v13 = vsel %vm8978_vm1, %v441_v52, %v442_v4  ;;  %vm6961_vm11 = vmpackc.low %vm6925_vm8, %vm6673_vm5  ;;  %v347_v31 = vand.u32 15, %v6920_v9  ;;  %v6967_v33 = vadd.s32 48, %v6777_v15  ;;  %v332_v37 = vadd.s32 64, %v6777_v15  ;;  %v7001_v52 = vld [vmem:[%s6803_s9 + $0x60] sm:$0xff] }
  0x1e   : > { %6118 = vmatprep.subr.bf16.mxu1 %v6450_v16  ;;  %v393_v40 = vrot.slane %v6896_v63, 7  ;;  %v392_v42 = vrot.slane %v6860_v47, 7  ;;  %v333_v45 = vadd.s32 72, %v6777_v15  ;;  %vm6992_vm12 = vmpackc.low %vm6673_vm5, %vm6954_vm10  ;;  %v9029_v49 = vmov 0 }
  0x1f   : > { %5579 = vmatpush3.bf16.msra.mxu0 %v6448_v14  ;;  %v6459_v14 = vld [vmem:[%s8970_s1 + $0x140] sm:$0xff]   ;;  %9028 = vst [vmem:[#allocation6_spill] sm:$0xff] %v6967_v33  ;;  %v9030_v49 = vsel %vm6992_vm12, 4294967295, %v9029_v49  ;;  %vm379_vm13 = vcmp.ne.s32.totalorder %v347_v31, 15  ;;  %v335_v53 = vadd.s32 88, %v6777_v15  ;;  %v346_v54 = vand.u32 15, %v6967_v33 }
  0x20   : > { %5580 = vmatprep.subr.bf16.mxu0 %v6449_v17  ;;  %v418_v17 = vsel %vm8979_vm0, %v389_v34, %v390_v59  ;;  %v6970_v34 = vld [vmem:[%s6803_s9 + $0x50] sm:$0xff]  ;;  %v349_v57 = vand.u32 15, %v333_v45  ;;  %v415_v59 = vsel %vm8979_vm0, %v392_v42, %v393_v40  ;;  %v348_v61 = vand.u32 15, %v332_v37  ;;  %vm7020_vm14 = vmpackc.low %vm379_vm13, %vm6673_vm5 }
  0x21   : > { %6119 = vmatpush3.bf16.msra.mxu1 %v6450_v16  ;;  %v4734_v16 = vpack.c.bf16 %v465_v1, %v466_v2  ;;  %v4710_v38 = vpack.c.bf16 %v417_v23, %v418_v17  ;;  %v447_v46 = vrot.slane %v6970_v34, 1  ;;  %v7013_v1 = vld [vmem:[%s6803_s9 + $0x68] sm:$0xff]  ;;  %v416_v2 = vsel %vm8979_vm0, %v391_v3, %v392_v42 }
  0x22   : > { %6120 = vmatprep.subr.bf16.mxu1 %v6453_v20  ;;  %vm381_vm15 = vcmp.ne.s32.totalorder %v349_v57, 15  ;;  %vm7025_vm2 = vcmp.ne.s32.totalorder %v344_v10, 0  ;;  %v351_v3 = vand.u32 15, %v335_v53  ;;  %vm7038_vm4 = vcmp.ne.s32.totalorder %v346_v54, 0 }
  0x23   : > { %5581 = vmatpush3.bf16.msra.mxu0 %v6451_v18  ;;  %v463_v18 = vsel %vm8978_vm1, %v442_v4, %v443_v6  ;;  %vm7031_vm3 = vmpackc.low %vm381_vm15, %vm6673_vm5  ;;  %v450_v23 = vrot.slane %v7013_v1, 1  ;;  %v334_v27 = vadd.s32 80, %v6777_v15  ;;  %vm7051_vm8 = vcmp.ne.s32.totalorder %v348_v61, 0 }
  0x24   : > { %5582 = vmatprep.subr.bf16.mxu0 %v6452_v22  ;;  %vm7065_vm10 = vmpackc.low %vm6673_vm5, %vm7025_vm2  ;;  %vm383_vm13 = vcmp.ne.s32.totalorder %v351_v3, 15 }
  0x25   : > { %6121 = vmatpush3.bf16.msra.mxu1 %v6453_v20  ;;  %v6939_v20 = vld [vmem:[%s6803_s9 + $0x48] sm:$0xff]  ;;  %vm7079_vm15 = vmpackc.low %vm383_vm13, %vm6673_vm5 }
  0x26   : > { %6122 = vmatprep.subr.bf16.mxu1 %v6456_v26  ;;  %v446_v36 = vrot.slane %v6939_v20, 1  ;;  %v397_v10 = vrot.slane %v6939_v20, 7  ;;  %v490_v17 = vpack.c.bf16 %v6939_v20, %v6917_v8 }
  0x27   : > { %5583 = vmatpush3.bf16.msra.mxu0 %v6454_v24  ;;  %v4737_v24 = vpack.c.bf16 %v463_v18, %v464_v13  ;;  %v394_v13 = vrot.slane %v6884_v56, 7  ;;  %v395_v18 = vrot.slane %v6914_v7, 7 }
  0x28   : > { %5584 = vmatprep.subr.bf16.mxu0 %v6455_v25  ;;  %v444_v25 = vrot.slane %v6914_v7, 1 }
  0x29   : > { %6123 = vmatpush3.bf16.msra.mxu1 %v6456_v26  ;;  %v445_v26 = vrot.slane %v6917_v8, 1 }
  0x2a   : > { %6124 = vmatprep.subr.bf16.mxu1 %v6458_v50  ;;  %v462_v44 = vsel %vm8978_vm1, %v443_v6, %v444_v25  ;;  %v449_v6 = vrot.slane %v7001_v52, 1 }
  0x2b   : > { %5585 = vmatpush3.bf16.msra.mxu0 %v6457_v48  ;;  %v461_v43 = vsel %vm8978_vm1, %v444_v25, %v445_v26  ;;  %v6987_v48 = vld [vmem:[%s6803_s9 + $0x58] sm:$0xff]  ;;  %v460_v51 = vsel %vm8978_vm1, %v445_v26, %v446_v36  ;;  %v489_v25 = vpack.c.bf16 %v6914_v7, %v6884_v56  ;;  %v396_v26 = vrot.slane %v6917_v8, 7 }
  0x2c   : > { %6142 = vmatprep.subr.bf16.mxu0 %v6459_v14  ;;  %v448_v62 = vrot.slane %v6987_v48, 1  ;;  %v9041_v56 = vmov 0  ;;  %v456_v42 = vsel %vm8978_vm1, %v449_v6, %v450_v23  ;;  %v399_v61 = vrot.slane %v6987_v48, 7 }
  0x2d   : > { %6125 = vmatpush3.bf16.msra.mxu1 %v6458_v50  ;;  %v488_v50 = vpack.c.bf16 %v6896_v63, %v6860_v47  ;;  %v4740_v47 = vpack.c.bf16 %v461_v43, %v462_v44  ;;  %v9042_v56 = vsel %vm7065_vm10, 4294967295, %v9041_v56  ;;  %v339_v43 = vadd.s32 120, %v6777_v15 }
  0x2e   : > { %4708 = vmatmul.mubr.msk.bf16.vlgmr.msra.gmra.mrb[0].mxu0 %vm6901_vm7, %v4707_v58  ;;  %v459_v58 = vsel %vm8978_vm1, %v446_v36, %v447_v46  ;;  %v457_v36 = vsel %vm8978_vm1, %v448_v62, %v449_v6  ;;  %v458_v37 = vsel %vm8978_vm1, %v447_v46, %v448_v62  ;;  %v398_v44 = vrot.slane %v6970_v34, 7 }
  0x2f   : > { %749 = vmatprep.mubr.bf16.mxu0 %v487_v5  ;;  %6143 = vmatpush3.bf16.msra.mxu0 %v6459_v14  ;;  %v4743_v5 = vpack.c.bf16 %v459_v58, %v460_v51  ;;  %v4746_v46 = vpack.c.bf16 %v457_v36, %v458_v37  ;;  %v355_v53 = vand.u32 15, %v339_v43  ;;  %v452_v58 = vrot.slane %v6824_v30, 1 }
  0x30   : > { %6127 = vmatmul.mubr.msk.bf16.vlgmr.msra.gmra.mrb[0].mxu1 %vm6946_vm9, %v4734_v16  ;;  %v7036_v16 = vld [vmem:[%s6803_s9 + $0x70] sm:$0xff]  ;;  %v336_v62 = vadd.s32 96, %v6777_v15  ;;  %v338_v6 = vadd.s32 112, %v6777_v15  ;;  %v9047_v63 = vmov 0 }
  0x31   : > { %6130 = vmatprep.mubr.msk.bf16.mxu1 %vm6961_vm11, %v4737_v24  ;;  %v4713_v24 = vpack.c.bf16 %v415_v59, %v416_v2  ;;  %v451_v7 = vrot.slane %v7036_v16, 1  ;;  %v413_v59 = vsel %vm8979_vm0, %v394_v13, %v395_v18 }
  0x32   : > { %v354_v28 = vand.u32 15, %v338_v6  ;;  %v6473_v6 = vld [vmem:[%s8970_s1 + $0x118] sm:$0xff]  }
  0x33   : > { %v455_v51 = vsel %vm8978_vm1, %v450_v23, %v451_v7  ;;  %vm7102_vm1 = vmpackc.low %vm6673_vm5, %vm7038_vm4  ;;  %v9053_v23 = vmov 0 }
  0x34   : > { %v4749_v57 = vpack.c.bf16 %v455_v51, %v456_v42  ;;  %v9048_v63 = vsel %vm7102_vm1, 4294967295, %v9047_v63  ;;  %v9062_v42 = vmov 0  ;;  %v6464_v51 = vld [vmem:[%s8970_s1 + $0x168] sm:$0xff]  }
  0x36   : > { %4711 = vmatmul.mubr.msk.bf16.gmra.mrb[4].mxu0 %vm6992_vm12, %v4710_v38  ;;  %v337_v38 = vadd.s32 104, %v6777_v15  ;;  %vm7125_vm12 = vmpackc.low %vm6673_vm5, %vm7051_vm8  ;;  %vm9057_vm8 = vcmp.lt.s32.totalorder %v6777_v15, 1 }
  0x37   : > { %757 = vmatprep.mubr.bf16.mxu0 %v488_v50  ;;  %v350_v50 = vand.u32 15, %v334_v27  ;;  %v9054_v23 = vsel %vm7125_vm12, 4294967295, %v9053_v23  ;;  %v9055_v27 = vmov 0  ;;  %v411_v8 = vsel %vm9057_vm8, %v396_v26, %v397_v10 }
  0x38   : > { %6131 = vmatmul.mubr.msk.bf16.gmra.mrb[4].mxu1 %vm7020_vm14, %v4740_v47  ;;  %v353_v45 = vand.u32 15, %v337_v38  ;;  %v414_v47 = vsel %vm8979_vm0, %v393_v40, %v394_v13  ;;  %v491_v38 = vpack.c.bf16 %v6987_v48, %v6970_v34  ;;  %v492_v48 = vpack.c.bf16 %v7013_v1, %v7001_v52  ;;  %v6474_v40 = vld [vmem:[%s8970_s1 + $0xd8] sm:$0xff]  }
  0x39   : > { %6134 = vmatprep.mubr.msk.bf16.mxu1 %vm7031_vm3, %v4743_v5  ;;  %v401_v5 = vrot.slane %v7013_v1, 7  ;;  %vm7108_vm0 = vcmp.ne.s32.totalorder %v350_v50, 0  ;;  %v4716_v12 = vpack.c.bf16 %v413_v59, %v414_v47  ;;  %v6463_v50 = vld [vmem:[%s8970_s1 + $0x160] sm:$0xff]   ;;  %v6469_v47 = vld [vmem:[%s8970_s1 + $0x108] sm:$0xff]  }
  0x3a   : > { %vm385_vm2 = vcmp.ne.s32.totalorder %v353_v45, 15  ;;  %v6468_v59 = vld [vmem:[%s8970_s1 + $0xc0] sm:$0xff]  }
  0x3b   : > { %vm7093_vm13 = vmpackc.low %vm385_vm2, %vm6673_vm5  ;;  %vm387_vm2 = vcmp.ne.s32.totalorder %v355_v53, 15  ;;  %v6465_v53 = vld [vmem:[%s8970_s1 + $0x170] sm:$0xff]  }
  0x3e   : > { %4714 = vmatmul.mubr.msk.bf16.gmra.mrb[8].mxu0 %vm7065_vm10, %v4713_v24  ;;  %vm9051_vm10 = vcmp.lt.s32.totalorder %v6777_v15, 7  ;;  %v352_v24 = vand.u32 15, %v336_v62  ;;  %v6471_v62 = vld [vmem:[%s8970_s1 + $0x110] sm:$0xff]  }
  0x3f   : > { %765 = vmatprep.mubr.bf16.mxu0 %v489_v25  ;;  %v454_v13 = vsel %vm9051_vm10, %v451_v7, %v452_v58  ;;  %vm9052_vm4 = vmmov %vm9051_vm10  ;;  %v400_v25 = vrot.slane %v7001_v52, 7  ;;  %v9059_v7 = vmov 0  ;;  %v9066_v52 = vmov 0 }
  0x40   : > { %6135 = vmatmul.mubr.msk.bf16.gmra.mrb[8].mxu1 %vm7079_vm15, %v4746_v46  ;;  %v469_v3 = vsel %vm9052_vm4, %v452_v58, %v437_v35  ;;  %vm7131_vm10 = vmpackc.low %vm387_vm2, %vm6673_vm5  ;;  %v402_v35 = vrot.slane %v7036_v16, 7  ;;  %vm368_vm2 = vcmp.ne.s32.totalorder %v352_v24, 0  ;;  %v6467_v58 = vld [vmem:[%s8970_s1 + $0x100] sm:$0xff]   ;;  %v6479_v24 = vld [vmem:[%s8970_s1 + $0x130] sm:$0xff]  }
  0x41   : > { %6138 = vmatprep.mubr.msk.bf16.mxu1 %vm7093_vm13, %v4749_v57  ;;  %v9056_v27 = vsel %vm7131_vm10, 4294967295, %v9055_v27  ;;  %v4752_v36 = vpack.c.bf16 %v469_v3, %v454_v13  ;;  %vm9058_vm4 = vmmov %vm9057_vm8  ;;  %v6466_v57 = vld [vmem:[%s8970_s1 + $0x178] sm:$0xff]   ;;  %5650 = vmatprep.subr.bf16.mxu1 %v6467_v58  ;;  %v6476_v13 = vld [vmem:[%s8970_s1 + $0xe0] sm:$0xff]  }
  0x42   : > { %v412_v31 = vsel %vm9058_vm4, %v395_v18, %v396_v26  ;;  %vm9061_vm8 = vmmov %vm9058_vm4  ;;  %v410_v26 = vsel %vm9058_vm4, %v397_v10, %v398_v44  ;;  %5651 = vmatpush3.bf16.msra.mxu1 %v6468_v59  ;;  %v6477_v3 = vld [vmem:[%s8970_s1 + $0x128] sm:$0xff]  }
  0x43   : > { %v4719_v37 = vpack.c.bf16 %v411_v8, %v412_v31  ;;  %v409_v18 = vsel %vm9061_vm8, %v398_v44, %v399_v61  ;;  %vm9064_vm8 = vmmov %vm9058_vm4  ;;  %v493_v44 = vpack.c.bf16 %v6824_v30, %v7036_v16  ;;  %v6460_v16 = vld [vmem:[%s8970_s1 + $0x148] sm:$0xff]   ;;  %v6461_v30 = vld [vmem:[%s8970_s1 + $0x150] sm:$0xff]   ;;  %5652 = vmatprep.subr.bf16.mxu1 %v6469_v47 }
  0x44   : > { %v4722_v34 = vpack.c.bf16 %v409_v18, %v410_v26  ;;  %v407_v20 = vsel %vm9064_vm8, %v400_v25, %v401_v5  ;;  %6144 = vmatprep.subr.bf16.mxu0 %v6460_v16  ;;  %v7265_v31 = vld [vmem:[%s8971_s2] ss:$0 sm:$0xff] }
  0x45   : > { %6145 = vmatpush3.bf16.msra.mxu0 %v6460_v16 }
  0x46   : > { %4717 = vmatmul.mubr.msk.bf16.gmra.mrb[12].mxu0 %vm7102_vm1, %v4716_v12  ;;  %vm7151_vm1 = vmpackc.low %vm6673_vm5, %vm7108_vm0  ;;  %6146 = vmatprep.subr.bf16.mxu0 %v6461_v30  ;;  %v6475_v12 = vld [vmem:[%s8970_s1 + $0x120] sm:$0xff]  }
  0x47   : > { %773 = vmatprep.mubr.bf16.mxu0 %v490_v17  ;;  %v9060_v7 = vsel %vm7151_vm1, 4294967295, %v9059_v7  ;;  %vm7166_vm0 = vmpackc.low %vm6673_vm5, %vm368_vm2  ;;  %v6478_v17 = vld [vmem:[%s8970_s1 + $0xe8] sm:$0xff]  }
  0x48   : > { %6139 = vmatmul.mubr.msk.bf16.gmra.mrb[12].mxu1 %vm7131_vm10, %v4752_v36  ;;  %vm370_vm10 = vcmp.ne.s32.totalorder %v354_v28, 0  ;;  %v9063_v42 = vsel %vm7166_vm0, 4294967295, %v9062_v42  ;;  %vm9068_vm2 = vmmov %vm9064_vm8  ;;  %v6481_v28 = vld [vmem:[%s8970_s1 + $0x138] sm:$0xff]  }
  0x49   : > { %v405_v1 = vsel %vm9068_vm2, %v402_v35, %v403_v39  ;;  %6147 = vmatpush3.bf16.msra.mxu0 %v6461_v30  ;;  %v6462_v39 = vld [vmem:[%s8970_s1 + $0x158] sm:$0xff]  }
  0x4a   : > { %6148 = vmatprep.subr.bf16.mxu0 %v6462_v39 }
  0x4d   : > { %6149 = vmatpush3.bf16.msra.mxu0 %v6462_v39 }
  0x4e   : > { %4720 = vmatmul.mubr.msk.bf16.gmra.mrb[16].mxu0 %vm7125_vm12, %v4719_v37  ;;  %vm9065_vm12 = vmmov %vm9058_vm4  ;;  %6150 = vmatprep.subr.bf16.mxu0 %v6463_v50 }
  0x4f   : > { %781 = vmatprep.mubr.bf16.mxu0 %v491_v38  ;;  %v408_v10 = vsel %vm9065_vm12, %v399_v61, %v400_v25  ;;  %vm7179_vm4 = vmpackc.low %vm6673_vm5, %vm370_vm10  ;;  %v6470_v61 = vld [vmem:[%s8970_s1 + $0xc8] sm:$0xff]   ;;  %v6480_v25 = vld [vmem:[%s8970_s1 + $0xf0] sm:$0xff]   ;;  %vm9071_vm10 = vcmp.lt.s32.totalorder %v6777_v15, 7 }
  0x50   : > { %v4725_v43 = vpack.c.bf16 %v407_v20, %v408_v10  ;;  %v9067_v52 = vsel %vm7179_vm4, 4294967295, %v9066_v52  ;;  %vm9069_vm12 = vmmov %vm9068_vm2  ;;  %5653 = vmatpush3.bf16.msra.mxu1 %v6470_v61 }
  0x51   : > { %v406_v45 = vsel %vm9069_vm12, %v401_v5, %v402_v35  ;;  %6151 = vmatpush3.bf16.msra.mxu0 %v6463_v50  ;;  %v6472_v5 = vld [vmem:[%s8970_s1 + $0xd0] sm:$0xff]   ;;  %5654 = vmatprep.subr.bf16.mxu1 %v6471_v62  ;;  %v6482_v35 = vld [vmem:[%s8970_s1 + $0xf8] sm:$0xff]   ;;  %vm9070_vm5 = vmmov %vm9068_vm2 }
  0x52   : > { %v4728_v46 = vpack.c.bf16 %v405_v1, %v406_v45  ;;  %6152 = vmatprep.subr.bf16.mxu0 %v6464_v51  ;;  %vm9072_vm8 = vmmov %vm9071_vm10 }
  0x53   : > { %vm9073_vm12 = vmmov %vm9072_vm8 }
  0x54   : > { %5655 = vmatpush3.bf16.msra.mxu1 %v6472_v5 }
  0x55   : > { %6153 = vmatpush3.bf16.msra.mxu0 %v6464_v51  ;;  %5656 = vmatprep.subr.bf16.mxu1 %v6473_v6 }
  0x56   : > { %4723 = vmatmul.mubr.msk.bf16.gmra.mrb[20].mxu0 %vm7151_vm1, %v4722_v34  ;;  %6154 = vmatprep.subr.bf16.mxu0 %v6465_v53 }
  0x57   : > { %789 = vmatprep.mubr.bf16.mxu0 %v492_v48 }
  0x58   : > { %5657 = vmatpush3.bf16.msra.mxu1 %v6474_v40 }
  0x59   : > { %6155 = vmatpush3.bf16.msra.mxu0 %v6465_v53  ;;  %5658 = vmatprep.subr.bf16.mxu1 %v6475_v12 }
  0x5a   : > { %6156 = vmatprep.subr.bf16.mxu0 %v6466_v57 }
  0x5c   : > { %5659 = vmatpush3.bf16.msra.mxu1 %v6476_v13 }
  0x5d   : > { %6157 = vmatpush3.bf16.msra.mxu0 %v6466_v57  ;;  %5660 = vmatprep.subr.bf16.mxu1 %v6477_v3 }
  0x5e   : > { %4726 = vmatmul.mubr.msk.bf16.gmra.mrb[24].mxu0 %vm7166_vm0, %v4725_v43 }
  0x5f   : > { %797 = vmatprep.mubr.bf16.mxu0 %v493_v44 }
  0x60   : > { %5661 = vmatpush3.bf16.msra.mxu1 %v6478_v17 }
  0x61   : > { %5662 = vmatprep.subr.bf16.mxu1 %v6479_v24 }
  0x64   : > { %5663 = vmatpush3.bf16.msra.mxu1 %v6480_v25 }
  0x65   : > { %5664 = vmatprep.subr.bf16.mxu1 %v6481_v28 }
  0x66   : > { %4729 = vmatmul.mubr.msk.bf16.gmra.mrb[28].mxu0 %vm7179_vm4, %v4728_v46 }
  0x68   : > { %5665 = vmatpush3.bf16.msra.mxu1 %v6482_v35 }
 0x101   : > { %v5586_v36 = vpop.f32.mrb[0].mxu0 }
 0x102   : > { %v5587_v8 = vpop.f32.mrb[1].mxu0 }
 0x103   : > { %v5588_v37 = vadd.f32 %v5587_v8, %v5586_v36  ;;  %v5589_v38 = vpop.f32.mrb[2].mxu0  ;;  %v6128_v26 = vpop.f32.mrb[0].mxu1 }
 0x104   : > { %v5590_v18 = vpop.f32.mrb[3].mxu0  ;;  %v840_v20 = vpop.f32.mrb[1].mxu1 }
 0x105   : > { %v5591_v34 = vadd.f32 %v5590_v18, %v5589_v38  ;;  %v744_v48 = vadd.f32 %v5588_v37, %v7265_v31  ;;  %v6129_v10 = vpop.f32.mrb[2].mxu1 }
 0x106   : > { %v843_v1 = vpop.f32.mrb[3].mxu1 }
 0x107   : > { %v841_v43 = vadd.f32 %v840_v20, %v744_v48  ;;  %v747_v44 = vadd.f32 %v5591_v34, %v7265_v31 }
 0x109   : > { %v7269_v45 = vmax.f32 %v841_v43, 0.0  ;;  %v844_v46 = vadd.f32 %v843_v1, %v747_v44  ;;  %v5592_v16 = vpop.f32.mrb[4].mxu0 }
 0x10a   : > { %v5593_v30 = vpop.f32.mrb[5].mxu0 }
 0x10b   : > { %v904_v39 = vmax.f32 %v844_v46, 0.0  ;;  %v5594_v50 = vadd.f32 %v5593_v30, %v5592_v16  ;;  %v5595_v51 = vpop.f32.mrb[6].mxu0  ;;  %v8992_v53 = vrot.slane %v7269_v45, 7  ;;  %v8991_v57 = vrot.slane %v7269_v45, 1  ;;  %v7273_v59 = vpop.f32.mrb[4].mxu1 }
 0x10c   : > { %v5596_v58 = vpop.f32.mrb[7].mxu0  ;;  %v856_v6 = vpop.f32.mrb[5].mxu1 }
 0x10d   : > { %v920_v47 = vrot.slane %v904_v39, 7  ;;  %v968_v61 = vrot.slane %v904_v39, 1  ;;  %v752_v62 = vadd.f32 %v5594_v50, %v7265_v31  ;;  %v5597_v5 = vadd.f32 %v5596_v58, %v5595_v51  ;;  %v7277_v12 = vpop.f32.mrb[6].mxu1 }
 0x10e   : > { %v1015_v40 = vpack.c.bf16 %v904_v39, %v7269_v45  ;;  %v859_v24 = vpop.f32.mrb[7].mxu1 }
 0x10f   : > { %v7283_v13 = vsel %vm9070_vm5, %v8992_v53, %v920_v47  ;;  %v849_v3 = vadd.f32 %v6128_v26, %v752_v62  ;;  %v755_v17 = vadd.f32 %v5597_v5, %v7265_v31  ;;  %v997_v25 = vsel %vm9071_vm10, %v8991_v57, %v968_v61  ;;  %vm9074_vm5 = vmmov %vm9068_vm2 }
 0x110   : > { %1272 = vmatprep.mubr.bf16.mxu1 %v1015_v40  ;;  %vm9075_vm10 = vmmov %vm9072_vm8 }
 0x111   : > { %v7290_v28 = vmax.f32 %v849_v3, 0.0  ;;  %v852_v35 = vadd.f32 %v6129_v10, %v755_v17  ;;  %v5598_v36 = vpop.f32.mrb[8].mxu0 }
 0x112   : > { %v5599_v8 = vpop.f32.mrb[9].mxu0 }
 0x113   : > { %v921_v37 = vrot.slane %v7290_v28, 7  ;;  %v969_v38 = vrot.slane %v7290_v28, 1  ;;  %v7294_v18 = vmax.f32 %v852_v35, 0.0  ;;  %v5600_v26 = vadd.f32 %v5599_v8, %v5598_v36  ;;  %v5601_v34 = vpop.f32.mrb[10].mxu0  ;;  %v7296_v20 = vpop.f32.mrb[8].mxu1 }
 0x114   : > { %v5602_v48 = vpop.f32.mrb[11].mxu0  ;;  %v872_v46 = vpop.f32.mrb[9].mxu1 }
 0x115   : > { %v922_v43 = vrot.slane %v7294_v18, 7  ;;  %v970_v44 = vrot.slane %v7294_v18, 1  ;;  %v5603_v1 = vadd.f32 %v5602_v48, %v5601_v34  ;;  %v760_v10 = vadd.f32 %v5600_v26, %v7265_v31  ;;  %v7303_v30 = vpop.f32.mrb[10].mxu1 }
 0x116   : > { %v996_v16 = vsel %vm9072_vm8, %v968_v61, %v969_v38  ;;  %v7309_v50 = vsel %vm9068_vm2, %v920_v47, %v921_v37  ;;  %v875_v40 = vpop.f32.mrb[11].mxu1  ;;  %vm9076_vm8 = vmmov %vm9068_vm2 }
 0x117   : > { %v857_v51 = vadd.f32 %v856_v6, %v760_v10  ;;  %v995_v58 = vsel %vm9073_vm12, %v969_v38, %v970_v44  ;;  %v763_v62 = vadd.f32 %v5603_v1, %v7265_v31  ;;  %v4853_v5 = vpack.c.bf16 %v996_v16, %v997_v25  ;;  %vm9077_vm2 = vmmov %vm9075_vm10 }
 0x118   : > { %v7316_v61 = vsel %vm9074_vm5, %v921_v37, %v922_v43  ;;  %vm9078_vm12 = vmmov %vm9074_vm5 }
 0x119   : > { %v7318_v3 = vmax.f32 %v857_v51, 0.0  ;;  %v860_v17 = vadd.f32 %v859_v24, %v763_v62  ;;  %6158 = vmatprep.mubr.msk.bf16.mxu0 %vm6890_vm6, %v4853_v5  ;;  %v5604_v47 = vpop.f32.mrb[12].mxu0  ;;  %vm9079_vm5 = vmmov %vm9077_vm2 }
 0x11a   : > { %v5605_v35 = vpop.f32.mrb[13].mxu0 }
 0x11b   : > { %v923_v36 = vrot.slane %v7318_v3, 7  ;;  %v971_v25 = vrot.slane %v7318_v3, 1  ;;  %v7326_v8 = vmax.f32 %v860_v17, 0.0  ;;  %v5606_v38 = vadd.f32 %v5605_v35, %v5604_v47  ;;  %v5607_v37 = vpop.f32.mrb[14].mxu0  ;;  %v7328_v34 = vpop.f32.mrb[12].mxu1 }
 0x11c   : > { %v5608_v26 = vpop.f32.mrb[15].mxu0  ;;  %v7335_v16 = vpop.f32.mrb[13].mxu1 }
 0x11d   : > { %v994_v24 = vsel %vm9075_vm10, %v970_v44, %v971_v25  ;;  %v924_v48 = vrot.slane %v7326_v8, 7  ;;  %v972_v1 = vrot.slane %v7326_v8, 1  ;;  %v768_v10 = vadd.f32 %v5606_v38, %v7265_v31  ;;  %v7337_v5 = vpop.f32.mrb[14].mxu1  ;;  %vm9080_vm10 = vmmov %vm9076_vm8 }
 0x11e   : > { %v4856_v51 = vpack.c.bf16 %v994_v24, %v995_v58  ;;  %v5609_v62 = vadd.f32 %v5608_v26, %v5607_v37  ;;  %v7343_v47 = vsel %vm9076_vm8, %v922_v43, %v923_v36  ;;  %v7348_v11 = vpop.f32.mrb[15].mxu1  ;;  %vm9081_vm8 = vmmov %vm9077_vm2 }
 0x11f   : > { %v865_v44 = vadd.f32 %v7273_v59, %v768_v10  ;;  %v993_v35 = vsel %vm9077_vm2, %v971_v25, %v972_v1  ;;  %v7352_v58 = vsel %vm9078_vm12, %v923_v36, %v924_v48  ;;  %vm9082_vm2 = vmmov %vm9080_vm10 }
 0x120   : > { %v771_v38 = vadd.f32 %v5609_v62, %v7265_v31  ;;  %6159 = vmatmul.mubr.msk.bf16.vlgmr.msra.gmra.mrb[32].mxu0 %vm6946_vm9, %v4856_v51  ;;  %vm9083_vm12 = vmmov %vm9079_vm5 }
 0x121   : > { %v7359_v37 = vmax.f32 %v865_v44, 0.0  ;;  %v5610_v59 = vpop.f32.mrb[16].mxu0 }
 0x122   : > { %v868_v26 = vadd.f32 %v7277_v12, %v771_v38  ;;  %v5611_v25 = vpop.f32.mrb[17].mxu0 }
 0x123   : > { %v925_v24 = vrot.slane %v7359_v37, 7  ;;  %v973_v10 = vrot.slane %v7359_v37, 1  ;;  %v5612_v36 = vadd.f32 %v5611_v25, %v5610_v59  ;;  %v5613_v17 = vpop.f32.mrb[18].mxu0 }
 0x124   : > { %v7364_v6 = vmax.f32 %v868_v26, 0.0  ;;  %v5614_v62 = vpop.f32.mrb[19].mxu0 }
 0x125   : > { %v5615_v39 = vadd.f32 %v5614_v62, %v5613_v17  ;;  %v776_v51 = vadd.f32 %v5612_v36, %v7265_v31  ;;  %v992_v44 = vsel %vm9079_vm5, %v972_v1, %v973_v10  ;;  %v7371_v43 = vsel %vm9080_vm10, %v924_v48, %v925_v24  ;;  %vm9084_vm5 = vmmov %vm9082_vm2 }
 0x126   : > { %v926_v12 = vrot.slane %v7364_v6, 7  ;;  %v974_v38 = vrot.slane %v7364_v6, 1  ;;  %v4859_v57 = vpack.c.bf16 %v992_v44, %v993_v35  ;;  %vm9085_vm10 = vmmov %vm9081_vm8 }
 0x127   : > { %v873_v26 = vadd.f32 %v872_v46, %v776_v51  ;;  %v779_v17 = vadd.f32 %v5615_v39, %v7265_v31 }
 0x128   : > { %6162 = vmatprep.mubr.msk.bf16.mxu0 %vm6961_vm11, %v4859_v57  ;;  %v991_v1 = vsel %vm9081_vm8, %v973_v10, %v974_v38  ;;  %v7384_v48 = vsel %vm9082_vm2, %v925_v24, %v926_v12  ;;  %vm9086_vm8 = vmmov %vm9082_vm2 }
 0x129   : > { %v7386_v25 = vmax.f32 %v873_v26, 0.0  ;;  %v876_v36 = vadd.f32 %v875_v40, %v779_v17  ;;  %v5616_v35 = vpop.f32.mrb[20].mxu0  ;;  %vm9087_vm2 = vmmov %vm9085_vm10 }
 0x12a   : > { %v5617_v46 = vpop.f32.mrb[21].mxu0 }
 0x12b   : > { %v927_v39 = vrot.slane %v7386_v25, 7  ;;  %v975_v51 = vrot.slane %v7386_v25, 1  ;;  %v7392_v57 = vmax.f32 %v876_v36, 0.0  ;;  %v5618_v44 = vadd.f32 %v5617_v46, %v5616_v35  ;;  %v5619_v10 = vpop.f32.mrb[22].mxu0 }
 0x12c   : > { %v5620_v59 = vpop.f32.mrb[23].mxu0 }
 0x12d   : > { %v928_v24 = vrot.slane %v7392_v57, 7  ;;  %v976_v26 = vrot.slane %v7392_v57, 1  ;;  %v784_v40 = vadd.f32 %v5618_v44, %v7265_v31  ;;  %v5621_v17 = vadd.f32 %v5620_v59, %v5619_v10 }
 0x12e   : > { %v990_v62 = vsel %vm9083_vm12, %v974_v38, %v975_v51  ;;  %v7403_v36 = vsel %vm9084_vm5, %v926_v12, %v927_v39  ;;  %vm9088_vm12 = vmmov %vm9084_vm5 }
 0x12f   : > { %v881_v35 = vadd.f32 %v7296_v20, %v784_v40  ;;  %v787_v46 = vadd.f32 %v5621_v17, %v7265_v31  ;;  %v4862_v9 = vpack.c.bf16 %v990_v62, %v991_v1  ;;  %v989_v33 = vsel %vm9085_vm10, %v975_v51, %v976_v26  ;;  %vm9089_vm5 = vmmov %vm9087_vm2 }
 0x130   : > { %v7411_v59 = vsel %vm9086_vm8, %v927_v39, %v928_v24  ;;  %vm9090_vm10 = vmmov %vm9086_vm8 }
 0x131   : > { %v7413_v38 = vmax.f32 %v881_v35, 0.0  ;;  %v884_v44 = vadd.f32 %v7303_v30, %v787_v46  ;;  %6163 = vmatmul.mubr.msk.bf16.gmra.mrb[36].mxu0 %vm7020_vm14, %v4862_v9  ;;  %v5622_v12 = vpop.f32.mrb[24].mxu0  ;;  %vm9091_vm8 = vmmov %vm9087_vm2 }
 0x132   : > { %v5623_v10 = vpop.f32.mrb[25].mxu0 }
 0x133   : > { %v929_v1 = vrot.slane %v7413_v38, 7  ;;  %v977_v62 = vrot.slane %v7413_v38, 1  ;;  %v7422_v51 = vmax.f32 %v884_v44, 0.0  ;;  %v5624_v39 = vadd.f32 %v5623_v10, %v5622_v12  ;;  %v5625_v40 = vpop.f32.mrb[26].mxu0 }
 0x134   : > { %v5626_v17 = vpop.f32.mrb[27].mxu0 }
 0x135   : > { %v930_v35 = vrot.slane %v7422_v51, 7  ;;  %v978_v30 = vrot.slane %v7422_v51, 1  ;;  %v5627_v46 = vadd.f32 %v5626_v17, %v5625_v40  ;;  %v792_v9 = vadd.f32 %v5624_v39, %v7265_v31 }
 0x136   : > { %v988_v20 = vsel %vm9087_vm2, %v976_v26, %v977_v62  ;;  %v1020_v53 = vpack.c.bf16 %v7422_v51, %v7413_v38  ;;  %v7433_v44 = vsel %vm9088_vm12, %v928_v24, %v929_v1  ;;  %vm9092_vm2 = vmmov %vm9090_vm10 }
 0x137   : > { %v889_v12 = vadd.f32 %v7335_v16, %v792_v9  ;;  %v795_v10 = vadd.f32 %v5627_v46, %v7265_v31  ;;  %v4865_v32 = vpack.c.bf16 %v988_v20, %v989_v33  ;;  %v987_v40 = vsel %vm9089_vm5, %v977_v62, %v978_v30  ;;  %vm9093_vm12 = vmmov %vm9089_vm5 }
 0x138   : > { %v939_v39 = vsel %vm9090_vm10, %v929_v1, %v930_v35  ;;  %vm9094_vm5 = vmmov %vm9092_vm2 }
 0x139   : > { %v915_v17 = vmax.f32 %v889_v12, 0.0  ;;  %v892_v26 = vadd.f32 %v7348_v11, %v795_v10  ;;  %6166 = vmatprep.mubr.msk.bf16.mxu0 %vm7031_vm3, %v4865_v32  ;;  %v5628_v38 = vpop.f32.mrb[28].mxu0  ;;  %v4844_v24 = vpack.c.bf16 %v939_v39, %v7433_v44  ;;  %vm9095_vm10 = vmmov %vm9091_vm8 }
 0x13a   : > { %v5629_v51 = vpop.f32.mrb[29].mxu0 }
 0x13b   : > { %v931_v16 = vrot.slane %v915_v17, 7  ;;  %v979_v9 = vrot.slane %v915_v17, 1  ;;  %v916_v46 = vmax.f32 %v892_v26, 0.0  ;;  %v5630_v33 = vadd.f32 %v5629_v51, %v5628_v38  ;;  %v5631_v20 = vpop.f32.mrb[30].mxu0 }
 0x13c   : > { %v5632_v55 = vpop.f32.mrb[31].mxu0 }
 0x13d   : > { %v932_v62 = vrot.slane %v916_v46, 7  ;;  %v980_v21 = vrot.slane %v916_v46, 1  ;;  %v800_v1 = vadd.f32 %v5630_v33, %v7265_v31  ;;  %v5633_v12 = vadd.f32 %v5632_v55, %v5631_v20 }
 0x13e   : > { %v986_v11 = vsel %vm9091_vm8, %v978_v30, %v979_v9  ;;  %v1021_v10 = vpack.c.bf16 %v916_v46, %v915_v17  ;;  %v938_v32 = vsel %vm9092_vm2, %v930_v35, %v931_v16  ;;  %vm9096_vm8 = vmmov %vm9092_vm2 }
 0x13f   : > { %v897_v44 = vadd.f32 %v7328_v34, %v800_v1  ;;  %v803_v39 = vadd.f32 %v5633_v12, %v7265_v31  ;;  %v4868_v26 = vpack.c.bf16 %v986_v11, %v987_v40  ;;  %v985_v38 = vsel %vm9093_vm12, %v979_v9, %v980_v21  ;;  %vm9098_vm12 = vmmov %vm9095_vm10 }
 0x140   : > { %v937_v51 = vsel %vm9094_vm5, %v931_v16, %v932_v62  ;;  %v9097_v1 = vrot.slane %v7269_v45, 7  ;;  %v9099_v11 = vrot.slane %v7269_v45, 1  ;;  %vm9100_vm5 = vmmov %vm9095_vm10  ;;  %v9103_v45 = vpack.c.bf16 %v7294_v18, %v7290_v28 }
 0x141   : > { %v917_v33 = vmax.f32 %v897_v44, 0.0  ;;  %v900_v55 = vadd.f32 %v7337_v5, %v803_v39  ;;  %6167 = vmatmul.mubr.msk.bf16.gmra.mrb[40].mxu0 %vm7079_vm15, %v4868_v26  ;;  %v4847_v30 = vpack.c.bf16 %v937_v51, %v938_v32  ;;  %v9104_v26 = vpack.c.bf16 %v7316_v61, %v7309_v50  ;;  %v6498_v51 = vld [vmem:[%s8970_s1 + $0x198] sm:$0xff]  }
 0x142   : > { %v9109_v28 = vpack.c.bf16 %v7364_v6, %v7359_v37  ;;  %v9110_v18 = vpack.c.bf16 %v7384_v48, %v7371_v43  ;;  %v9112_v50 = vpack.c.bf16 %v7392_v57, %v7386_v25  ;;  %v9113_v61 = vpack.c.bf16 %v7411_v59, %v7403_v36  ;;  %v6485_v6 = vld [vmem:[%s8970_s1 + $0x210] sm:$0xff]   ;;  %v6490_v37 = vld [vmem:[%s8970_s1 + $0x238] sm:$0xff]   ;;  %v6491_v48 = vld [vmem:[%s8970_s1 + $0x1c0] sm:$0xff]  }
 0x143   : > { %v933_v17 = vrot.slane %v917_v33, 7  ;;  %v981_v35 = vrot.slane %v917_v33, 1  ;;  %v918_v46 = vmax.f32 %v900_v55, 0.0  ;;  %v6489_v43 = vld [vmem:[%s8970_s1 + $0x230] sm:$0xff]   ;;  %v6492_v25 = vld [vmem:[%s8970_s1 + $0x180] sm:$0xff]   ;;  %5730 = vmatprep.subr.bf16.mxu0 %v6491_v48  ;;  %v6493_v57 = vld [vmem:[%s8970_s1 + $0x1c8] sm:$0xff]  }
 0x144   : > { %5731 = vmatpush3.bf16.msra.mxu0 %v6492_v25  ;;  %v6494_v36 = vld [vmem:[%s8970_s1 + $0x188] sm:$0xff]   ;;  %v6495_v59 = vld [vmem:[%s8970_s1 + $0x1d0] sm:$0xff]   ;;  %v6500_v55 = vld [vmem:[%s8970_s1 + $0x1a0] sm:$0xff]  }
 0x145   : > { %v934_v34 = vrot.slane %v918_v46, 7  ;;  %v982_v20 = vrot.slane %v918_v46, 1  ;;  %v984_v31 = vsel %vm9095_vm10, %v980_v21, %v981_v35  ;;  %v1022_v40 = vpack.c.bf16 %v918_v46, %v917_v33  ;;  %vm9101_vm10 = vmmov %vm9092_vm2  ;;  %5732 = vmatprep.subr.bf16.mxu0 %v6493_v57  ;;  %v6499_v33 = vld [vmem:[%s8970_s1 + $0x1e0] sm:$0xff]   ;;  %v6504_v46 = vld [vmem:[%s8970_s1 + $0x1b0] sm:$0xff]  }
 0x146   : > { %v4871_v9 = vpack.c.bf16 %v984_v31, %v985_v38  ;;  %v936_v16 = vsel %vm9096_vm8, %v932_v62, %v933_v17  ;;  %vm9102_vm8 = vnez %v9056_v27  ;;  %v9107_v38 = vpack.c.bf16 %v7352_v58, %v7343_v47  ;;  %v6487_v47 = vld [vmem:[%s8970_s1 + $0x220] sm:$0xff]   ;;  %v6488_v58 = vld [vmem:[%s8970_s1 + $0x228] sm:$0xff]  }
 0x147   : > { %v950_v5 = vsel %vm9092_vm2, %v934_v34, %v9097_v1  ;;  %v983_v12 = vsel %vm9098_vm12, %v981_v35, %v982_v20  ;;  %v998_v32 = vsel %vm9100_vm5, %v982_v20, %v9099_v11  ;;  %v935_v21 = vsel %vm9101_vm10, %v933_v17, %v934_v34  ;;  %v6502_v17 = vld [vmem:[%s8970_s1 + $0x1a8] sm:$0xff]   ;;  %v6503_v35 = vld [vmem:[%s8970_s1 + $0x1f0] sm:$0xff]   ;;  %v6505_v34 = vld [vmem:[%s8970_s1 + $0x1f8] sm:$0xff]  }
 0x148   : > { %v4829_v44 = vpack.c.bf16 %v7283_v13, %v950_v5  ;;  %6170 = vmatprep.mubr.msk.bf16.mxu0 %vm7093_vm13, %v4871_v9  ;;  %v4874_v62 = vpack.c.bf16 %v998_v32, %v983_v12  ;;  %v4850_v39 = vpack.c.bf16 %v935_v21, %v936_v16  ;;  %vm9105_vm2 = vnez %v9030_v49  ;;  %v6506_v20 = vld [vmem:[%s8970_s1 + $0x1b8] sm:$0xff]  }
 0x149   : > { %v9106_v13 = vpack.c.bf16 %v7326_v8, %v7318_v3  ;;  %vm9108_vm12 = vnez %v9042_v56  ;;  %vm9111_vm5 = vnez %v9048_v63  ;;  %vm9114_vm10 = vnez %v9054_v23  ;;  %v6483_v3 = vld [vmem:[%s8970_s1 + $0x200] sm:$0xff]   ;;  %v6486_v8 = vld [vmem:[%s8970_s1 + $0x218] sm:$0xff]   ;;  %5733 = vmatpush3.bf16.msra.mxu0 %v6494_v36 }
 0x14a   : > { %4830 = vmatmul.mubr.msk.bf16.vlgmr.msra.gmra.mrb[16].mxu1 %vm6901_vm7, %v4829_v44  ;;  %6171 = vmatmul.mubr.msk.bf16.gmra.mrb[44].mxu0 %vm9102_vm8, %v4874_v62  ;;  %v6507_v56 = vld [vmem:[%s8972_s3] sm:$0xff]  }
 0x14b   : > { %1280 = vmatprep.mubr.bf16.mxu1 %v9103_v45  ;;  %6174 = vmatprep.subr.bf16.mxu1 %v6483_v3  ;;  %v6511_v63 = vld [vmem:[%s8970_s1 + $0x280] sm:$0xff]  }
 0x14c   : > { %6175 = vmatpush3.bf16.msra.mxu1 %v6483_v3  ;;  %5734 = vmatprep.subr.bf16.mxu0 %v6495_v59 }
 0x152   : > { %4833 = vmatmul.mubr.msk.bf16.gmra.mrb[20].mxu1 %vm9105_vm2, %v9104_v26  ;;  %v7609_v26 = vld [vmem:[%s8971_s2 + $0x1] ss:$0 sm:$0xff] }
 0x153   : > { %1288 = vmatprep.mubr.bf16.mxu1 %v9106_v13 }
 0x15a   : > { %4836 = vmatmul.mubr.msk.bf16.gmra.mrb[24].mxu1 %vm9108_vm12, %v9107_v38 }
 0x15b   : > { %1296 = vmatprep.mubr.bf16.mxu1 %v9109_v28 }
 0x162   : > { %4839 = vmatmul.mubr.msk.bf16.gmra.mrb[28].mxu1 %vm9111_vm5, %v9110_v18 }
 0x163   : > { %1304 = vmatprep.mubr.bf16.mxu1 %v9112_v50 }
 0x16a   : > { %4842 = vmatmul.mubr.msk.bf16.gmra.mrb[32].mxu1 %vm9114_vm10, %v9113_v61 }
 0x16b   : > { %1312 = vmatprep.mubr.bf16.mxu1 %v1020_v53  ;;  %v6484_v53 = vld [vmem:[%s8970_s1 + $0x208] sm:$0xff]  }
 0x16c   : > { %6176 = vmatprep.subr.bf16.mxu1 %v6484_v53 }
 0x16d   : > { %6177 = vmatpush3.bf16.msra.mxu1 %v6484_v53 }
 0x16e   : > { %6178 = vmatprep.subr.bf16.mxu1 %v6485_v6 }
 0x171   : > { %6179 = vmatpush3.bf16.msra.mxu1 %v6485_v6 }
 0x172   : > { %4845 = vmatmul.mubr.msk.bf16.gmra.mrb[36].mxu1 %vm7151_vm1, %v4844_v24  ;;  %6180 = vmatprep.subr.bf16.mxu1 %v6486_v8  ;;  %v6496_v24 = vld [vmem:[%s8970_s1 + $0x190] sm:$0xff]  }
 0x173   : > { %1320 = vmatprep.mubr.bf16.mxu1 %v1021_v10  ;;  %5735 = vmatpush3.bf16.msra.mxu0 %v6496_v24  ;;  %v6497_v10 = vld [vmem:[%s8970_s1 + $0x1d8] sm:$0xff]  }
 0x174   : > { %5736 = vmatprep.subr.bf16.mxu0 %v6497_v10 }
 0x175   : > { %6181 = vmatpush3.bf16.msra.mxu1 %v6486_v8 }
 0x176   : > { %6182 = vmatprep.subr.bf16.mxu1 %v6487_v47 }
 0x177   : > { %5737 = vmatpush3.bf16.msra.mxu0 %v6498_v51 }
 0x178   : > { %5738 = vmatprep.subr.bf16.mxu0 %v6499_v33 }
 0x179   : > { %6183 = vmatpush3.bf16.msra.mxu1 %v6487_v47 }
 0x17a   : > { %4848 = vmatmul.mubr.msk.bf16.gmra.mrb[40].mxu1 %vm7166_vm0, %v4847_v30  ;;  %6184 = vmatprep.subr.bf16.mxu1 %v6488_v58  ;;  %v6501_v30 = vld [vmem:[%s8970_s1 + $0x1e8] sm:$0xff]   ;;  %vm9116_vm0 = vcmp.lt.s32.totalorder %v6777_v15, 7 }
 0x17b   : > { %1328 = vmatprep.mubr.bf16.mxu1 %v1022_v40  ;;  %5739 = vmatpush3.bf16.msra.mxu0 %v6500_v55  ;;  %vm9117_vm1 = vmmov %vm9116_vm0 }
 0x17c   : > { %5740 = vmatprep.subr.bf16.mxu0 %v6501_v30 }
 0x17d   : > { %6185 = vmatpush3.bf16.msra.mxu1 %v6488_v58 }
 0x17e   : > { %6186 = vmatprep.subr.bf16.mxu1 %v6489_v43 }
 0x17f   : > { %5741 = vmatpush3.bf16.msra.mxu0 %v6502_v17 }
 0x180   : > { %5742 = vmatprep.subr.bf16.mxu0 %v6503_v35 }
 0x181   : > { %6187 = vmatpush3.bf16.msra.mxu1 %v6489_v43 }
 0x182   : > { %4851 = vmatmul.mubr.msk.bf16.gmra.mrb[44].mxu1 %vm7179_vm4, %v4850_v39  ;;  %6188 = vmatprep.subr.bf16.mxu1 %v6490_v37  ;;  %vm9115_vm4 = vcmp.lt.s32.totalorder %v6777_v15, 1 }
 0x183   : > { %5743 = vmatpush3.bf16.msra.mxu0 %v6504_v46  ;;  %vm9118_vm10 = vmmov %vm9115_vm4 }
 0x184   : > { %5744 = vmatprep.subr.bf16.mxu0 %v6505_v34 }
 0x185   : > { %6189 = vmatpush3.bf16.msra.mxu1 %v6490_v37 }
 0x187   : > { %5745 = vmatpush3.bf16.msra.mxu0 %v6506_v20 }
 0x188   : > { %5822 = vmatprep.subr.bf16.mxu0 %v6511_v63 }
 0x1f3   : > { %v6160_v31 = vpop.f32.mrb[32].mxu0 }
 0x1f4   : > { %v1371_v40 = vpop.f32.mrb[33].mxu0 }
 0x1f5   : > { %v6161_v9 = vpop.f32.mrb[34].mxu0 }
 0x1f6   : > { %v1374_v16 = vpop.f32.mrb[35].mxu0 }
 0x204   : > { %v7592_v1 = vpop.f32.mrb[36].mxu0 }
 0x205   : > { %v1387_v5 = vpop.f32.mrb[37].mxu0 }
 0x206   : > { %v7594_v12 = vpop.f32.mrb[38].mxu0 }
 0x207   : > { %v1390_v11 = vpop.f32.mrb[39].mxu0 }
 0x214   : > { %v7596_v32 = vpop.f32.mrb[40].mxu0 }
 0x215   : > { %v7598_v21 = vpop.f32.mrb[41].mxu0 }
 0x216   : > { %v7600_v44 = vpop.f32.mrb[42].mxu0 }
 0x217   : > { %v7602_v62 = vpop.f32.mrb[43].mxu0 }
 0x21d   : > { %v5666_v39 = vpop.f32.mrb[16].mxu1  ;;  %v7604_v45 = vpop.f32.mrb[44].mxu0 }
 0x21e   : > { %v5667_v13 = vpop.f32.mrb[17].mxu1  ;;  %v7611_v38 = vpop.f32.mrb[45].mxu0 }
 0x21f   : > { %v5668_v28 = vadd.f32 %v5667_v13, %v5666_v39  ;;  %v5669_v18 = vpop.f32.mrb[18].mxu1  ;;  %v7613_v50 = vpop.f32.mrb[46].mxu0 }
 0x220   : > { %v5670_v61 = vpop.f32.mrb[19].mxu1  ;;  %v7615_v3 = vpop.f32.mrb[47].mxu0 }
 0x221   : > { %v1275_v53 = vadd.f32 %v5668_v28, %v7609_v26  ;;  %v5671_v6 = vadd.f32 %v5670_v61, %v5669_v18 }
 0x223   : > { %v1372_v8 = vadd.f32 %v1371_v40, %v1275_v53  ;;  %v1278_v47 = vadd.f32 %v5671_v6, %v7609_v26 }
 0x225   : > { %v7619_v58 = vmax.f32 %v1372_v8, 0.0  ;;  %v1375_v43 = vadd.f32 %v1374_v16, %v1278_v47  ;;  %v5672_v37 = vpop.f32.mrb[20].mxu1 }
 0x226   : > { %v5673_v48 = vpop.f32.mrb[21].mxu1 }
 0x227   : > { %v1435_v25 = vmax.f32 %v1375_v43, 0.0  ;;  %v5674_v57 = vadd.f32 %v5673_v48, %v5672_v37  ;;  %v5675_v36 = vpop.f32.mrb[22].mxu1  ;;  %v1450_v59 = vrot.slane %v7619_v58, 7  ;;  %v1498_v24 = vrot.slane %v7619_v58, 1 }
 0x228   : > { %v5676_v10 = vpop.f32.mrb[23].mxu1 }
 0x229   : > { %v1451_v51 = vrot.slane %v1435_v25, 7  ;;  %v1499_v33 = vrot.slane %v1435_v25, 1  ;;  %v1283_v55 = vadd.f32 %v5674_v57, %v7609_v26  ;;  %v5677_v30 = vadd.f32 %v5676_v10, %v5675_v36 }
 0x22a   : > { %v1546_v17 = vpack.c.bf16 %v1435_v25, %v7619_v58 }
 0x22b   : > { %v7629_v35 = vsel %vm9115_vm4, %v1450_v59, %v1451_v51  ;;  %v1380_v46 = vadd.f32 %v6160_v31, %v1283_v55  ;;  %v1286_v34 = vadd.f32 %v5677_v30, %v7609_v26  ;;  %v1528_v20 = vsel %vm9116_vm0, %v1498_v24, %v1499_v33 }
 0x22c   : > { %1803 = vmatprep.mubr.bf16.mxu0 %v1546_v17 }
 0x22d   : > { %v7636_v40 = vmax.f32 %v1380_v46, 0.0  ;;  %v1383_v16 = vadd.f32 %v6161_v9, %v1286_v34  ;;  %v5678_v39 = vpop.f32.mrb[24].mxu1 }
 0x22e   : > { %v5679_v13 = vpop.f32.mrb[25].mxu1 }
 0x22f   : > { %v1452_v28 = vrot.slane %v7636_v40, 7  ;;  %v1500_v18 = vrot.slane %v7636_v40, 1  ;;  %v7640_v61 = vmax.f32 %v1383_v16, 0.0  ;;  %v5680_v31 = vadd.f32 %v5679_v13, %v5678_v39  ;;  %v5681_v53 = vpop.f32.mrb[26].mxu1 }
 0x230   : > { %v5682_v6 = vpop.f32.mrb[27].mxu1 }
 0x231   : > { %v1453_v8 = vrot.slane %v7640_v61, 7  ;;  %v1501_v47 = vrot.slane %v7640_v61, 1  ;;  %v1291_v43 = vadd.f32 %v5680_v31, %v7609_v26  ;;  %v5683_v37 = vadd.f32 %v5682_v6, %v5681_v53 }
 0x232   : > { %v1527_v9 = vsel %vm9116_vm0, %v1499_v33, %v1500_v18  ;;  %v1547_v48 = vpack.c.bf16 %v7640_v61, %v7636_v40  ;;  %v7651_v25 = vsel %vm9115_vm4, %v1451_v51, %v1452_v28 }
 0x233   : > { %v1526_v57 = vsel %vm9117_vm1, %v1500_v18, %v1501_v47  ;;  %v1388_v36 = vadd.f32 %v1387_v5, %v1291_v43  ;;  %v1294_v10 = vadd.f32 %v5683_v37, %v7609_v26  ;;  %v4975_v55 = vpack.c.bf16 %v1527_v9, %v1528_v20  ;;  %vm9119_vm1 = vmmov %vm9116_vm0 }
 0x234   : > { %v7658_v30 = vsel %vm9118_vm10, %v1452_v28, %v1453_v8  ;;  %vm9121_vm10 = vmmov %vm9116_vm0 }
 0x235   : > { %v7660_v17 = vmax.f32 %v1388_v36, 0.0  ;;  %v1391_v33 = vadd.f32 %v1390_v11, %v1294_v10  ;;  %6190 = vmatprep.mubr.msk.bf16.mxu1 %vm6890_vm6, %v4975_v55  ;;  %v5684_v46 = vpop.f32.mrb[28].mxu1  ;;  %v4954_v51 = vpack.c.bf16 %v7658_v30, %v7651_v25  ;;  %vm9120_vm6 = vmmov %vm9115_vm4  ;;  %v6517_v25 = vld [vmem:[%s8970_s1 + $0x298] sm:$0xff]  }
 0x236   : > { %v5685_v34 = vpop.f32.mrb[29].mxu1  ;;  %vm9122_vm0 = vmmov %vm9115_vm4  ;;  %v6518_v30 = vld [vmem:[%s8970_s1 + $0x258] sm:$0xff]  }
 0x237   : > { %v1454_v5 = vrot.slane %v7660_v17, 7  ;;  %v1502_v16 = vrot.slane %v7660_v17, 1  ;;  %v7668_v20 = vmax.f32 %v1391_v33, 0.0  ;;  %v5686_v39 = vadd.f32 %v5685_v34, %v5684_v46  ;;  %v5687_v13 = vpop.f32.mrb[30].mxu1  ;;  %vm9124_vm4 = vmmov %vm9122_vm0 }
 0x238   : > { %v5688_v28 = vpop.f32.mrb[31].mxu1 }
 0x239   : > { %v1525_v11 = vsel %vm9119_vm1, %v1501_v47, %v1502_v16  ;;  %v1455_v60 = vrot.slane %v7668_v20, 7  ;;  %v1503_v18 = vrot.slane %v7668_v20, 1  ;;  %v1299_v31 = vadd.f32 %v5686_v39, %v7609_v26 }
 0x23a   : > { %v4978_v53 = vpack.c.bf16 %v1525_v11, %v1526_v57  ;;  %v5689_v6 = vadd.f32 %v5688_v28, %v5687_v13  ;;  %v7679_v37 = vsel %vm9120_vm6, %v1453_v8, %v1454_v5  ;;  %vm9125_vm6 = vmmov %vm9122_vm0  ;;  %v9142_v2 = vpack.c.bf16 %v7668_v20, %v7660_v17  ;;  %v6520_v17 = vld [vmem:[%s8970_s1 + $0x2a0] sm:$0xff]   ;;  %v6524_v20 = vld [vmem:[%s8970_s1 + $0x2a8] sm:$0xff]  }
 0x23b   : > { %v1396_v9 = vadd.f32 %v7592_v1, %v1299_v31  ;;  %v1524_v47 = vsel %vm9121_vm10, %v1502_v16, %v1503_v18  ;;  %v7686_v36 = vsel %vm9122_vm0, %v1454_v5, %v1455_v60  ;;  %vm9127_vm10 = vmmov %vm9122_vm0 }
 0x23c   : > { %v1302_v10 = vadd.f32 %v5689_v6, %v7609_v26  ;;  %6191 = vmatmul.mubr.msk.bf16.vlgmr.msra.gmra.mrb[48].mxu1 %vm6946_vm9, %v4978_v53  ;;  %vm9123_vm9 = vmmov %vm9119_vm1  ;;  %v9143_v0 = vpack.c.bf16 %v7686_v36, %v7679_v37  ;;  %v6525_v37 = vld [vmem:[%s8970_s1 + $0x268] sm:$0xff]  }
 0x23d   : > { %v7693_v55 = vmax.f32 %v1396_v9, 0.0  ;;  %v5690_v8 = vpop.f32.mrb[32].mxu1  ;;  %vm9128_vm0 = vmmov %vm9119_vm1 }
 0x23e   : > { %v1399_v1 = vadd.f32 %v7594_v12, %v1302_v10  ;;  %v5691_v33 = vpop.f32.mrb[33].mxu1 }
 0x23f   : > { %v1456_v46 = vrot.slane %v7693_v55, 7  ;;  %v1504_v34 = vrot.slane %v7693_v55, 1  ;;  %v5692_v5 = vadd.f32 %v5691_v33, %v5690_v8  ;;  %v5693_v16 = vpop.f32.mrb[34].mxu1 }
 0x240   : > { %v7698_v39 = vmax.f32 %v1399_v1, 0.0  ;;  %v5694_v13 = vpop.f32.mrb[35].mxu1 }
 0x241   : > { %v1307_v22 = vadd.f32 %v5692_v5, %v7609_v26  ;;  %v5695_v28 = vadd.f32 %v5694_v13, %v5693_v16  ;;  %v1523_v11 = vsel %vm9123_vm9, %v1503_v18, %v1504_v34  ;;  %v7705_v31 = vsel %vm9124_vm4, %v1455_v60, %v1456_v46  ;;  %vm9129_vm9 = vmmov %vm9124_vm4 }
 0x242   : > { %v1457_v12 = vrot.slane %v7698_v39, 7  ;;  %v1505_v53 = vrot.slane %v7698_v39, 1  ;;  %v4981_v6 = vpack.c.bf16 %v1523_v11, %v1524_v47  ;;  %v9144_v27 = vpack.c.bf16 %v7698_v39, %v7693_v55 }
 0x243   : > { %v1404_v10 = vadd.f32 %v7598_v21, %v1307_v22  ;;  %v1310_v8 = vadd.f32 %v5695_v28, %v7609_v26 }
 0x244   : > { %6194 = vmatprep.mubr.msk.bf16.mxu1 %vm6961_vm11, %v4981_v6  ;;  %v1522_v18 = vsel %vm9119_vm1, %v1504_v34, %v1505_v53  ;;  %v7719_v60 = vsel %vm9125_vm6, %v1456_v46, %v1457_v12  ;;  %vm9126_vm11 = vmmov %vm9119_vm1 }
 0x245   : > { %v7721_v1 = vmax.f32 %v1404_v10, 0.0  ;;  %v1407_v47 = vadd.f32 %v7602_v62, %v1310_v8  ;;  %v5696_v33 = vpop.f32.mrb[36].mxu1  ;;  %vm9131_vm1 = vmmov %vm9128_vm0  ;;  %v9145_v58 = vpack.c.bf16 %v7719_v60, %v7705_v31 }
 0x246   : > { %v5697_v5 = vpop.f32.mrb[37].mxu1  ;;  %vm9132_vm6 = vmmov %vm9124_vm4 }
 0x247   : > { %v1458_v16 = vrot.slane %v7721_v1, 7  ;;  %v1506_v29 = vrot.slane %v7721_v1, 1  ;;  %v7728_v13 = vmax.f32 %v1407_v47, 0.0  ;;  %v5698_v34 = vadd.f32 %v5697_v5, %v5696_v33  ;;  %v5699_v22 = vpop.f32.mrb[38].mxu1 }
 0x248   : > { %v5700_v28 = vpop.f32.mrb[39].mxu1 }
 0x249   : > { %v1459_v46 = vrot.slane %v7728_v13, 7  ;;  %v1507_v11 = vrot.slane %v7728_v13, 1  ;;  %v1315_v62 = vadd.f32 %v5698_v34, %v7609_v26  ;;  %v5701_v6 = vadd.f32 %v5700_v28, %v5699_v22 }
 0x24a   : > { %v1521_v10 = vsel %vm9126_vm11, %v1505_v53, %v1506_v29  ;;  %v7739_v47 = vsel %vm9127_vm10, %v1457_v12, %v1458_v16  ;;  %vm9133_vm11 = vmmov %vm9128_vm0  ;;  %v9146_v49 = vpack.c.bf16 %v7728_v13, %v7721_v1 }
 0x24b   : > { %v1412_v33 = vadd.f32 %v7596_v32, %v1315_v62  ;;  %v1318_v5 = vadd.f32 %v5701_v6, %v7609_v26  ;;  %v4984_v21 = vpack.c.bf16 %v1521_v10, %v1522_v18  ;;  %v1520_v9 = vsel %vm9128_vm0, %v1506_v29, %v1507_v11  ;;  %vm9135_vm10 = vmmov %vm9128_vm0 }
 0x24c   : > { %v7747_v34 = vsel %vm9129_vm9, %v1458_v16, %v1459_v46  ;;  %vm9137_vm9 = vmmov %vm9131_vm1 }
 0x24d   : > { %v7749_v53 = vmax.f32 %v1412_v33, 0.0  ;;  %v1415_v22 = vadd.f32 %v7600_v44, %v1318_v5  ;;  %6195 = vmatmul.mubr.msk.bf16.gmra.mrb[52].mxu1 %vm7020_vm14, %v4984_v21  ;;  %v5702_v12 = vpop.f32.mrb[40].mxu1  ;;  %vm9130_vm14 = vmmov %vm9128_vm0 }
 0x24e   : > { %v5703_v28 = vpop.f32.mrb[41].mxu1 }
 0x24f   : > { %v1460_v18 = vrot.slane %v7749_v53, 7  ;;  %v1508_v29 = vrot.slane %v7749_v53, 1  ;;  %v7758_v62 = vmax.f32 %v1415_v22, 0.0  ;;  %v5704_v16 = vadd.f32 %v5703_v28, %v5702_v12  ;;  %v5705_v6 = vpop.f32.mrb[42].mxu1 }
 0x250   : > { %v5706_v10 = vpop.f32.mrb[43].mxu1 }
 0x251   : > { %v1461_v33 = vrot.slane %v7758_v62, 7  ;;  %v1509_v44 = vrot.slane %v7758_v62, 1  ;;  %v1323_v4 = vadd.f32 %v5704_v16, %v7609_v26  ;;  %v5707_v21 = vadd.f32 %v5706_v10, %v5705_v6 }
 0x252   : > { %v1519_v5 = vsel %vm9130_vm14, %v1507_v11, %v1508_v29  ;;  %v1551_v32 = vpack.c.bf16 %v7758_v62, %v7749_v53  ;;  %v7769_v22 = vsel %vm9124_vm4, %v1459_v46, %v1460_v18 }
 0x253   : > { %v1420_v12 = vadd.f32 %v7611_v38, %v1323_v4  ;;  %v1326_v28 = vadd.f32 %v5707_v21, %v7609_v26  ;;  %v4987_v8 = vpack.c.bf16 %v1519_v5, %v1520_v9  ;;  %v1518_v57 = vsel %vm9131_vm1, %v1508_v29, %v1509_v44 }
 0x254   : > { %v1470_v16 = vsel %vm9132_vm6, %v1460_v18, %v1461_v33 }
 0x255   : > { %v1446_v6 = vmax.f32 %v1420_v12, 0.0  ;;  %v1423_v11 = vadd.f32 %v7615_v3, %v1326_v28  ;;  %6198 = vmatprep.mubr.msk.bf16.mxu1 %vm7031_vm3, %v4987_v8  ;;  %v5708_v53 = vpop.f32.mrb[44].mxu1  ;;  %v4966_v46 = vpack.c.bf16 %v1470_v16, %v7769_v22  ;;  %vm9134_vm3 = vmmov %vm9124_vm4 }
 0x256   : > { %v5709_v62 = vpop.f32.mrb[45].mxu1  ;;  %vm9136_vm0 = vmmov %vm9134_vm3 }
 0x257   : > { %v1462_v38 = vrot.slane %v1446_v6, 7  ;;  %v1510_v10 = vrot.slane %v1446_v6, 1  ;;  %v1447_v4 = vmax.f32 %v1423_v11, 0.0  ;;  %v5710_v9 = vadd.f32 %v5709_v62, %v5708_v53  ;;  %v5711_v21 = vpop.f32.mrb[46].mxu1  ;;  %vm9138_vm14 = vmmov %vm9136_vm0 }
 0x258   : > { %v5712_v5 = vpop.f32.mrb[47].mxu1  ;;  %vm9139_vm4 = vmmov %vm9136_vm0 }
 0x259   : > { %v1463_v29 = vrot.slane %v1447_v4, 7  ;;  %v1511_v43 = vrot.slane %v1447_v4, 1  ;;  %v1331_v18 = vadd.f32 %v5710_v9, %v7609_v26  ;;  %v5713_v12 = vadd.f32 %v5712_v5, %v5711_v21  ;;  %vm9141_vm6 = vmmov %vm9136_vm0 }
 0x25a   : > { %v1517_v3 = vsel %vm9133_vm11, %v1509_v44, %v1510_v10  ;;  %v1552_v14 = vpack.c.bf16 %v1447_v4, %v1446_v6  ;;  %v1469_v8 = vsel %vm9134_vm3, %v1461_v33, %v1462_v38  ;;  %vm9157_vm11 = vmmov %vm9136_vm0 }
 0x25b   : > { %v1428_v22 = vadd.f32 %v7604_v45, %v1331_v18  ;;  %v1334_v28 = vadd.f32 %v5713_v12, %v7609_v26  ;;  %v4990_v16 = vpack.c.bf16 %v1517_v3, %v1518_v57  ;;  %v1516_v11 = vsel %vm9135_vm10, %v1510_v10, %v1511_v43  ;;  %vm9158_vm3 = vmmov %vm9131_vm1 }
 0x25c   : > { %v1468_v53 = vsel %vm9136_vm0, %v1462_v38, %v1463_v29  ;;  %vm9161_vm10 = vmmov %vm9136_vm0 }
 0x25d   : > { %v1448_v62 = vmax.f32 %v1428_v22, 0.0  ;;  %v1431_v9 = vadd.f32 %v7613_v50, %v1334_v28  ;;  %6199 = vmatmul.mubr.msk.bf16.gmra.mrb[56].mxu1 %vm7079_vm15, %v4990_v16  ;;  %v4969_v44 = vpack.c.bf16 %v1468_v53, %v1469_v8  ;;  %vm9140_vm15 = vmmov %vm9131_vm1 }
 0x25f   : > { %v1464_v6 = vrot.slane %v1448_v62, 7  ;;  %v1512_v33 = vrot.slane %v1448_v62, 1  ;;  %v1449_v4 = vmax.f32 %v1431_v9, 0.0 }
 0x261   : > { %v1465_v45 = vrot.slane %v1449_v4, 7  ;;  %v1513_v21 = vrot.slane %v1449_v4, 1  ;;  %v1515_v26 = vsel %vm9137_vm9, %v1511_v43, %v1512_v33  ;;  %v1553_v57 = vpack.c.bf16 %v1449_v4, %v1448_v62  ;;  %vm9162_vm9 = vmmov %vm9131_vm1 }
 0x262   : > { %v4993_v10 = vpack.c.bf16 %v1515_v26, %v1516_v11  ;;  %v1467_v38 = vsel %vm9138_vm14, %v1463_v29, %v1464_v6  ;;  %vm9163_vm14 = vmmov %vm9131_vm1 }
 0x263   : > { %v1481_v54 = vsel %vm9139_vm4, %v1465_v45, %v1450_v59  ;;  %v1514_v50 = vsel %vm9140_vm15, %v1512_v33, %v1513_v21  ;;  %v1529_v5 = vsel %vm9131_vm1, %v1513_v21, %v1498_v24  ;;  %v1466_v43 = vsel %vm9141_vm6, %v1464_v6, %v1465_v45  ;;  %v6515_v24 = vld [vmem:[%s8970_s1 + $0x290] sm:$0xff]  }
 0x264   : > { %v4951_v18 = vpack.c.bf16 %v7629_v35, %v1481_v54  ;;  %6202 = vmatprep.mubr.msk.bf16.mxu1 %vm7093_vm13, %v4993_v10  ;;  %v4996_v29 = vpack.c.bf16 %v1529_v5, %v1514_v50  ;;  %v4972_v12 = vpack.c.bf16 %v1466_v43, %v1467_v38  ;;  %v9147_v59 = vpack.c.bf16 %v7747_v34, %v7739_v47 }
 0x265   : > { %vm9149_vm13 = vnez %v9060_v7  ;;  %v6513_v7 = vld [vmem:[%s8970_s1 + $0x288] sm:$0xff]  }
 0x266   : > { %4952 = vmatmul.mubr.msk.bf16.vlgmr.msra.gmra.mrb[48].mxu0 %vm6901_vm7, %v4951_v18  ;;  %6203 = vmatmul.mubr.msk.bf16.gmra.mrb[60].mxu1 %vm9102_vm8, %v4996_v29  ;;  %vm9148_vm7 = vnez %v9054_v23  ;;  %vm9150_vm8 = vnez %v9063_v42  ;;  %v6512_v23 = vld [vmem:[%s8970_s1 + $0x240] sm:$0xff]   ;;  %v6514_v42 = vld [vmem:[%s8970_s1 + $0x248] sm:$0xff]  }
 0x267   : > { %1811 = vmatprep.mubr.bf16.mxu0 %v1547_v48  ;;  %6222 = vmatprep.mubr.bf16.mxu1 %v6507_v56  ;;  %v6516_v48 = vld [vmem:[%s8970_s1 + $0x250] sm:$0xff]  }
 0x268   : > { %5823 = vmatpush3.bf16.msra.mxu0 %v6512_v23 }
 0x269   : > { %5824 = vmatprep.subr.bf16.mxu0 %v6513_v7 }
 0x26c   : > { %5825 = vmatpush3.bf16.msra.mxu0 %v6514_v42 }
 0x26d   : > { %5826 = vmatprep.subr.bf16.mxu0 %v6515_v24 }
 0x26e   : > { %4955 = vmatmul.mubr.msk.bf16.gmra.mrb[52].mxu0 %vm9105_vm2, %v4954_v51  ;;  %vm9151_vm2 = vnez %v9067_v52  ;;  %v6521_v51 = vld [vmem:[%s8970_s1 + $0x260] sm:$0xff]  }
 0x26f   : > { %1819 = vmatprep.mubr.bf16.mxu0 %v9142_v2 }
 0x270   : > { %5827 = vmatpush3.bf16.msra.mxu0 %v6516_v48 }
 0x271   : > { %5828 = vmatprep.subr.bf16.mxu0 %v6517_v25 }
 0x274   : > { %5829 = vmatpush3.bf16.msra.mxu0 %v6518_v30 }
 0x275   : > { %5830 = vmatprep.subr.bf16.mxu0 %v6520_v17 }
 0x276   : > { %4958 = vmatmul.mubr.msk.bf16.gmra.mrb[56].mxu0 %vm9108_vm12, %v9143_v0 }
 0x277   : > { %1827 = vmatprep.mubr.bf16.mxu0 %v9144_v27 }
 0x278   : > { %5831 = vmatpush3.bf16.msra.mxu0 %v6521_v51 }
 0x279   : > { %5832 = vmatprep.subr.bf16.mxu0 %v6524_v20 }
 0x27c   : > { %5833 = vmatpush3.bf16.msra.mxu0 %v6525_v37 }
 0x27e   : > { %4961 = vmatmul.mubr.msk.bf16.gmra.mrb[60].mxu0 %vm9111_vm5, %v9145_v58 }
 0x27f   : > { %1835 = vmatprep.mubr.bf16.mxu0 %v9146_v49 }
 0x286   : > { %4964 = vmatmul.mubr.msk.bf16.gmra.mrb[64].mxu0 %vm9148_vm7, %v9147_v59 }
 0x287   : > { %1843 = vmatprep.mubr.bf16.mxu0 %v1551_v32 }
 0x28e   : > { %4967 = vmatmul.mubr.msk.bf16.gmra.mrb[68].mxu0 %vm9149_vm13, %v4966_v46  ;;  %v7912_v46 = vld [vmem:[%s8971_s2 + $0x2] ss:$0 sm:$0xff] }
 0x28f   : > { %1851 = vmatprep.mubr.bf16.mxu0 %v1552_v14 }
 0x296   : > { %4970 = vmatmul.mubr.msk.bf16.gmra.mrb[72].mxu0 %vm9150_vm8, %v4969_v44 }
 0x297   : > { %1859 = vmatprep.mubr.bf16.mxu0 %v1553_v57 }
 0x29e   : > { %4973 = vmatmul.mubr.msk.bf16.gmra.mrb[76].mxu0 %vm9151_vm2, %v4972_v12  ;;  %vm9180_vm2 = vmmov %vm9136_vm0 }
 0x30f   : > { %v6192_v52 = vpop.f32.mrb[48].mxu1 }
 0x310   : > { %v1902_v35 = vpop.f32.mrb[49].mxu1 }
 0x311   : > { %v6193_v40 = vpop.f32.mrb[50].mxu1 }
 0x312   : > { %v1905_v61 = vpop.f32.mrb[51].mxu1 }
 0x320   : > { %v7895_v36 = vpop.f32.mrb[52].mxu1 }
 0x321   : > { %v1918_v55 = vpop.f32.mrb[53].mxu1 }
 0x322   : > { %v7897_v39 = vpop.f32.mrb[54].mxu1 }
 0x323   : > { %v1921_v31 = vpop.f32.mrb[55].mxu1 }
 0x330   : > { %v7899_v60 = vpop.f32.mrb[56].mxu1 }
 0x331   : > { %v7901_v1 = vpop.f32.mrb[57].mxu1 }
 0x332   : > { %v7903_v13 = vpop.f32.mrb[58].mxu1 }
 0x333   : > { %v7905_v47 = vpop.f32.mrb[59].mxu1 }
 0x339   : > { %v5746_v34 = vpop.f32.mrb[48].mxu0  ;;  %v7907_v32 = vpop.f32.mrb[60].mxu1 }
 0x33a   : > { %v5747_v3 = vpop.f32.mrb[49].mxu0  ;;  %v7914_v14 = vpop.f32.mrb[61].mxu1 }
 0x33b   : > { %v5748_v8 = vadd.f32 %v5747_v3, %v5746_v34  ;;  %v5749_v22 = vpop.f32.mrb[50].mxu0  ;;  %v7916_v28 = vpop.f32.mrb[62].mxu1 }
 0x33c   : > { %v5750_v16 = vpop.f32.mrb[51].mxu0  ;;  %v7918_v11 = vpop.f32.mrb[63].mxu1 }
 0x33d   : > { %v1806_v53 = vadd.f32 %v5748_v8, %v7912_v46  ;;  %v5751_v62 = vadd.f32 %v5750_v16, %v5749_v22 }
 0x33f   : > { %v1903_v9 = vadd.f32 %v1902_v35, %v1806_v53  ;;  %v1809_v44 = vadd.f32 %v5751_v62, %v7912_v46 }
 0x341   : > { %v1906_v6 = vadd.f32 %v1905_v61, %v1809_v44  ;;  %v5752_v33 = vpop.f32.mrb[52].mxu0  ;;  %v1965_v45 = vmax.f32 %v1903_v9, 0.0 }
 0x342   : > { %v5753_v4 = vpop.f32.mrb[53].mxu0 }
 0x343   : > { %v1966_v21 = vmax.f32 %v1906_v6, 0.0  ;;  %v5754_v26 = vadd.f32 %v5753_v4, %v5752_v33  ;;  %v5755_v57 = vpop.f32.mrb[54].mxu0 }
 0x344   : > { %v5756_v10 = vpop.f32.mrb[55].mxu0 }
 0x345   : > { %v1814_v38 = vadd.f32 %v5754_v26, %v7912_v46  ;;  %v5757_v54 = vadd.f32 %v5756_v10, %v5755_v57  ;;  %v1989_v50 = vpack.c.bf16 %v1966_v21, %v1965_v45 }
 0x347   : > { %v1911_v5 = vadd.f32 %v6192_v52, %v1814_v38  ;;  %v1817_v43 = vadd.f32 %v5757_v54, %v7912_v46  ;;  %6206 = vmatprep.subr.bf16.mxu1 %v1989_v50 }
 0x348   : > { %6207 = vmatpush3.bf16.msra.mxu1 %v1989_v50 }
 0x349   : > { %v1914_v18 = vadd.f32 %v6193_v40, %v1817_v43  ;;  %v5758_v29 = vpop.f32.mrb[56].mxu0  ;;  %v1967_v2 = vmax.f32 %v1911_v5, 0.0 }
 0x34a   : > { %v5759_v12 = vpop.f32.mrb[57].mxu0 }
 0x34b   : > { %v1968_v0 = vmax.f32 %v1914_v18, 0.0  ;;  %v5760_v27 = vadd.f32 %v5759_v12, %v5758_v29  ;;  %v5761_v58 = vpop.f32.mrb[58].mxu0 }
 0x34c   : > { %v5762_v49 = vpop.f32.mrb[59].mxu0 }
 0x34d   : > { %v1822_v59 = vadd.f32 %v5760_v27, %v7912_v46  ;;  %v5763_v56 = vadd.f32 %v5762_v49, %v5761_v58  ;;  %v1990_v63 = vpack.c.bf16 %v1968_v0, %v1967_v2 }
 0x34f   : > { %v1919_v23 = vadd.f32 %v1918_v55, %v1822_v59  ;;  %v1825_v7 = vadd.f32 %v5763_v56, %v7912_v46  ;;  %6208 = vmatprep.subr.bf16.mxu1 %v1990_v63 }
 0x350   : > { %6209 = vmatpush3.bf16.msra.mxu1 %v1990_v63 }
 0x351   : > { %v1922_v42 = vadd.f32 %v1921_v31, %v1825_v7  ;;  %v5764_v52 = vpop.f32.mrb[60].mxu0  ;;  %v1969_v35 = vmax.f32 %v1919_v23, 0.0 }
 0x352   : > { %v5765_v24 = vpop.f32.mrb[61].mxu0 }
 0x353   : > { %v1970_v40 = vmax.f32 %v1922_v42, 0.0  ;;  %v5766_v61 = vadd.f32 %v5765_v24, %v5764_v52  ;;  %v5767_v48 = vpop.f32.mrb[62].mxu0 }
 0x354   : > { %v5768_v25 = vpop.f32.mrb[63].mxu0 }
 0x355   : > { %v1830_v30 = vadd.f32 %v5766_v61, %v7912_v46  ;;  %v5769_v17 = vadd.f32 %v5768_v25, %v5767_v48  ;;  %v1991_v51 = vpack.c.bf16 %v1970_v40, %v1969_v35 }
 0x357   : > { %v1927_v20 = vadd.f32 %v7895_v36, %v1830_v30  ;;  %v1833_v37 = vadd.f32 %v5769_v17, %v7912_v46  ;;  %6210 = vmatprep.subr.bf16.mxu1 %v1991_v51 }
 0x358   : > { %6211 = vmatpush3.bf16.msra.mxu1 %v1991_v51 }
 0x359   : > { %v1930_v55 = vadd.f32 %v7897_v39, %v1833_v37  ;;  %v5770_v31 = vpop.f32.mrb[64].mxu0  ;;  %v1971_v3 = vmax.f32 %v1927_v20, 0.0  ;;  %v6519_v20 = vld [vmem:[%s8970_s1 + $0x2c0] sm:$0xff]   ;;  %v6508_v37 = vld [vmem:[%s8972_s3 + $0x8] sm:$0xff]  }
 0x35a   : > { %v5771_v34 = vpop.f32.mrb[65].mxu0 }
 0x35b   : > { %v1972_v8 = vmax.f32 %v1930_v55, 0.0  ;;  %v5772_v22 = vadd.f32 %v5771_v34, %v5770_v31  ;;  %v5773_v16 = vpop.f32.mrb[66].mxu0  ;;  %v6510_v55 = vld [vmem:[%s8972_s3 + $0x18] sm:$0xff]   ;;  %v6527_v34 = vld [vmem:[%s8970_s1 + $0x2e0] sm:$0xff]  }
 0x35c   : > { %v5774_v53 = vpop.f32.mrb[67].mxu0  ;;  %v6526_v31 = vld [vmem:[%s8970_s1 + $0x2d8] sm:$0xff]  }
 0x35d   : > { %v1838_v62 = vadd.f32 %v5772_v22, %v7912_v46  ;;  %v5775_v9 = vadd.f32 %v5774_v53, %v5773_v16  ;;  %v1992_v44 = vpack.c.bf16 %v1972_v8, %v1971_v3  ;;  %v6528_v3 = vld [vmem:[%s8970_s1 + $0x2b0] sm:$0xff]   ;;  %v6530_v22 = vld [vmem:[%s8970_s1 + $0x2e8] sm:$0xff]   ;;  %v6532_v53 = vld [vmem:[%s8970_s1 + $0x2b8] sm:$0xff]  }
 0x35e   : > { %v6529_v8 = vld [vmem:[%s8970_s1 + $0x270] sm:$0xff]   ;;  %5834 = vmatprep.subr.bf16.mxu0 %v6528_v3 }
 0x35f   : > { %v1935_v6 = vadd.f32 %v7901_v1, %v1838_v62  ;;  %v1841_v36 = vadd.f32 %v5775_v9, %v7912_v46  ;;  %6212 = vmatprep.subr.bf16.mxu1 %v1992_v44  ;;  %5835 = vmatpush3.bf16.msra.mxu0 %v6529_v8  ;;  %v6531_v16 = vld [vmem:[%s8970_s1 + $0x2f0] sm:$0xff]   ;;  %v6533_v62 = vld [vmem:[%s8970_s1 + $0x278] sm:$0xff]  }
 0x360   : > { %6213 = vmatpush3.bf16.msra.mxu1 %v1992_v44  ;;  %5836 = vmatprep.subr.bf16.mxu0 %v6532_v53  ;;  %v6534_v9 = vld [vmem:[%s8970_s1 + $0x2f8] sm:$0xff]   ;;  %v2086_v44 = vand.u32 7, %v6777_v15 }
 0x361   : > { %v1938_v33 = vadd.f32 %v7905_v47, %v1841_v36  ;;  %v5776_v39 = vpop.f32.mrb[68].mxu0  ;;  %v1973_v45 = vmax.f32 %v1935_v6, 0.0  ;;  %v2087_v6 = vand.u32 7, %v6789_v19 }
 0x362   : > { %v5777_v4 = vpop.f32.mrb[69].mxu0  ;;  %vm7995_vm12 = vcmp.ne.s32.totalorder %v2086_v44, 7  ;;  %vm8038_vm15 = vcmp.ne.s32.totalorder %v2086_v44, 0 }
 0x363   : > { %v1974_v21 = vmax.f32 %v1938_v33, 0.0  ;;  %v5778_v26 = vadd.f32 %v5777_v4, %v5776_v39  ;;  %v5779_v57 = vpop.f32.mrb[70].mxu0  ;;  %5837 = vmatpush3.bf16.msra.mxu0 %v6533_v62  ;;  %vm7999_vm5 = vcmp.ne.s32.totalorder %v2087_v6, 7  ;;  %vm8042_vm1 = vcmp.ne.s32.totalorder %v2087_v6, 0 }
 0x364   : > { %v5780_v10 = vpop.f32.mrb[71].mxu0  ;;  %vm8033_vm4 = vmpackc.low %vm7999_vm5, %vm7995_vm12 }
 0x365   : > { %v1846_v38 = vadd.f32 %v5778_v26, %v7912_v46  ;;  %v5781_v54 = vadd.f32 %v5780_v10, %v5779_v57  ;;  %v1993_v50 = vpack.c.bf16 %v1974_v21, %v1973_v45  ;;  %v2088_v57 = vand.u32 7, %v6844_v41  ;;  %v9156_v10 = vld [vmem:[#allocation2_spill] sm:$0xff]  ;;  %vm9181_vm12 = vmmov %vm9158_vm3 }
 0x367   : > { %v1943_v5 = vadd.f32 %v7899_v60, %v1846_v38  ;;  %v1849_v1 = vadd.f32 %v5781_v54, %v7912_v46  ;;  %6214 = vmatprep.subr.bf16.mxu1 %v1993_v50  ;;  %v2089_v38 = vand.u32 7, %v9156_v10  ;;  %vm8048_vm6 = vcmp.ne.s32.totalorder %v2088_v57, 7 }
 0x368   : > { %6215 = vmatpush3.bf16.msra.mxu1 %v1993_v50 }
 0x369   : > { %v1946_v43 = vadd.f32 %v7903_v13, %v1849_v1  ;;  %v5782_v47 = vpop.f32.mrb[72].mxu0  ;;  %v1975_v29 = vmax.f32 %v1943_v5, 0.0  ;;  %vm8056_vm7 = vcmp.ne.s32.totalorder %v2089_v38, 7 }
 0x36a   : > { %v5783_v18 = vpop.f32.mrb[73].mxu0  ;;  %vm8082_vm5 = vmpackc.low %vm8056_vm7, %vm8048_vm6 }
 0x36b   : > { %v1976_v12 = vmax.f32 %v1946_v43, 0.0  ;;  %v5784_v2 = vadd.f32 %v5783_v18, %v5782_v47  ;;  %v5785_v0 = vpop.f32.mrb[74].mxu0  ;;  %vm9190_vm6 = vmmov %vm9180_vm2 }
 0x36c   : > { %v5786_v27 = vpop.f32.mrb[75].mxu0  ;;  %vm9191_vm7 = vmmov %vm9162_vm9 }
 0x36d   : > { %v1854_v58 = vadd.f32 %v5784_v2, %v7912_v46  ;;  %v5787_v49 = vadd.f32 %v5786_v27, %v5785_v0  ;;  %v1994_v59 = vpack.c.bf16 %v1976_v12, %v1975_v29  ;;  %v9159_v27 = vld [vmem:[#allocation4_spill] sm:$0xff] }
 0x36f   : > { %v1951_v56 = vadd.f32 %v7914_v14, %v1854_v58  ;;  %v1857_v60 = vadd.f32 %v5787_v49, %v7912_v46  ;;  %6216 = vmatprep.subr.bf16.mxu1 %v1994_v59  ;;  %v2090_v58 = vand.u32 7, %v9159_v27  ;;  %v9160_v49 = vld [vmem:[#allocation3_spill] sm:$0xff]  ;;  %v6537_v27 = vld [vmem:[%s8970_s1 + $0x390] sm:$0xff]  }
 0x370   : > { %6217 = vmatpush3.bf16.msra.mxu1 %v1994_v59  ;;  %v2091_v59 = vand.u32 7, %v9160_v49  ;;  %v6539_v49 = vld [vmem:[%s8970_s1 + $0x300] sm:$0xff]  }
 0x371   : > { %v1954_v63 = vadd.f32 %v7918_v11, %v1857_v60  ;;  %v5788_v13 = vpop.f32.mrb[76].mxu0  ;;  %v1977_v7 = vmax.f32 %v1951_v56, 0.0  ;;  %vm8062_vm13 = vcmp.ne.s32.totalorder %v2090_v58, 7 }
 0x372   : > { %v5789_v23 = vpop.f32.mrb[77].mxu0  ;;  %vm8068_vm8 = vcmp.ne.s32.totalorder %v2091_v59, 7 }
 0x373   : > { %v1978_v42 = vmax.f32 %v1954_v63, 0.0  ;;  %v5790_v52 = vadd.f32 %v5789_v23, %v5788_v13  ;;  %v5791_v24 = vpop.f32.mrb[78].mxu0 }
 0x374   : > { %v5792_v35 = vpop.f32.mrb[79].mxu0 }
 0x375   : > { %v1862_v40 = vadd.f32 %v5790_v52, %v7912_v46  ;;  %v5793_v61 = vadd.f32 %v5792_v35, %v5791_v24  ;;  %v1995_v48 = vpack.c.bf16 %v1978_v42, %v1977_v7  ;;  %v6548_v24 = vld [vmem:[%s8970_s1 + $0x318] sm:$0xff]   ;;  %v6549_v35 = vld [vmem:[%s8970_s1 + $0x3b0] sm:$0xff]  }
 0x377   : > { %v1959_v25 = vadd.f32 %v7907_v32, %v1862_v40  ;;  %v1865_v14 = vadd.f32 %v5793_v61, %v7912_v46  ;;  %6218 = vmatprep.subr.bf16.mxu1 %v1995_v48  ;;  %v6509_v32 = vld [vmem:[%s8972_s3 + $0x10] sm:$0xff]   ;;  %v6522_v46 = vld [vmem:[%s8970_s1 + $0x2c8] sm:$0xff]   ;;  %v6550_v40 = vld [vmem:[%s8970_s1 + $0x360] sm:$0xff]  }
 0x378   : > { %6219 = vmatpush3.bf16.msra.mxu1 %v1995_v48  ;;  %v6552_v48 = vld [vmem:[%s8970_s1 + $0x3b8] sm:$0xff]  }
 0x379   : > { %v1962_v30 = vadd.f32 %v7916_v28, %v1865_v14  ;;  %v1979_v11 = vmax.f32 %v1959_v25, 0.0  ;;  %v6523_v28 = vld [vmem:[%s8970_s1 + $0x2d0] sm:$0xff]   ;;  %v6553_v25 = vld [vmem:[%s8970_s1 + $0x368] sm:$0xff]  }
 0x37a   : > { %v6554_v14 = vld [vmem:[%s8970_s1 + $0x328] sm:$0xff]  }
 0x37b   : > { %v1980_v17 = vmax.f32 %v1962_v30, 0.0  ;;  %v9178_v30 = vld [vmem:[#allocation6_spill] sm:$0xff] }
 0x37d   : > { %v1996_v51 = vpack.c.bf16 %v1980_v17, %v1979_v11  ;;  %v2092_v11 = vand.u32 7, %v9178_v30  ;;  %v6555_v30 = vld [vmem:[%s8970_s1 + $0x370] sm:$0xff]  }
 0x37f   : > { %6220 = vmatprep.subr.bf16.mxu1 %v1996_v51 }
 0x380   : > { %6221 = vmatpush3.bf16.msra.mxu1 %v1996_v51 }
 0x381   : > { %6230 = vmatprep.subr.bf16.mxu1 %v6519_v20 }
 0x383   : > { %6223 = vmatmul.mubr.bf16.vlgmr.msra.gmra.mrb[64].mxu1 %v6508_v37 }
 0x384   : > { %6226 = vmatprep.mubr.bf16.mxu1 %v6509_v32  ;;  %6231 = vmatpush3.bf16.msra.mxu1 %v6519_v20  ;;  %v9179_v32 = vld [vmem:[#allocation5_spill] sm:$0xff] }
 0x385   : > { %6232 = vmatprep.subr.bf16.mxu1 %v6522_v46 }
 0x388   : > { %6233 = vmatpush3.bf16.msra.mxu1 %v6522_v46  ;;  %v2093_v46 = vand.u32 7, %v9179_v32 }
 0x389   : > { %6234 = vmatprep.subr.bf16.mxu1 %v6523_v28 }
 0x38b   : > { %6227 = vmatmul.mubr.bf16.gmra.mrb[68].mxu1 %v6510_v55 }
 0x38c   : > { %6235 = vmatpush3.bf16.msra.mxu1 %v6523_v28 }
 0x38d   : > { %6236 = vmatprep.subr.bf16.mxu1 %v6526_v31 }
 0x390   : > { %6237 = vmatpush3.bf16.msra.mxu1 %v6526_v31 }
 0x391   : > { %6238 = vmatprep.subr.bf16.mxu1 %v6527_v34 }
 0x394   : > { %6239 = vmatpush3.bf16.msra.mxu1 %v6527_v34 }
 0x395   : > { %6240 = vmatprep.subr.bf16.mxu1 %v6530_v22 }
 0x398   : > { %6241 = vmatpush3.bf16.msra.mxu1 %v6530_v22 }
 0x399   : > { %6242 = vmatprep.subr.bf16.mxu1 %v6531_v16 }
 0x39c   : > { %6243 = vmatpush3.bf16.msra.mxu1 %v6531_v16 }
 0x39d   : > { %6244 = vmatprep.subr.bf16.mxu1 %v6534_v9 }
 0x3a0   : > { %6245 = vmatpush3.bf16.msra.mxu1 %v6534_v9 }
 0x456   : > { %v7993_v36 = vpop.f32.mrb[64].mxu1 }
 0x457   : > { %v2055_v33 = vpop.f32.mrb[65].mxu1  ;;  %v2112_v45 = vrot.slane %v7993_v36, 7  ;;  %v2136_v21 = vrot.slane %v7993_v36, 1 }
 0x458   : > { %v8005_v26 = vpop.f32.mrb[66].mxu1  ;;  %v2110_v54 = vrot.slane %v2055_v33, 7  ;;  %v2134_v47 = vrot.slane %v2055_v33, 1 }
 0x459   : > { %v2113_v50 = vrot.slane %v8005_v26, 7  ;;  %v2137_v5 = vrot.slane %v8005_v26, 1  ;;  %v2159_v1 = vpack.c.bf16 %v8005_v26, %v7993_v36  ;;  %v2058_v43 = vpop.f32.mrb[67].mxu1 }
 0x45a   : > { %v2111_v18 = vrot.slane %v2058_v43, 7  ;;  %v2135_v29 = vrot.slane %v2058_v43, 1  ;;  %v2158_v12 = vpack.c.bf16 %v2058_v43, %v2055_v33  ;;  %v6583_v33 = vld [vmem:[%s8973_s4] sm:$0xff]  }
 0x45b   : > { %v8015_v2 = vsel %vm9157_vm11, %v2112_v45, %v2113_v50  ;;  %v2146_v0 = vsel %vm9158_vm3, %v2136_v21, %v2137_v5  ;;  %vm9184_vm11 = vmmov %vm9136_vm0 }
 0x45c   : > { %v2123_v56 = vsel %vm9161_vm10, %v2111_v18, %v2112_v45  ;;  %v2124_v60 = vsel %vm9136_vm0, %v2110_v54, %v2111_v18  ;;  %v2147_v63 = vsel %vm9162_vm9, %v2135_v29, %v2136_v21  ;;  %v2148_v13 = vsel %vm9163_vm14, %v2134_v47, %v2135_v29  ;;  %2403 = vmatprep.mubr.bf16.mxu0 %v2158_v12  ;;  %vm9185_vm3 = vmmov %vm9136_vm0  ;;  %v6586_v12 = vld [vmem:[%s8970_s1 + $0x480] sm:$0xff]  }
 0x45d   : > { %v5089_v7 = vpack.c.bf16 %v2147_v63, %v2148_v13  ;;  %v5080_v42 = vpack.c.bf16 %v8015_v2, %v2123_v56  ;;  %vm9186_vm10 = vmmov %vm9162_vm9  ;;  %v6541_v56 = vld [vmem:[%s8970_s1 + $0x348] sm:$0xff]   ;;  %v6543_v63 = vld [vmem:[%s8970_s1 + $0x3a0] sm:$0xff]  }
 0x45e   : > { %v6228_v52 = vpop.f32.mrb[68].mxu1  ;;  %vm8096_vm0 = vmpackc.low %vm8042_vm1, %vm8038_vm15  ;;  %vm2108_vm1 = vcmp.ne.s32.totalorder %v2092_v11, 7  ;;  %v6544_v13 = vld [vmem:[%s8970_s1 + $0x350] sm:$0xff]   ;;  %v6588_v2 = vld [vmem:[%s8970_s1 + $0x4c8] sm:$0xff]  }
 0x45f   : > { %v2071_v61 = vpop.f32.mrb[69].mxu1  ;;  %6246 = vmatprep.mubr.msk.bf16.mxu1 %vm8033_vm4, %v5089_v7  ;;  %v2116_v17 = vrot.slane %v6228_v52, 7  ;;  %v2140_v28 = vrot.slane %v6228_v52, 1  ;;  %vm9189_vm14 = vmmov %vm9180_vm2  ;;  %v6545_v7 = vld [vmem:[%s8970_s1 + $0x310] sm:$0xff]  }
 0x460   : > { %v2114_v51 = vrot.slane %v2071_v61, 7  ;;  %v2138_v20 = vrot.slane %v2071_v61, 1  ;;  %v6229_v37 = vpop.f32.mrb[70].mxu1  ;;  %vm8116_vm15 = vmpackc.low %vm8068_vm8, %vm8062_vm13  ;;  %vm2097_vm13 = vcmp.ne.s32.totalorder %v2089_v38, 0  ;;  %v6591_v38 = vld [vmem:[%s8970_s1 + $0x4d0] sm:$0xff]  }
 0x461   : > { %v2117_v55 = vrot.slane %v6229_v37, 7  ;;  %v2141_v31 = vrot.slane %v6229_v37, 1  ;;  %v2161_v34 = vpack.c.bf16 %v6229_v37, %v6228_v52  ;;  %v2074_v3 = vpop.f32.mrb[71].mxu1  ;;  %v6547_v52 = vld [vmem:[%s8970_s1 + $0x358] sm:$0xff]  }
 0x462   : > { %v2121_v8 = vsel %vm9180_vm2, %v2113_v50, %v2114_v51  ;;  %v2145_v22 = vsel %vm9181_vm12, %v2137_v5, %v2138_v20  ;;  %v2115_v16 = vrot.slane %v2074_v3, 7  ;;  %v2139_v53 = vrot.slane %v2074_v3, 1  ;;  %vm9192_vm2 = vmmov %vm9191_vm7  ;;  %v6585_v5 = vld [vmem:[%s8970_s1 + $0x4c0] sm:$0xff]  }
 0x463   : > { %v5092_v9 = vpack.c.bf16 %v2145_v22, %v2146_v0  ;;  %v2118_v44 = vsel %vm9184_vm11, %v2116_v17, %v2117_v55  ;;  %v2125_v6 = vsel %vm9185_vm3, %v2117_v55, %v2110_v54  ;;  %v2142_v36 = vsel %vm9186_vm10, %v2140_v28, %v2141_v31  ;;  %v6536_v0 = vld [vmem:[%s8970_s1 + $0x388] sm:$0xff]  }
 0x464   : > { %v2149_v39 = vsel %vm9162_vm9, %v2141_v31, %v2134_v47  ;;  %v5077_v4 = vpack.c.bf16 %v2124_v60, %v2125_v6  ;;  %v2119_v45 = vsel %vm9189_vm14, %v2115_v16, %v2116_v17  ;;  %v2120_v21 = vsel %vm9190_vm6, %v2114_v51, %v2115_v16  ;;  %v6542_v60 = vld [vmem:[%s8970_s1 + $0x308] sm:$0xff]   ;;  %v6557_v17 = vld [vmem:[%s8970_s1 + $0x378] sm:$0xff]  }
 0x465   : > { %v2143_v26 = vsel %vm9191_vm7, %v2139_v53, %v2140_v28  ;;  %v2144_v54 = vsel %vm9192_vm2, %v2138_v20, %v2139_v53  ;;  %v2160_v50 = vpack.c.bf16 %v2074_v3, %v2071_v61  ;;  %6247 = vmatmul.mubr.msk.bf16.vlgmr.msra.gmra.mrb[72].mxu1 %vm8082_vm5, %v5092_v9  ;;  %v5098_v43 = vpack.c.bf16 %v2149_v39, %v2142_v36  ;;  %v6551_v61 = vld [vmem:[%s8970_s1 + $0x320] sm:$0xff]   ;;  %v6558_v51 = vld [vmem:[%s8970_s1 + $0x338] sm:$0xff]  }
 0x466   : > { %5078 = vmatmul.mubr.msk.bf16.vlgmr.msra.gmra.mrb[80].mxu0 %vm8096_vm0, %v5077_v4  ;;  %v5095_v47 = vpack.c.bf16 %v2143_v26, %v2144_v54  ;;  %v5083_v18 = vpack.c.bf16 %v2120_v21, %v2121_v8  ;;  %v5086_v29 = vpack.c.bf16 %v2118_v44, %v2119_v45  ;;  %vm2109_vm12 = vcmp.ne.s32.totalorder %v2093_v46, 7 }
 0x467   : > { %2411 = vmatprep.mubr.bf16.mxu0 %v2159_v1  ;;  %vm2096_vm11 = vcmp.ne.s32.totalorder %v2088_v57, 0  ;;  %vm8128_vm8 = vmpackc.low %vm2109_vm12, %vm2108_vm1  ;;  %vm2098_vm10 = vcmp.ne.s32.totalorder %v2090_v58, 0  ;;  %vm2099_vm9 = vcmp.ne.s32.totalorder %v2091_v59, 0  ;;  %vm2100_vm6 = vcmp.ne.s32.totalorder %v2092_v11, 0  ;;  %v6535_v1 = vld [vmem:[%s8970_s1 + $0x380] sm:$0xff]   ;;  %v6540_v59 = vld [vmem:[%s8970_s1 + $0x398] sm:$0xff]  }
 0x468   : > { %6250 = vmatprep.mubr.msk.bf16.mxu1 %vm8116_vm15, %v5095_v47  ;;  %vm8132_vm3 = vmpackc.low %vm2097_vm13, %vm2096_vm11  ;;  %vm2101_vm7 = vcmp.ne.s32.totalorder %v2093_v46, 0  ;;  %6254 = vmatprep.subr.bf16.mxu1 %v6535_v1  ;;  %v6538_v58 = vld [vmem:[%s8970_s1 + $0x340] sm:$0xff]   ;;  %v6556_v11 = vld [vmem:[%s8970_s1 + $0x330] sm:$0xff]   ;;  %vm9203_vm1 = vcmp.lt.s32.totalorder %v6777_v15, 1  ;;  %vm9204_vm12 = vcmp.lt.s32.totalorder %v6777_v15, 7 }
 0x469   : > { %vm8144_vm14 = vmpackc.low %vm2099_vm9, %vm2098_vm10  ;;  %6255 = vmatpush3.bf16.msra.mxu1 %v6535_v1  ;;  %5874 = vmatprep.subr.bf16.mxu0 %v6538_v58  ;;  %v8231_v46 = vld [vmem:[%s8971_s2 + $0x3] ss:$0 sm:$0xff]  ;;  %v6589_v57 = vld [vmem:[%s8970_s1 + $0x488] sm:$0xff]  }
 0x46a   : > { %vm8150_vm2 = vmpackc.low %vm2101_vm7, %vm2100_vm6  ;;  %6256 = vmatprep.subr.bf16.mxu1 %v6536_v0  ;;  %5875 = vmatpush3.bf16.msra.mxu0 %v6539_v49 }
 0x46b   : > { %5876 = vmatprep.subr.bf16.mxu0 %v6541_v56  ;;  %vm9205_vm11 = vmmov %vm9204_vm12 }
 0x46c   : > { %vm9206_vm13 = vmmov %vm9203_vm1 }
 0x46d   : > { %6251 = vmatmul.mubr.msk.bf16.gmra.mrb[76].mxu1 %vm8128_vm8, %v5098_v43  ;;  %vm9207_vm10 = vmmov %vm9205_vm11 }
 0x46e   : > { %5081 = vmatmul.mubr.msk.bf16.gmra.mrb[84].mxu0 %vm8132_vm3, %v5080_v42  ;;  %6257 = vmatpush3.bf16.msra.mxu1 %v6536_v0  ;;  %v6546_v42 = vld [vmem:[%s8970_s1 + $0x3a8] sm:$0xff]   ;;  %vm9208_vm9 = vmmov %vm9203_vm1 }
 0x46f   : > { %2419 = vmatprep.mubr.bf16.mxu0 %v2160_v50  ;;  %6258 = vmatprep.subr.bf16.mxu1 %v6537_v27  ;;  %vm9209_vm6 = vmmov %vm9207_vm10 }
 0x470   : > { %5877 = vmatpush3.bf16.msra.mxu0 %v6542_v60  ;;  %vm9210_vm7 = vmmov %vm9203_vm1 }
 0x471   : > { %5878 = vmatprep.subr.bf16.mxu0 %v6544_v13 }
 0x472   : > { %6259 = vmatpush3.bf16.msra.mxu1 %v6537_v27 }
 0x473   : > { %6260 = vmatprep.subr.bf16.mxu1 %v6540_v59 }
 0x474   : > { %5879 = vmatpush3.bf16.msra.mxu0 %v6545_v7 }
 0x475   : > { %5880 = vmatprep.subr.bf16.mxu0 %v6547_v52 }
 0x476   : > { %5084 = vmatmul.mubr.msk.bf16.gmra.mrb[88].mxu0 %vm8144_vm14, %v5083_v18  ;;  %6261 = vmatpush3.bf16.msra.mxu1 %v6540_v59 }
 0x477   : > { %2427 = vmatprep.mubr.bf16.mxu0 %v2161_v34  ;;  %6262 = vmatprep.subr.bf16.mxu1 %v6543_v63 }
 0x478   : > { %5881 = vmatpush3.bf16.msra.mxu0 %v6548_v24 }
 0x479   : > { %5882 = vmatprep.subr.bf16.mxu0 %v6550_v40 }
 0x47a   : > { %6263 = vmatpush3.bf16.msra.mxu1 %v6543_v63 }
 0x47b   : > { %6264 = vmatprep.subr.bf16.mxu1 %v6546_v42 }
 0x47c   : > { %5883 = vmatpush3.bf16.msra.mxu0 %v6551_v61 }
 0x47d   : > { %5884 = vmatprep.subr.bf16.mxu0 %v6553_v25 }
 0x47e   : > { %5087 = vmatmul.mubr.msk.bf16.gmra.mrb[92].mxu0 %vm8150_vm2, %v5086_v29  ;;  %6265 = vmatpush3.bf16.msra.mxu1 %v6546_v42 }
 0x47f   : > { %6266 = vmatprep.subr.bf16.mxu1 %v6549_v35 }
 0x480   : > { %5885 = vmatpush3.bf16.msra.mxu0 %v6554_v14 }
 0x481   : > { %5886 = vmatprep.subr.bf16.mxu0 %v6555_v30 }
 0x482   : > { %6267 = vmatpush3.bf16.msra.mxu1 %v6549_v35 }
 0x483   : > { %6268 = vmatprep.subr.bf16.mxu1 %v6552_v48 }
 0x484   : > { %5887 = vmatpush3.bf16.msra.mxu0 %v6556_v11 }
 0x485   : > { %5888 = vmatprep.subr.bf16.mxu0 %v6557_v17 }
 0x486   : > { %6269 = vmatpush3.bf16.msra.mxu1 %v6552_v48 }
 0x488   : > { %5889 = vmatpush3.bf16.msra.mxu0 %v6558_v51 }
 0x538   : > { %v6248_v20 = vpop.f32.mrb[72].mxu1 }
 0x539   : > { %v5838_v37 = vpop.f32.mrb[80].mxu0  ;;  %v2470_v32 = vpop.f32.mrb[73].mxu1 }
 0x53a   : > { %v5839_v28 = vpop.f32.mrb[81].mxu0  ;;  %v6249_v55 = vpop.f32.mrb[74].mxu1 }
 0x53b   : > { %v5840_v31 = vadd.f32 %v5839_v28, %v5838_v37  ;;  %v5841_v34 = vpop.f32.mrb[82].mxu0  ;;  %v2473_v3 = vpop.f32.mrb[75].mxu1 }
 0x53c   : > { %v5842_v8 = vpop.f32.mrb[83].mxu0 }
 0x53d   : > { %v2406_v22 = vadd.f32 %v5840_v31, %v8231_v46  ;;  %v5843_v16 = vadd.f32 %v5842_v8, %v5841_v34 }
 0x53f   : > { %v2471_v53 = vadd.f32 %v2470_v32, %v2406_v22  ;;  %v2409_v9 = vadd.f32 %v5843_v16, %v8231_v46 }
 0x540   : > { %v8235_v44 = vpop.f32.mrb[76].mxu1 }
 0x541   : > { %v8237_v6 = vmax.f32 %v2471_v53, 0.0  ;;  %v2474_v36 = vadd.f32 %v2473_v3, %v2409_v9  ;;  %v5844_v39 = vpop.f32.mrb[84].mxu0  ;;  %v2486_v4 = vpop.f32.mrb[77].mxu1 }
 0x542   : > { %v5845_v45 = vpop.f32.mrb[85].mxu0  ;;  %v8239_v21 = vpop.f32.mrb[78].mxu1 }
 0x543   : > { %v2502_v26 = vmax.f32 %v2474_v36, 0.0  ;;  %v5846_v54 = vadd.f32 %v5845_v45, %v5844_v39  ;;  %v5847_v50 = vpop.f32.mrb[86].mxu0  ;;  %v2489_v43 = vpop.f32.mrb[79].mxu1  ;;  %v2509_v47 = vrot.slane %v8237_v6, 7  ;;  %v2533_v18 = vrot.slane %v8237_v6, 1 }
 0x544   : > { %v5848_v29 = vpop.f32.mrb[87].mxu0 }
 0x545   : > { %v2510_v1 = vrot.slane %v2502_v26, 7  ;;  %v2534_v0 = vrot.slane %v2502_v26, 1  ;;  %v2414_v27 = vadd.f32 %v5846_v54, %v8231_v46  ;;  %v5849_v58 = vadd.f32 %v5848_v29, %v5847_v50 }
 0x546   : > { %v2557_v49 = vpack.c.bf16 %v2502_v26, %v8237_v6  ;;  %v6559_v6 = vld [vmem:[%s8970_s1 + $0x440] sm:$0xff]  }
 0x547   : > { %v8249_v59 = vsel %vm9203_vm1, %v2509_v47, %v2510_v1  ;;  %v2479_v56 = vadd.f32 %v6248_v20, %v2414_v27  ;;  %v2417_v60 = vadd.f32 %v5849_v58, %v8231_v46  ;;  %v2547_v63 = vsel %vm9204_vm12, %v2533_v18, %v2534_v0  ;;  %vm9211_vm1 = vmmov %vm9209_vm6  ;;  %6278 = vmatprep.subr.bf16.mxu1 %v6559_v6 }
 0x548   : > { %2802 = vmatprep.mubr.bf16.mxu0 %v2557_v49  ;;  %vm9212_vm12 = vmmov %vm9210_vm7 }
 0x549   : > { %v8256_v13 = vmax.f32 %v2479_v56, 0.0  ;;  %v2482_v7 = vadd.f32 %v6249_v55, %v2417_v60  ;;  %v5850_v42 = vpop.f32.mrb[88].mxu0 }
 0x54a   : > { %v5851_v52 = vpop.f32.mrb[89].mxu0 }
 0x54b   : > { %v2511_v24 = vrot.slane %v8256_v13, 7  ;;  %v2535_v35 = vrot.slane %v8256_v13, 1  ;;  %v8260_v40 = vmax.f32 %v2482_v7, 0.0  ;;  %v5852_v61 = vadd.f32 %v5851_v52, %v5850_v42  ;;  %v5853_v48 = vpop.f32.mrb[90].mxu0 }
 0x54c   : > { %v5854_v25 = vpop.f32.mrb[91].mxu0 }
 0x54d   : > { %v2512_v14 = vrot.slane %v8260_v40, 7  ;;  %v2536_v30 = vrot.slane %v8260_v40, 1  ;;  %v2422_v11 = vadd.f32 %v5852_v61, %v8231_v46  ;;  %v5855_v17 = vadd.f32 %v5854_v25, %v5853_v48 }
 0x54e   : > { %v2546_v51 = vsel %vm9205_vm11, %v2534_v0, %v2535_v35  ;;  %v2558_v20 = vpack.c.bf16 %v8260_v40, %v8256_v13  ;;  %v2522_v37 = vsel %vm9206_vm13, %v2510_v1, %v2511_v24  ;;  %vm9213_vm11 = vmmov %vm9211_vm1 }
 0x54f   : > { %v2545_v32 = vsel %vm9207_vm10, %v2535_v35, %v2536_v30  ;;  %v2487_v28 = vadd.f32 %v2486_v4, %v2422_v11  ;;  %v2425_v55 = vadd.f32 %v5855_v17, %v8231_v46  ;;  %v5187_v31 = vpack.c.bf16 %v2546_v51, %v2547_v63  ;;  %vm9214_vm13 = vmmov %vm9210_vm7 }
 0x550   : > { %v2521_v34 = vsel %vm9208_vm9, %v2511_v24, %v2512_v14  ;;  %vm9215_vm10 = vmmov %vm9210_vm7 }
 0x551   : > { %v2505_v3 = vmax.f32 %v2487_v28, 0.0  ;;  %v2490_v8 = vadd.f32 %v2489_v43, %v2425_v55  ;;  %6270 = vmatprep.mubr.msk.bf16.mxu1 %vm8033_vm4, %v5187_v31  ;;  %v5856_v22 = vpop.f32.mrb[92].mxu0  ;;  %v5178_v16 = vpack.c.bf16 %v2521_v34, %v2522_v37  ;;  %vm9216_vm9 = vmmov %vm9211_vm1  ;;  %v6565_v28 = vld [vmem:[%s8970_s1 + $0x408] sm:$0xff]   ;;  %v6567_v31 = vld [vmem:[%s8970_s1 + $0x460] sm:$0xff]  }
 0x552   : > { %v5857_v53 = vpop.f32.mrb[93].mxu0  ;;  %v6566_v55 = vld [vmem:[%s8970_s1 + $0x3c8] sm:$0xff]   ;;  %v6568_v34 = vld [vmem:[%s8970_s1 + $0x410] sm:$0xff]  }
 0x553   : > { %v2513_v9 = vrot.slane %v2505_v3, 7  ;;  %v2537_v36 = vrot.slane %v2505_v3, 1  ;;  %v2506_v39 = vmax.f32 %v2490_v8, 0.0  ;;  %v5858_v45 = vadd.f32 %v5857_v53, %v5856_v22  ;;  %v5859_v26 = vpop.f32.mrb[94].mxu0  ;;  %v6570_v8 = vld [vmem:[%s8970_s1 + $0x468] sm:$0xff]   ;;  %v6571_v22 = vld [vmem:[%s8970_s1 + $0x418] sm:$0xff]  }
 0x554   : > { %v5860_v4 = vpop.f32.mrb[95].mxu0  ;;  %v6573_v53 = vld [vmem:[%s8970_s1 + $0x470] sm:$0xff]  }
 0x555   : > { %v2544_v54 = vsel %vm9209_vm6, %v2536_v30, %v2537_v36  ;;  %v2514_v50 = vrot.slane %v2506_v39, 7  ;;  %v2538_v29 = vrot.slane %v2506_v39, 1  ;;  %v2430_v1 = vadd.f32 %v5858_v45, %v8231_v46  ;;  %vm9217_vm6 = vmmov %vm9211_vm1  ;;  %v6577_v45 = vld [vmem:[%s8970_s1 + $0x428] sm:$0xff]  }
 0x556   : > { %v5190_v43 = vpack.c.bf16 %v2544_v54, %v2545_v32  ;;  %v5861_v0 = vadd.f32 %v5860_v4, %v5859_v26  ;;  %v2559_v27 = vpack.c.bf16 %v2506_v39, %v2505_v3  ;;  %v2520_v58 = vsel %vm9210_vm7, %v2512_v14, %v2513_v9  ;;  %v6564_v32 = vld [vmem:[%s8970_s1 + $0x458] sm:$0xff]   ;;  %v6569_v3 = vld [vmem:[%s8970_s1 + $0x3d0] sm:$0xff]   ;;  %v6578_v26 = vld [vmem:[%s8970_s1 + $0x3e8] sm:$0xff]  }
 0x557   : > { %v2495_v49 = vadd.f32 %v8235_v44, %v2430_v1  ;;  %v2543_v56 = vsel %vm9211_vm1, %v2537_v36, %v2538_v29  ;;  %v2519_v60 = vsel %vm9212_vm12, %v2513_v9, %v2514_v50  ;;  %v6574_v9 = vld [vmem:[%s8970_s1 + $0x420] sm:$0xff]   ;;  %v6576_v39 = vld [vmem:[%s8970_s1 + $0x478] sm:$0xff]   ;;  %v6579_v4 = vld [vmem:[%s8970_s1 + $0x430] sm:$0xff]  }
 0x558   : > { %v2433_v63 = vadd.f32 %v5861_v0, %v8231_v46  ;;  %6271 = vmatmul.mubr.msk.bf16.vlgmr.msra.gmra.mrb[80].mxu1 %vm8082_vm5, %v5190_v43  ;;  %v5181_v13 = vpack.c.bf16 %v2519_v60, %v2520_v58  ;;  %v6575_v36 = vld [vmem:[%s8970_s1 + $0x3e0] sm:$0xff]   ;;  %v6580_v54 = vld [vmem:[%s8970_s1 + $0x3f0] sm:$0xff]   ;;  %vm9218_vm1 = vmmov %vm9210_vm7 }
 0x559   : > { %v2507_v7 = vmax.f32 %v2495_v49, 0.0  ;;  %6279 = vmatpush3.bf16.msra.mxu1 %v6559_v6  ;;  %vm9219_vm12 = vmmov %vm9217_vm6 }
 0x55a   : > { %v2498_v42 = vadd.f32 %v8239_v21, %v2433_v63 }
 0x55b   : > { %v2515_v52 = vrot.slane %v2507_v7, 7  ;;  %v2539_v24 = vrot.slane %v2507_v7, 1 }
 0x55c   : > { %v2508_v35 = vmax.f32 %v2498_v42, 0.0 }
 0x55d   : > { %v2542_v44 = vsel %vm9213_vm11, %v2538_v29, %v2539_v24  ;;  %v2518_v40 = vsel %vm9214_vm13, %v2514_v50, %v2515_v52  ;;  %v6581_v50 = vld [vmem:[%s8970_s1 + $0x438] sm:$0xff]   ;;  %vm9220_vm11 = vmmov %vm9217_vm6 }
 0x55e   : > { %v2516_v61 = vrot.slane %v2508_v35, 7  ;;  %v2540_v48 = vrot.slane %v2508_v35, 1  ;;  %v5193_v25 = vpack.c.bf16 %v2542_v44, %v2543_v56  ;;  %v2560_v46 = vpack.c.bf16 %v2508_v35, %v2507_v7  ;;  %v6582_v29 = vld [vmem:[%s8970_s1 + $0x3f8] sm:$0xff]   ;;  %v8398_v56 = vld [vmem:[%s8971_s2 + $0x4] ss:$0 sm:$0xff]  ;;  %vm9221_vm13 = vmmov %vm9218_vm1 }
 0x560   : > { %v2524_v14 = vsel %vm9215_vm10, %v2516_v61, %v2509_v47  ;;  %6274 = vmatprep.mubr.msk.bf16.mxu1 %vm8116_vm15, %v5193_v25  ;;  %v2541_v21 = vsel %vm9216_vm9, %v2539_v24, %v2540_v48  ;;  %v2548_v30 = vsel %vm9217_vm6, %v2540_v48, %v2533_v18  ;;  %v2517_v11 = vsel %vm9210_vm7, %v2515_v52, %v2516_v61  ;;  %v6560_v47 = vld [vmem:[%s8970_s1 + $0x448] sm:$0xff]   ;;  %v6561_v18 = vld [vmem:[%s8970_s1 + $0x450] sm:$0xff]   ;;  %vm9222_vm10 = vmmov %vm9217_vm6 }
 0x561   : > { %v5175_v17 = vpack.c.bf16 %v8249_v59, %v2524_v14  ;;  %v5196_v51 = vpack.c.bf16 %v2548_v30, %v2541_v21  ;;  %v5184_v37 = vpack.c.bf16 %v2517_v11, %v2518_v40  ;;  %6280 = vmatprep.subr.bf16.mxu1 %v6560_v47  ;;  %v6562_v59 = vld [vmem:[%s8970_s1 + $0x400] sm:$0xff]   ;;  %vm9223_vm9 = vmmov %vm9218_vm1 }
 0x562   : > { %6281 = vmatpush3.bf16.msra.mxu1 %v6560_v47  ;;  %5926 = vmatprep.subr.bf16.mxu0 %v6562_v59  ;;  %vm9225_vm7 = vmmov %vm9217_vm6 }
 0x563   : > { %5176 = vmatmul.mubr.msk.bf16.vlgmr.msra.gmra.mrb[96].mxu0 %vm8096_vm0, %v5175_v17  ;;  %6275 = vmatmul.mubr.msk.bf16.gmra.mrb[84].mxu1 %vm8128_vm8, %v5196_v51 }
 0x564   : > { %2810 = vmatprep.mubr.bf16.mxu0 %v2558_v20  ;;  %6282 = vmatprep.subr.bf16.mxu1 %v6561_v18  ;;  %v6563_v20 = vld [vmem:[%s8970_s1 + $0x3c0] sm:$0xff]  }
 0x565   : > { %5927 = vmatpush3.bf16.msra.mxu0 %v6563_v20 }
 0x566   : > { %6283 = vmatpush3.bf16.msra.mxu1 %v6561_v18  ;;  %5928 = vmatprep.subr.bf16.mxu0 %v6565_v28 }
 0x567   : > { %6284 = vmatprep.subr.bf16.mxu1 %v6564_v32 }
 0x569   : > { %5929 = vmatpush3.bf16.msra.mxu0 %v6566_v55 }
 0x56a   : > { %6285 = vmatpush3.bf16.msra.mxu1 %v6564_v32  ;;  %5930 = vmatprep.subr.bf16.mxu0 %v6568_v34 }
 0x56b   : > { %5179 = vmatmul.mubr.msk.bf16.gmra.mrb[100].mxu0 %vm8132_vm3, %v5178_v16  ;;  %6286 = vmatprep.subr.bf16.mxu1 %v6567_v31  ;;  %v6572_v16 = vld [vmem:[%s8970_s1 + $0x3d8] sm:$0xff]  }
 0x56c   : > { %2818 = vmatprep.mubr.bf16.mxu0 %v2559_v27 }
 0x56d   : > { %5931 = vmatpush3.bf16.msra.mxu0 %v6569_v3 }
 0x56e   : > { %6287 = vmatpush3.bf16.msra.mxu1 %v6567_v31  ;;  %5932 = vmatprep.subr.bf16.mxu0 %v6571_v22 }
 0x56f   : > { %6288 = vmatprep.subr.bf16.mxu1 %v6570_v8 }
 0x571   : > { %5933 = vmatpush3.bf16.msra.mxu0 %v6572_v16 }
 0x572   : > { %6289 = vmatpush3.bf16.msra.mxu1 %v6570_v8  ;;  %5934 = vmatprep.subr.bf16.mxu0 %v6574_v9 }
 0x573   : > { %5182 = vmatmul.mubr.msk.bf16.gmra.mrb[104].mxu0 %vm8144_vm14, %v5181_v13  ;;  %6290 = vmatprep.subr.bf16.mxu1 %v6573_v53 }
 0x574   : > { %2826 = vmatprep.mubr.bf16.mxu0 %v2560_v46 }
 0x575   : > { %5935 = vmatpush3.bf16.msra.mxu0 %v6575_v36 }
 0x576   : > { %6291 = vmatpush3.bf16.msra.mxu1 %v6573_v53  ;;  %5936 = vmatprep.subr.bf16.mxu0 %v6577_v45 }
 0x577   : > { %6292 = vmatprep.subr.bf16.mxu1 %v6576_v39 }
 0x579   : > { %5937 = vmatpush3.bf16.msra.mxu0 %v6578_v26 }
 0x57a   : > { %6293 = vmatpush3.bf16.msra.mxu1 %v6576_v39  ;;  %5938 = vmatprep.subr.bf16.mxu0 %v6579_v4 }
 0x57b   : > { %5185 = vmatmul.mubr.msk.bf16.gmra.mrb[108].mxu0 %vm8150_vm2, %v5184_v37 }
 0x57d   : > { %5939 = vmatpush3.bf16.msra.mxu0 %v6580_v54 }
 0x57e   : > { %5940 = vmatprep.subr.bf16.mxu0 %v6581_v50 }
 0x581   : > { %5941 = vmatpush3.bf16.msra.mxu0 %v6582_v29 }
 0x582   : > { %5984 = vmatprep.subr.bf16.mxu0 %v6585_v5 }
 0x62b   : > { %v6272_v1 = vpop.f32.mrb[80].mxu1 }
 0x62c   : > { %v2869_v43 = vpop.f32.mrb[81].mxu1 }
 0x62d   : > { %v6273_v0 = vpop.f32.mrb[82].mxu1 }
 0x62e   : > { %v2872_v27 = vpop.f32.mrb[83].mxu1 }
 0x636   : > { %v5890_v58 = vpop.f32.mrb[96].mxu0  ;;  %v8393_v49 = vpop.f32.mrb[84].mxu1 }
 0x637   : > { %v5891_v60 = vpop.f32.mrb[97].mxu0  ;;  %v2885_v63 = vpop.f32.mrb[85].mxu1 }
 0x638   : > { %v5892_v13 = vadd.f32 %v5891_v60, %v5890_v58  ;;  %v5893_v7 = vpop.f32.mrb[98].mxu0  ;;  %v8400_v42 = vpop.f32.mrb[86].mxu1 }
 0x639   : > { %v5894_v52 = vpop.f32.mrb[99].mxu0  ;;  %v2888_v24 = vpop.f32.mrb[87].mxu1 }
 0x63a   : > { %v2805_v35 = vadd.f32 %v5892_v13, %v8398_v56  ;;  %v5895_v44 = vadd.f32 %v5894_v52, %v5893_v7 }
 0x63c   : > { %v2870_v40 = vadd.f32 %v2869_v43, %v2805_v35  ;;  %v2808_v61 = vadd.f32 %v5895_v44, %v8398_v56 }
 0x63e   : > { %v8404_v48 = vmax.f32 %v2870_v40, 0.0  ;;  %v2873_v25 = vadd.f32 %v2872_v27, %v2808_v61  ;;  %v5896_v46 = vpop.f32.mrb[100].mxu0 }
 0x63f   : > { %v5897_v14 = vpop.f32.mrb[101].mxu0 }
 0x640   : > { %v2901_v21 = vmax.f32 %v2873_v25, 0.0  ;;  %v5898_v30 = vadd.f32 %v5897_v14, %v5896_v46  ;;  %v5899_v11 = vpop.f32.mrb[102].mxu0  ;;  %v2908_v17 = vrot.slane %v8404_v48, 7  ;;  %v2932_v51 = vrot.slane %v8404_v48, 1 }
 0x641   : > { %v5900_v37 = vpop.f32.mrb[103].mxu0 }
 0x642   : > { %v2909_v6 = vrot.slane %v2901_v21, 7  ;;  %v2933_v47 = vrot.slane %v2901_v21, 1  ;;  %v2813_v18 = vadd.f32 %v5898_v30, %v8398_v56  ;;  %v5901_v59 = vadd.f32 %v5900_v37, %v5899_v11 }
 0x643   : > { %v2956_v20 = vpack.c.bf16 %v2901_v21, %v8404_v48  ;;  %v6592_v48 = vld [vmem:[%s8970_s1 + $0x490] sm:$0xff]  }
 0x644   : > { %v8414_v32 = vsel %vm9218_vm1, %v2908_v17, %v2909_v6  ;;  %v2878_v28 = vadd.f32 %v6272_v1, %v2813_v18  ;;  %v2816_v55 = vadd.f32 %v5901_v59, %v8398_v56  ;;  %v2946_v31 = vsel %vm9219_vm12, %v2932_v51, %v2933_v47  ;;  %vm9226_vm12 = vmmov %vm9217_vm6 }
 0x645   : > { %3201 = vmatprep.mubr.bf16.mxu0 %v2956_v20 }
 0x646   : > { %v8421_v34 = vmax.f32 %v2878_v28, 0.0  ;;  %v2881_v3 = vadd.f32 %v6273_v0, %v2816_v55  ;;  %v5902_v8 = vpop.f32.mrb[104].mxu0 }
 0x647   : > { %v5903_v22 = vpop.f32.mrb[105].mxu0 }
 0x648   : > { %v2910_v16 = vrot.slane %v8421_v34, 7  ;;  %v2934_v53 = vrot.slane %v8421_v34, 1  ;;  %v8425_v9 = vmax.f32 %v2881_v3, 0.0  ;;  %v5904_v36 = vadd.f32 %v5903_v22, %v5902_v8  ;;  %v5905_v39 = vpop.f32.mrb[106].mxu0 }
 0x649   : > { %v5906_v45 = vpop.f32.mrb[107].mxu0 }
 0x64a   : > { %v2911_v26 = vrot.slane %v8425_v9, 7  ;;  %v2935_v4 = vrot.slane %v8425_v9, 1  ;;  %v2821_v54 = vadd.f32 %v5904_v36, %v8398_v56  ;;  %v5907_v50 = vadd.f32 %v5906_v45, %v5905_v39 }
 0x64b   : > { %v2945_v29 = vsel %vm9220_vm11, %v2933_v47, %v2934_v53  ;;  %v2957_v1 = vpack.c.bf16 %v8425_v9, %v8421_v34  ;;  %v2921_v43 = vsel %vm9221_vm13, %v2909_v6, %v2910_v16  ;;  %vm9227_vm11 = vmmov %vm9218_vm1 }
 0x64c   : > { %v2944_v0 = vsel %vm9222_vm10, %v2934_v53, %v2935_v4  ;;  %v2886_v27 = vadd.f32 %v2885_v63, %v2821_v54  ;;  %v2824_v58 = vadd.f32 %v5907_v50, %v8398_v56  ;;  %v5285_v60 = vpack.c.bf16 %v2945_v29, %v2946_v31  ;;  %vm9229_vm13 = vmmov %vm9217_vm6  ;;  %v6598_v29 = vld [vmem:[%s8970_s1 + $0x4a0] sm:$0xff]  }
 0x64d   : > { %v2920_v13 = vsel %vm9223_vm9, %v2910_v16, %v2911_v26  ;;  %vm9230_vm10 = vmmov %vm9217_vm6 }
 0x64e   : > { %v2904_v7 = vmax.f32 %v2886_v27, 0.0  ;;  %v2889_v52 = vadd.f32 %v2888_v24, %v2824_v58  ;;  %6294 = vmatprep.mubr.msk.bf16.mxu1 %vm8033_vm4, %v5285_v60  ;;  %v5908_v35 = vpop.f32.mrb[108].mxu0  ;;  %v5276_v44 = vpack.c.bf16 %v2920_v13, %v2921_v43  ;;  %vm9224_vm4 = vmmov %vm9218_vm1  ;;  %v6601_v43 = vld [vmem:[%s8970_s1 + $0x4a8] sm:$0xff]  }
 0x64f   : > { %v5909_v40 = vpop.f32.mrb[109].mxu0  ;;  %vm9231_vm9 = vmmov %vm9218_vm1 }
 0x650   : > { %v2912_v61 = vrot.slane %v2904_v7, 7  ;;  %v2936_v25 = vrot.slane %v2904_v7, 1  ;;  %v2905_v46 = vmax.f32 %v2889_v52, 0.0  ;;  %v5910_v14 = vadd.f32 %v5909_v40, %v5908_v35  ;;  %v5911_v21 = vpop.f32.mrb[110].mxu0  ;;  %v5247_v52 = vld [vmem:[%s8971_s2 + $0x5] ss:$0 sm:$0xff] }
 0x651   : > { %v5912_v63 = vpop.f32.mrb[111].mxu0 }
 0x652   : > { %v2943_v30 = vsel %vm9217_vm6, %v2935_v4, %v2936_v25  ;;  %v2913_v11 = vrot.slane %v2905_v46, 7  ;;  %v2937_v37 = vrot.slane %v2905_v46, 1  ;;  %v2829_v6 = vadd.f32 %v5910_v14, %v8398_v56 }
 0x653   : > { %v5288_v24 = vpack.c.bf16 %v2943_v30, %v2944_v0  ;;  %v5913_v47 = vadd.f32 %v5912_v63, %v5911_v21  ;;  %v2958_v23 = vpack.c.bf16 %v2905_v46, %v2904_v7  ;;  %v2919_v18 = vsel %vm9224_vm4, %v2911_v26, %v2912_v61  ;;  %vm9244_vm4 = vmmov %vm9218_vm1 }
 0x654   : > { %v2894_v59 = vadd.f32 %v8393_v49, %v2829_v6  ;;  %v2942_v20 = vsel %vm9225_vm7, %v2936_v25, %v2937_v37  ;;  %v2918_v28 = vsel %vm9218_vm1, %v2912_v61, %v2913_v11  ;;  %vm9245_vm7 = vmmov %vm9218_vm1 }
 0x655   : > { %v2832_v55 = vadd.f32 %v5913_v47, %v8398_v56  ;;  %6295 = vmatmul.mubr.msk.bf16.vlgmr.msra.gmra.mrb[88].mxu1 %vm8082_vm5, %v5288_v24  ;;  %v5279_v31 = vpack.c.bf16 %v2918_v28, %v2919_v18  ;;  %vm9228_vm5 = vmmov %vm9218_vm1 }
 0x656   : > { %v2906_v34 = vmax.f32 %v2894_v59, 0.0  ;;  %vm9246_vm1 = vmmov %vm9230_vm10 }
 0x657   : > { %v2897_v3 = vadd.f32 %v8400_v42, %v2832_v55 }
 0x658   : > { %v2914_v8 = vrot.slane %v2906_v34, 7  ;;  %v2938_v22 = vrot.slane %v2906_v34, 1 }
 0x659   : > { %v2907_v16 = vmax.f32 %v2897_v3, 0.0 }
 0x65a   : > { %v2941_v49 = vsel %vm9226_vm12, %v2937_v37, %v2938_v22  ;;  %v2917_v53 = vsel %vm9227_vm11, %v2913_v11, %v2914_v8  ;;  %vm9247_vm12 = vmmov %vm9246_vm1 }
 0x65b   : > { %v2915_v9 = vrot.slane %v2907_v16, 7  ;;  %v2939_v36 = vrot.slane %v2907_v16, 1  ;;  %v5291_v39 = vpack.c.bf16 %v2941_v49, %v2942_v20  ;;  %v2959_v56 = vpack.c.bf16 %v2907_v16, %v2906_v34  ;;  %vm9248_vm11 = vmmov %vm9244_vm4 }
 0x65d   : > { %v2923_v62 = vsel %vm9228_vm5, %v2915_v9, %v2908_v17  ;;  %6298 = vmatprep.mubr.msk.bf16.mxu1 %vm8116_vm15, %v5291_v39  ;;  %v2940_v42 = vsel %vm9229_vm13, %v2938_v22, %v2939_v36  ;;  %v2947_v45 = vsel %vm9230_vm10, %v2939_v36, %v2932_v51  ;;  %v2916_v26 = vsel %vm9231_vm9, %v2914_v8, %v2915_v9  ;;  %v6594_v17 = vld [vmem:[%s8970_s1 + $0x4d8] sm:$0xff]   ;;  %vm9249_vm5 = vmmov %vm9244_vm4 }
 0x65e   : > { %v5273_v4 = vpack.c.bf16 %v8414_v32, %v2923_v62  ;;  %v5294_v54 = vpack.c.bf16 %v2947_v45, %v2940_v42  ;;  %v5282_v50 = vpack.c.bf16 %v2916_v26, %v2917_v53  ;;  %v6595_v51 = vld [vmem:[%s8970_s1 + $0x498] sm:$0xff]   ;;  %v6597_v32 = vld [vmem:[%s8970_s1 + $0x4e0] sm:$0xff]   ;;  %vm9250_vm13 = vmmov %vm9246_vm1 }
 0x65f   : > { %vm9253_vm9 = vmmov %vm9246_vm1 }
 0x660   : > { %5274 = vmatmul.mubr.msk.bf16.vlgmr.msra.gmra.mrb[112].mxu0 %vm8096_vm0, %v5273_v4  ;;  %6299 = vmatmul.mubr.msk.bf16.gmra.mrb[92].mxu1 %vm8128_vm8, %v5294_v54  ;;  %vm3325_vm0 = vcmask 523264  }
 0x661   : > { %3209 = vmatprep.mubr.bf16.mxu0 %v2957_v1  ;;  %6310 = vmatprep.mubr.msk.bf16.mxu1 %vm3325_vm0, %v6583_v33  ;;  %v6600_v1 = vld [vmem:[%s8970_s1 + $0x4e8] sm:$0xff]  }
 0x662   : > { %5985 = vmatpush3.bf16.msra.mxu0 %v6586_v12 }
 0x663   : > { %5986 = vmatprep.subr.bf16.mxu0 %v6588_v2 }
 0x666   : > { %5987 = vmatpush3.bf16.msra.mxu0 %v6589_v57 }
 0x667   : > { %5988 = vmatprep.subr.bf16.mxu0 %v6591_v38 }
 0x668   : > { %5277 = vmatmul.mubr.msk.bf16.gmra.mrb[116].mxu0 %vm8132_vm3, %v5276_v44 }
 0x669   : > { %3217 = vmatprep.mubr.bf16.mxu0 %v2958_v23 }
 0x66a   : > { %5989 = vmatpush3.bf16.msra.mxu0 %v6592_v48 }
 0x66b   : > { %5990 = vmatprep.subr.bf16.mxu0 %v6594_v17 }
 0x66e   : > { %5991 = vmatpush3.bf16.msra.mxu0 %v6595_v51 }
 0x66f   : > { %5992 = vmatprep.subr.bf16.mxu0 %v6597_v32 }
 0x670   : > { %5280 = vmatmul.mubr.msk.bf16.gmra.mrb[120].mxu0 %vm8144_vm14, %v5279_v31 }
 0x671   : > { %3225 = vmatprep.mubr.bf16.mxu0 %v2959_v56 }
 0x672   : > { %5993 = vmatpush3.bf16.msra.mxu0 %v6598_v29 }
 0x673   : > { %5994 = vmatprep.subr.bf16.mxu0 %v6600_v1 }
 0x676   : > { %5995 = vmatpush3.bf16.msra.mxu0 %v6601_v43 }
 0x678   : > { %5283 = vmatmul.mubr.msk.bf16.gmra.mrb[124].mxu0 %vm8150_vm2, %v5282_v50 }
 0x728   : > { %v6296_v0 = vpop.f32.mrb[88].mxu1 }
 0x729   : > { %v3268_v27 = vpop.f32.mrb[89].mxu1 }
 0x72a   : > { %v6297_v58 = vpop.f32.mrb[90].mxu1 }
 0x72b   : > { %v3271_v60 = vpop.f32.mrb[91].mxu1 }
 0x733   : > { %v5942_v13 = vpop.f32.mrb[112].mxu0  ;;  %v6300_v7 = vpop.f32.mrb[92].mxu1 }
 0x734   : > { %v5943_v35 = vpop.f32.mrb[113].mxu0  ;;  %v3284_v44 = vpop.f32.mrb[93].mxu1 }
 0x735   : > { %v5944_v40 = vadd.f32 %v5943_v35, %v5942_v13  ;;  %v5945_v61 = vpop.f32.mrb[114].mxu0  ;;  %v6301_v25 = vpop.f32.mrb[94].mxu1  ;;  %v6593_v13 = vld [vmem:[%s8970_s1 + $0x510] sm:$0xff]   ;;  %v6602_v35 = vld [vmem:[%s8970_s1 + $0x528] sm:$0xff]  }
 0x736   : > { %v5946_v46 = vpop.f32.mrb[115].mxu0  ;;  %v3287_v14 = vpop.f32.mrb[95].mxu1 }
 0x737   : > { %v3204_v21 = vadd.f32 %v5944_v40, %v5247_v52  ;;  %v5947_v63 = vadd.f32 %v5946_v46, %v5945_v61  ;;  %v6604_v40 = vld [vmem:[%s8970_s1 + $0x4b0] sm:$0xff]   ;;  %v6607_v46 = vld [vmem:[%s8970_s1 + $0x4b8] sm:$0xff]  }
 0x738   : > { %v6605_v61 = vld [vmem:[%s8970_s1 + $0x530] sm:$0xff]  }
 0x739   : > { %v3269_v30 = vadd.f32 %v3268_v27, %v3204_v21  ;;  %v3207_v11 = vadd.f32 %v5947_v63, %v5247_v52  ;;  %v6587_v27 = vld [vmem:[%s8970_s1 + $0x500] sm:$0xff]  }
 0x73a   : > { %v6609_v21 = vld [vmem:[%s8970_s1 + $0x580] sm:$0xff]  }
 0x73b   : > { %v3272_v37 = vadd.f32 %v3271_v60, %v3207_v11  ;;  %v5948_v6 = vpop.f32.mrb[116].mxu0  ;;  %v3299_v47 = vmax.f32 %v3269_v30, 0.0  ;;  %v6590_v60 = vld [vmem:[%s8970_s1 + $0x508] sm:$0xff]   ;;  %v6610_v63 = vld [vmem:[%s8970_s1 + $0x5c0] sm:$0xff]   ;;  %v3381_v30 = vand.u32 3, %v6777_v15  ;;  %v3382_v11 = vand.u32 3, %v6789_v19 }
 0x73c   : > { %v5949_v24 = vpop.f32.mrb[117].mxu0 }
 0x73d   : > { %v3300_v23 = vmax.f32 %v3272_v37, 0.0  ;;  %v5950_v18 = vadd.f32 %v5949_v24, %v5948_v6  ;;  %v5951_v59 = vpop.f32.mrb[118].mxu0  ;;  %v3383_v37 = vand.u32 3, %v6844_v41  ;;  %v3384_v24 = vand.u32 3, %v9156_v10 }
 0x73e   : > { %v5952_v20 = vpop.f32.mrb[119].mxu0  ;;  %vm8579_vm15 = vcmp.ne.s32.totalorder %v3381_v30, 0  ;;  %vm8583_vm8 = vcmp.ne.s32.totalorder %v3382_v11, 0  ;;  %vm8587_vm3 = vcmp.ne.s32.totalorder %v3381_v30, 3  ;;  %vm8591_vm14 = vcmp.ne.s32.totalorder %v3382_v11, 3  ;;  %v6632_v30 = vld [vmem:[%s8970_s1 + $0x578] sm:$0xff]  }
 0x73f   : > { %v3212_v28 = vadd.f32 %v5950_v18, %v5247_v52  ;;  %v5953_v55 = vadd.f32 %v5952_v20, %v5951_v59  ;;  %v3311_v31 = vpack.c.bf16 %v3300_v23, %v3299_v47  ;;  %vm8595_vm2 = vcmp.ne.s32.totalorder %v3383_v37, 3  ;;  %vm8621_vm10 = vmpackc.low %vm8583_vm8, %vm8579_vm15  ;;  %v6633_v11 = vld [vmem:[%s8970_s1 + $0x640] sm:$0xff]  }
 0x740   : > { %vm8599_vm6 = vcmp.ne.s32.totalorder %v3384_v24, 3 }
 0x741   : > { %v3277_v34 = vadd.f32 %v6296_v0, %v3212_v28  ;;  %v3215_v3 = vadd.f32 %v5953_v55, %v5247_v52  ;;  %6302 = vmatprep.subr.bf16.mxu1 %v3311_v31  ;;  %v9240_v55 = vmov 0 }
 0x742   : > { %6303 = vmatpush3.bf16.msra.mxu1 %v3311_v31  ;;  %v9241_v55 = vsel %vm8595_vm2, 4294967295, %v9240_v55 }
 0x743   : > { %v3280_v8 = vadd.f32 %v6297_v58, %v3215_v3  ;;  %v5954_v22 = vpop.f32.mrb[120].mxu0  ;;  %v3301_v49 = vmax.f32 %v3277_v34, 0.0  ;;  %v6584_v58 = vld [vmem:[%s8973_s4 + $0x8] sm:$0xff]  }
 0x744   : > { %v5955_v16 = vpop.f32.mrb[121].mxu0 }
 0x745   : > { %v3302_v53 = vmax.f32 %v3280_v8, 0.0  ;;  %v5956_v9 = vadd.f32 %v5955_v16, %v5954_v22  ;;  %v5957_v36 = vpop.f32.mrb[122].mxu0 }
 0x746   : > { %v5958_v39 = vpop.f32.mrb[123].mxu0 }
 0x747   : > { %v3220_v56 = vadd.f32 %v5956_v9, %v5247_v52  ;;  %v5959_v62 = vadd.f32 %v5958_v39, %v5957_v36  ;;  %v3312_v42 = vpack.c.bf16 %v3302_v53, %v3301_v49  ;;  %v9242_v9 = vmov 0 }
 0x748   : > { %v9243_v9 = vsel %vm8599_vm6, 4294967295, %v9242_v9 }
 0x749   : > { %v3285_v45 = vadd.f32 %v3284_v44, %v3220_v56  ;;  %v3223_v26 = vadd.f32 %v5959_v62, %v5247_v52  ;;  %6304 = vmatprep.subr.bf16.mxu1 %v3312_v42  ;;  %v6603_v44 = vld [vmem:[%s8970_s1 + $0x4f0] sm:$0xff]  }
 0x74a   : > { %6305 = vmatpush3.bf16.msra.mxu1 %v3312_v42  ;;  %5996 = vmatprep.subr.bf16.mxu0 %v6603_v44  ;;  %v6624_v44 = vld [vmem:[%s8970_s1 + $0x5a8] sm:$0xff]  }
 0x74b   : > { %v3288_v4 = vadd.f32 %v3287_v14, %v3223_v26  ;;  %v5960_v54 = vpop.f32.mrb[124].mxu0  ;;  %v3303_v33 = vmax.f32 %v3285_v45, 0.0  ;;  %5997 = vmatpush3.bf16.msra.mxu0 %v6604_v40  ;;  %v6608_v14 = vld [vmem:[%s8970_s1 + $0x538] sm:$0xff]   ;;  %v6625_v40 = vld [vmem:[%s8970_s1 + $0x5e8] sm:$0xff]  }
 0x74c   : > { %v5961_v50 = vpop.f32.mrb[125].mxu0 }
 0x74d   : > { %v3304_v5 = vmax.f32 %v3288_v4, 0.0  ;;  %v5962_v12 = vadd.f32 %v5961_v50, %v5960_v54  ;;  %v5963_v2 = vpop.f32.mrb[126].mxu0 }
 0x74e   : > { %v5964_v57 = vpop.f32.mrb[127].mxu0 }
 0x74f   : > { %v3228_v38 = vadd.f32 %v5962_v12, %v5247_v52  ;;  %v5965_v48 = vadd.f32 %v5964_v57, %v5963_v2  ;;  %v3313_v17 = vpack.c.bf16 %v3304_v5, %v3303_v33  ;;  %v6611_v2 = vld [vmem:[%s8970_s1 + $0x540] sm:$0xff]   ;;  %v5521_v5 = vld [vmem:[%s8971_s2 + $0x8] ss:$0 sm:$0xff] }
 0x751   : > { %v3293_v51 = vadd.f32 %v6300_v7, %v3228_v38  ;;  %v3231_v32 = vadd.f32 %v5965_v48, %v5247_v52  ;;  %6306 = vmatprep.subr.bf16.mxu1 %v3313_v17  ;;  %v6596_v7 = vld [vmem:[%s8970_s1 + $0x518] sm:$0xff]   ;;  %v6599_v52 = vld [vmem:[%s8970_s1 + $0x520] sm:$0xff]   ;;  %v6612_v48 = vld [vmem:[%s8970_s1 + $0x588] sm:$0xff]  }
 0x752   : > { %6307 = vmatpush3.bf16.msra.mxu1 %v3313_v17  ;;  %v6613_v17 = vld [vmem:[%s8970_s1 + $0x5c8] sm:$0xff]  }
 0x753   : > { %v3296_v29 = vadd.f32 %v6301_v25, %v3231_v32  ;;  %v3305_v1 = vmax.f32 %v3293_v51, 0.0  ;;  %v6606_v25 = vld [vmem:[%s8970_s1 + $0x4f8] sm:$0xff]  }
 0x754   : > { %5998 = vmatprep.subr.bf16.mxu0 %v6606_v25  ;;  %v6627_v25 = vld [vmem:[%s8970_s1 + $0x5b0] sm:$0xff]  }
 0x755   : > { %v3306_v43 = vmax.f32 %v3296_v29, 0.0  ;;  %5999 = vmatpush3.bf16.msra.mxu0 %v6607_v46  ;;  %v6614_v29 = vld [vmem:[%s8970_s1 + $0x548] sm:$0xff]   ;;  %v6628_v46 = vld [vmem:[%s8970_s1 + $0x5f0] sm:$0xff]  }
 0x756   : > { %6022 = vmatprep.subr.bf16.mxu0 %v6609_v21  ;;  %v6630_v21 = vld [vmem:[%s8970_s1 + $0x5b8] sm:$0xff]  }
 0x757   : > { %v3314_v0 = vpack.c.bf16 %v3306_v43, %v3305_v1  ;;  %v6615_v43 = vld [vmem:[%s8970_s1 + $0x590] sm:$0xff]  }
 0x759   : > { %6308 = vmatprep.subr.bf16.mxu1 %v3314_v0 }
 0x75a   : > { %6309 = vmatpush3.bf16.msra.mxu1 %v3314_v0  ;;  %v6616_v0 = vld [vmem:[%s8970_s1 + $0x5d0] sm:$0xff]  }
 0x75b   : > { %6314 = vmatprep.subr.bf16.mxu1 %v6587_v27 }
 0x75d   : > { %6311 = vmatmul.mubr.msk.bf16.vlgmr.msra.gmra.mrb[96].mxu1 %vm3325_vm0, %v6584_v58  ;;  %vm8631_vm0 = vmpackc.low %vm8591_vm14, %vm8587_vm3  ;;  %v6618_v58 = vld [vmem:[%s8970_s1 + $0x598] sm:$0xff]  }
 0x75e   : > { %6315 = vmatpush3.bf16.msra.mxu1 %v6587_v27  ;;  %v6617_v27 = vld [vmem:[%s8970_s1 + $0x550] sm:$0xff]  }
 0x75f   : > { %6316 = vmatprep.subr.bf16.mxu1 %v6590_v60 }
 0x762   : > { %6317 = vmatpush3.bf16.msra.mxu1 %v6590_v60  ;;  %v6619_v60 = vld [vmem:[%s8970_s1 + $0x5d8] sm:$0xff]  }
 0x763   : > { %6318 = vmatprep.subr.bf16.mxu1 %v6593_v13 }
 0x766   : > { %6319 = vmatpush3.bf16.msra.mxu1 %v6593_v13  ;;  %v6620_v13 = vld [vmem:[%s8970_s1 + $0x558] sm:$0xff]  }
 0x767   : > { %6320 = vmatprep.subr.bf16.mxu1 %v6596_v7 }
 0x76a   : > { %6321 = vmatpush3.bf16.msra.mxu1 %v6596_v7  ;;  %v6621_v7 = vld [vmem:[%s8970_s1 + $0x5a0] sm:$0xff]  }
 0x76b   : > { %6322 = vmatprep.subr.bf16.mxu1 %v6599_v52 }
 0x76e   : > { %6323 = vmatpush3.bf16.msra.mxu1 %v6599_v52  ;;  %v6622_v52 = vld [vmem:[%s8970_s1 + $0x5e0] sm:$0xff]  }
 0x76f   : > { %6324 = vmatprep.subr.bf16.mxu1 %v6602_v35 }
 0x772   : > { %6325 = vmatpush3.bf16.msra.mxu1 %v6602_v35  ;;  %v6623_v35 = vld [vmem:[%s8970_s1 + $0x560] sm:$0xff]  }
 0x773   : > { %6326 = vmatprep.subr.bf16.mxu1 %v6605_v61 }
 0x776   : > { %6327 = vmatpush3.bf16.msra.mxu1 %v6605_v61  ;;  %v6626_v61 = vld [vmem:[%s8970_s1 + $0x568] sm:$0xff]  }
 0x777   : > { %6328 = vmatprep.subr.bf16.mxu1 %v6608_v14 }
 0x77a   : > { %6329 = vmatpush3.bf16.msra.mxu1 %v6608_v14  ;;  %v6629_v14 = vld [vmem:[%s8970_s1 + $0x570] sm:$0xff]  }
 0x77b   : > { %6334 = vmatprep.subr.bf16.mxu1 %v6610_v63 }
 0x830   : > { %v6312_v6 = vpop.f32.mrb[96].mxu1 }
 0x831   : > { %v3366_v47 = vpop.f32.mrb[97].mxu1  ;;  %v3395_v41 = vrot.slane %v6312_v6, 7  ;;  %v3407_v31 = vrot.slane %v6312_v6, 1 }
 0x832   : > { %v3393_v20 = vrot.slane %v3366_v47, 7  ;;  %v3405_v10 = vrot.slane %v3366_v47, 1  ;;  %v6313_v28 = vpop.f32.mrb[98].mxu1 }
 0x833   : > { %v3396_v34 = vrot.slane %v6313_v28, 7  ;;  %v3408_v3 = vrot.slane %v6313_v28, 1  ;;  %v3418_v8 = vpack.c.bf16 %v6313_v28, %v6312_v6  ;;  %v3369_v22 = vpop.f32.mrb[99].mxu1 }
 0x834   : > { %v3394_v16 = vrot.slane %v3369_v22, 7  ;;  %v3406_v49 = vrot.slane %v3369_v22, 1  ;;  %v3417_v53 = vpack.c.bf16 %v3369_v22, %v3366_v47  ;;  %v5349_v47 = vld [vmem:[%s8971_s2 + $0x6] ss:$0 sm:$0xff] }
 0x835   : > { %v3397_v36 = vsel %vm9244_vm4, %v3395_v41, %v3396_v34  ;;  %v3400_v39 = vsel %vm9245_vm7, %v3396_v34, %v3393_v20  ;;  %v3409_v56 = vsel %vm9246_vm1, %v3407_v31, %v3408_v3  ;;  %v3412_v62 = vsel %vm9247_vm12, %v3408_v3, %v3405_v10  ;;  %vm8642_vm4 = vmpackc.low %vm8599_vm6, %vm8595_vm2 }
 0x836   : > { %v5384_v42 = vpack.c.bf16 %v3412_v62, %v3409_v56  ;;  %v3398_v45 = vsel %vm9248_vm11, %v3394_v16, %v3395_v41  ;;  %v3399_v26 = vsel %vm9249_vm5, %v3393_v20, %v3394_v16  ;;  %v3410_v4 = vsel %vm9250_vm13, %v3406_v49, %v3407_v31  ;;  %3656 = vmatprep.mubr.bf16.mxu0 %v3417_v53  ;;  %vm9264_vm11 = vmmov %vm9249_vm5 }
 0x837   : > { %v3411_v50 = vsel %vm9253_vm9, %v3405_v10, %v3406_v49  ;;  %v5375_v33 = vpack.c.bf16 %v3399_v26, %v3400_v39  ;;  %v5378_v12 = vpack.c.bf16 %v3397_v36, %v3398_v45  ;;  %vm8658_vm7 = vcmp.ne.s32.totalorder %v3383_v37, 0  ;;  %v8739_v37 = vld [vmem:[%s8970_s1 + $0x680] sm:$0xff]   ;;  %vm9265_vm5 = vmmov %vm9253_vm9 }
 0x838   : > { %v5381_v57 = vpack.c.bf16 %v3410_v4, %v3411_v50  ;;  %vm8662_vm1 = vcmp.ne.s32.totalorder %v3384_v24, 0  ;;  %vm9266_vm13 = vmmov %vm9265_vm5 }
 0x839   : > { %5376 = vmatmul.mubr.msk.bf16.vlgmr.msra.gmra.mrb[128].mxu0 %vm8621_vm10, %v5375_v33  ;;  %vm8673_vm12 = vmpackc.low %vm8662_vm1, %vm8658_vm7 }
 0x83a   : > { %6330 = vmatprep.mubr.msk.bf16.mxu1 %vm8631_vm0, %v5381_v57  ;;  %3664 = vmatprep.mubr.bf16.mxu0 %v3418_v8  ;;  %vm9267_vm9 = vmmov %vm9264_vm11 }
 0x83b   : > { %6331 = vmatmul.mubr.msk.bf16.vlgmr.msra.gmra.mrb[100].mxu1 %vm8642_vm4, %v5384_v42  ;;  %6023 = vmatpush3.bf16.msra.mxu0 %v6611_v2  ;;  %vm9269_vm6 = vmmov %vm9265_vm5 }
 0x83c   : > { %6335 = vmatpush3.bf16.msra.mxu1 %v6610_v63  ;;  %6024 = vmatprep.subr.bf16.mxu0 %v6612_v48  ;;  %v6631_v63 = vld [vmem:[%s8970_s1 + $0x5f8] sm:$0xff]   ;;  %vm9270_vm2 = vmmov %vm9267_vm9 }
 0x83d   : > { %6336 = vmatprep.subr.bf16.mxu1 %v6613_v17 }
 0x83f   : > { %6025 = vmatpush3.bf16.msra.mxu0 %v6614_v29 }
 0x840   : > { %6337 = vmatpush3.bf16.msra.mxu1 %v6613_v17  ;;  %6026 = vmatprep.subr.bf16.mxu0 %v6615_v43 }
 0x841   : > { %5379 = vmatmul.mubr.msk.bf16.gmra.mrb[132].mxu0 %vm8673_vm12, %v5378_v12  ;;  %6338 = vmatprep.subr.bf16.mxu1 %v6616_v0 }
 0x843   : > { %6027 = vmatpush3.bf16.msra.mxu0 %v6617_v27 }
 0x844   : > { %6339 = vmatpush3.bf16.msra.mxu1 %v6616_v0  ;;  %6028 = vmatprep.subr.bf16.mxu0 %v6618_v58 }
 0x845   : > { %6340 = vmatprep.subr.bf16.mxu1 %v6619_v60 }
 0x847   : > { %6029 = vmatpush3.bf16.msra.mxu0 %v6620_v13 }
 0x848   : > { %6341 = vmatpush3.bf16.msra.mxu1 %v6619_v60  ;;  %6030 = vmatprep.subr.bf16.mxu0 %v6621_v7 }
 0x849   : > { %6342 = vmatprep.subr.bf16.mxu1 %v6622_v52 }
 0x84b   : > { %6031 = vmatpush3.bf16.msra.mxu0 %v6623_v35 }
 0x84c   : > { %6343 = vmatpush3.bf16.msra.mxu1 %v6622_v52  ;;  %6032 = vmatprep.subr.bf16.mxu0 %v6624_v44 }
 0x84d   : > { %6344 = vmatprep.subr.bf16.mxu1 %v6625_v40 }
 0x84f   : > { %6033 = vmatpush3.bf16.msra.mxu0 %v6626_v61 }
 0x850   : > { %6345 = vmatpush3.bf16.msra.mxu1 %v6625_v40  ;;  %6034 = vmatprep.subr.bf16.mxu0 %v6627_v25 }
 0x851   : > { %6346 = vmatprep.subr.bf16.mxu1 %v6628_v46 }
 0x853   : > { %6035 = vmatpush3.bf16.msra.mxu0 %v6629_v14 }
 0x854   : > { %6347 = vmatpush3.bf16.msra.mxu1 %v6628_v46  ;;  %6036 = vmatprep.subr.bf16.mxu0 %v6630_v21 }
 0x855   : > { %6348 = vmatprep.subr.bf16.mxu1 %v6631_v63 }
 0x857   : > { %6037 = vmatpush3.bf16.msra.mxu0 %v6632_v30  ;;  %v6635_v30 = vld [vmem:[%s8970_s1 + $0x600] sm:$0xff]  }
 0x858   : > { %6349 = vmatpush3.bf16.msra.mxu1 %v6631_v63  ;;  %6060 = vmatprep.subr.bf16.mxu0 %v6633_v11 }
 0x859   : > { %6354 = vmatprep.subr.bf16.mxu1 %v8739_v37 }
 0x90c   : > { %v6000_v6 = vpop.f32.mrb[128].mxu0 }
 0x90d   : > { %v6001_v24 = vpop.f32.mrb[129].mxu0 }
 0x90e   : > { %v6002_v41 = vadd.f32 %v6001_v24, %v6000_v6  ;;  %v6332_v20 = vpop.f32.mrb[100].mxu1  ;;  %v6003_v10 = vpop.f32.mrb[130].mxu0 }
 0x90f   : > { %v3707_v28 = vpop.f32.mrb[101].mxu1  ;;  %v6004_v31 = vpop.f32.mrb[131].mxu0 }
 0x910   : > { %v3659_v34 = vadd.f32 %v6002_v41, %v5349_v47  ;;  %v6005_v3 = vadd.f32 %v6004_v31, %v6003_v10  ;;  %v6333_v8 = vpop.f32.mrb[102].mxu1  ;;  %v6637_v41 = vld [vmem:[%s8970_s1 + $0x688] sm:$0xff]   ;;  %v6639_v10 = vld [vmem:[%s8970_s1 + $0x650] sm:$0xff]  }
 0x911   : > { %v3710_v22 = vpop.f32.mrb[103].mxu1  ;;  %v6641_v31 = vld [vmem:[%s8970_s1 + $0x610] sm:$0xff]  }
 0x912   : > { %v3708_v16 = vadd.f32 %v3707_v28, %v3659_v34  ;;  %v3662_v49 = vadd.f32 %v6005_v3, %v5349_v47  ;;  %v6640_v28 = vld [vmem:[%s8970_s1 + $0x690] sm:$0xff]   ;;  %v6643_v34 = vld [vmem:[%s8970_s1 + $0x698] sm:$0xff]  }
 0x913   : > { %v6644_v3 = vld [vmem:[%s8970_s1 + $0x618] sm:$0xff]  }
 0x914   : > { %v3722_v53 = vmax.f32 %v3708_v16, 0.0  ;;  %v3711_v36 = vadd.f32 %v3710_v22, %v3662_v49  ;;  %v6006_v39 = vpop.f32.mrb[132].mxu0  ;;  %v6646_v22 = vld [vmem:[%s8970_s1 + $0x6a0] sm:$0xff]   ;;  %v6648_v49 = vld [vmem:[%s8970_s1 + $0x668] sm:$0xff]  }
 0x915   : > { %v6007_v56 = vpop.f32.mrb[133].mxu0  ;;  %v6647_v16 = vld [vmem:[%s8970_s1 + $0x620] sm:$0xff]  }
 0x916   : > { %v3723_v62 = vmax.f32 %v3711_v36, 0.0  ;;  %v6008_v42 = vadd.f32 %v6007_v56, %v6006_v39  ;;  %v6009_v45 = vpop.f32.mrb[134].mxu0  ;;  %v3726_v26 = vrot.slane %v3722_v53, 7  ;;  %v3738_v4 = vrot.slane %v3722_v53, 1  ;;  %v6650_v36 = vld [vmem:[%s8970_s1 + $0x628] sm:$0xff]   ;;  %v6651_v39 = vld [vmem:[%s8970_s1 + $0x670] sm:$0xff]  }
 0x917   : > { %v6010_v50 = vpop.f32.mrb[135].mxu0  ;;  %v6652_v56 = vld [vmem:[%s8970_s1 + $0x6b0] sm:$0xff]  }
 0x918   : > { %v3727_v33 = vrot.slane %v3723_v62, 7  ;;  %v3739_v12 = vrot.slane %v3723_v62, 1  ;;  %v3667_v2 = vadd.f32 %v6008_v42, %v5349_v47  ;;  %v6011_v57 = vadd.f32 %v6010_v50, %v6009_v45  ;;  %v6654_v42 = vld [vmem:[%s8970_s1 + $0x678] sm:$0xff]  }
 0x919   : > { %v3750_v48 = vpack.c.bf16 %v3723_v62, %v3722_v53  ;;  %v6649_v53 = vld [vmem:[%s8970_s1 + $0x6a8] sm:$0xff]   ;;  %v6653_v62 = vld [vmem:[%s8970_s1 + $0x630] sm:$0xff]   ;;  %v6655_v45 = vld [vmem:[%s8970_s1 + $0x6b8] sm:$0xff]  }
 0x91a   : > { %v3732_v17 = vsel %vm9264_vm11, %v3726_v26, %v3727_v33  ;;  %v3716_v29 = vadd.f32 %v6332_v20, %v3667_v2  ;;  %v3670_v43 = vadd.f32 %v6011_v57, %v5349_v47  ;;  %v3744_v0 = vsel %vm9265_vm5, %v3738_v4, %v3739_v12  ;;  %vm9268_vm11 = vmmov %vm9267_vm9  ;;  %v6636_v47 = vld [vmem:[%s8970_s1 + $0x648] sm:$0xff]  }
 0x91b   : > { %3989 = vmatprep.mubr.bf16.mxu0 %v3750_v48  ;;  %v6638_v20 = vld [vmem:[%s8970_s1 + $0x608] sm:$0xff]  }
 0x91c   : > { %v3724_v27 = vmax.f32 %v3716_v29, 0.0  ;;  %v3719_v58 = vadd.f32 %v6333_v8, %v3670_v43  ;;  %v6645_v8 = vld [vmem:[%s8970_s1 + $0x660] sm:$0xff]  }
 0x91e   : > { %v3728_v60 = vrot.slane %v3724_v27, 7  ;;  %v3740_v13 = vrot.slane %v3724_v27, 1  ;;  %v3725_v7 = vmax.f32 %v3719_v58, 0.0 }
 0x920   : > { %v3729_v52 = vrot.slane %v3725_v7, 7  ;;  %v3741_v35 = vrot.slane %v3725_v7, 1  ;;  %v3743_v44 = vsel %vm9266_vm13, %v3739_v12, %v3740_v13  ;;  %v3751_v40 = vpack.c.bf16 %v3725_v7, %v3724_v27  ;;  %v5435_v12 = vld [vmem:[%s8971_s2 + $0x7] ss:$0 sm:$0xff]  ;;  %vm9272_vm13 = vmmov %vm9265_vm5 }
 0x921   : > { %v5467_v61 = vpack.c.bf16 %v3743_v44, %v3744_v0  ;;  %v3731_v25 = vsel %vm9267_vm9, %v3727_v33, %v3728_v60  ;;  %vm9273_vm9 = vmmov %vm9270_vm2 }
 0x922   : > { %v3733_v46 = vsel %vm9268_vm11, %v3729_v52, %v3726_v26  ;;  %v3742_v14 = vsel %vm9265_vm5, %v3740_v13, %v3741_v35  ;;  %v3745_v21 = vsel %vm9269_vm6, %v3741_v35, %v3738_v4  ;;  %v3730_v63 = vsel %vm9270_vm2, %v3728_v60, %v3729_v52  ;;  %v6656_v26 = vld [vmem:[%s8970_s1 + $0x638] sm:$0xff]   ;;  %vm9271_vm6 = vmmov %vm9265_vm5 }
 0x923   : > { %v5461_v11 = vpack.c.bf16 %v3732_v17, %v3733_v46  ;;  %6350 = vmatprep.mubr.msk.bf16.mxu1 %vm8631_vm0, %v5467_v61  ;;  %v5470_v6 = vpack.c.bf16 %v3745_v21, %v3742_v14  ;;  %v5464_v24 = vpack.c.bf16 %v3730_v63, %v3731_v25  ;;  %vm9274_vm11 = vmmov %vm9270_vm2 }
 0x925   : > { %5462 = vmatmul.mubr.msk.bf16.vlgmr.msra.gmra.mrb[136].mxu0 %vm8621_vm10, %v5461_v11  ;;  %6351 = vmatmul.mubr.msk.bf16.vlgmr.msra.gmra.mrb[104].mxu1 %vm8642_vm4, %v5470_v6 }
 0x926   : > { %3997 = vmatprep.mubr.bf16.mxu0 %v3751_v40  ;;  %6061 = vmatpush3.bf16.msra.mxu0 %v6635_v30 }
 0x927   : > { %6355 = vmatpush3.bf16.msra.mxu1 %v8739_v37  ;;  %6062 = vmatprep.subr.bf16.mxu0 %v6636_v47  ;;  %v6642_v37 = vld [vmem:[%s8970_s1 + $0x658] sm:$0xff]  }
 0x928   : > { %6356 = vmatprep.subr.bf16.mxu1 %v6637_v41 }
 0x92a   : > { %6063 = vmatpush3.bf16.msra.mxu0 %v6638_v20 }
 0x92b   : > { %6357 = vmatpush3.bf16.msra.mxu1 %v6637_v41  ;;  %6064 = vmatprep.subr.bf16.mxu0 %v6639_v10 }
 0x92c   : > { %6358 = vmatprep.subr.bf16.mxu1 %v6640_v28 }
 0x92d   : > { %5465 = vmatmul.mubr.msk.bf16.gmra.mrb[140].mxu0 %vm8673_vm12, %v5464_v24 }
 0x92e   : > { %6065 = vmatpush3.bf16.msra.mxu0 %v6641_v31 }
 0x92f   : > { %6359 = vmatpush3.bf16.msra.mxu1 %v6640_v28  ;;  %6066 = vmatprep.subr.bf16.mxu0 %v6642_v37 }
 0x930   : > { %6360 = vmatprep.subr.bf16.mxu1 %v6643_v34 }
 0x932   : > { %6067 = vmatpush3.bf16.msra.mxu0 %v6644_v3 }
 0x933   : > { %6361 = vmatpush3.bf16.msra.mxu1 %v6643_v34  ;;  %6068 = vmatprep.subr.bf16.mxu0 %v6645_v8 }
 0x934   : > { %6362 = vmatprep.subr.bf16.mxu1 %v6646_v22 }
 0x936   : > { %6069 = vmatpush3.bf16.msra.mxu0 %v6647_v16 }
 0x937   : > { %6363 = vmatpush3.bf16.msra.mxu1 %v6646_v22  ;;  %6070 = vmatprep.subr.bf16.mxu0 %v6648_v49 }
 0x938   : > { %6364 = vmatprep.subr.bf16.mxu1 %v6649_v53 }
 0x93a   : > { %6071 = vmatpush3.bf16.msra.mxu0 %v6650_v36 }
 0x93b   : > { %6365 = vmatpush3.bf16.msra.mxu1 %v6649_v53  ;;  %6072 = vmatprep.subr.bf16.mxu0 %v6651_v39 }
 0x93c   : > { %6366 = vmatprep.subr.bf16.mxu1 %v6652_v56 }
 0x93e   : > { %6073 = vmatpush3.bf16.msra.mxu0 %v6653_v62 }
 0x93f   : > { %6367 = vmatpush3.bf16.msra.mxu1 %v6652_v56  ;;  %6074 = vmatprep.subr.bf16.mxu0 %v6654_v42 }
 0x940   : > { %6368 = vmatprep.subr.bf16.mxu1 %v6655_v45 }
 0x942   : > { %6075 = vmatpush3.bf16.msra.mxu0 %v6656_v26 }
 0x943   : > { %6369 = vmatpush3.bf16.msra.mxu1 %v6655_v45 }
 0x9f8   : > { %v6038_v4 = vpop.f32.mrb[136].mxu0  ;;  %v6352_v50 = vpop.f32.mrb[104].mxu1 }
 0x9f9   : > { %v6039_v33 = vpop.f32.mrb[137].mxu0  ;;  %v4040_v2 = vpop.f32.mrb[105].mxu1 }
 0x9fa   : > { %v6040_v57 = vadd.f32 %v6039_v33, %v6038_v4  ;;  %v6041_v48 = vpop.f32.mrb[138].mxu0  ;;  %v6353_v17 = vpop.f32.mrb[106].mxu1 }
 0x9fb   : > { %v6042_v29 = vpop.f32.mrb[139].mxu0  ;;  %v4043_v43 = vpop.f32.mrb[107].mxu1 }
 0x9fc   : > { %v3992_v0 = vadd.f32 %v6040_v57, %v5435_v12  ;;  %v6043_v27 = vadd.f32 %v6042_v29, %v6041_v48 }
 0x9fe   : > { %v4041_v58 = vadd.f32 %v4040_v2, %v3992_v0  ;;  %v3995_v60 = vadd.f32 %v6043_v27, %v5435_v12 }
 0xa00   : > { %v4055_v13 = vmax.f32 %v4041_v58, 0.0  ;;  %v4044_v7 = vadd.f32 %v4043_v43, %v3995_v60  ;;  %v6044_v52 = vpop.f32.mrb[140].mxu0 }
 0xa01   : > { %v6045_v35 = vpop.f32.mrb[141].mxu0 }
 0xa02   : > { %v4056_v44 = vmax.f32 %v4044_v7, 0.0  ;;  %v6046_v40 = vadd.f32 %v6045_v35, %v6044_v52  ;;  %v6047_v61 = vpop.f32.mrb[142].mxu0  ;;  %v4059_v25 = vrot.slane %v4055_v13, 7  ;;  %v4071_v46 = vrot.slane %v4055_v13, 1 }
 0xa03   : > { %v6048_v14 = vpop.f32.mrb[143].mxu0 }
 0xa04   : > { %v4060_v21 = vrot.slane %v4056_v44, 7  ;;  %v4072_v63 = vrot.slane %v4056_v44, 1  ;;  %v4000_v30 = vadd.f32 %v6046_v40, %v5435_v12  ;;  %v6049_v11 = vadd.f32 %v6048_v14, %v6047_v61 }
 0xa05   : > { %v4083_v6 = vpack.c.bf16 %v4056_v44, %v4055_v13 }
 0xa06   : > { %v4065_v24 = vsel %vm9270_vm2, %v4059_v25, %v4060_v21  ;;  %v4049_v47 = vadd.f32 %v6352_v50, %v4000_v30  ;;  %v4003_v41 = vadd.f32 %v6049_v11, %v5435_v12  ;;  %v4077_v20 = vsel %vm9271_vm6, %v4071_v46, %v4072_v63  ;;  %vm9275_vm2 = vmmov %vm9265_vm5 }
 0xa07   : > { %4322 = vmatprep.mubr.bf16.mxu0 %v4083_v6  ;;  %vm9276_vm6 = vmmov %vm9273_vm9 }
 0xa08   : > { %v4057_v10 = vmax.f32 %v4049_v47, 0.0  ;;  %v4052_v28 = vadd.f32 %v6353_v17, %v4003_v41 }
 0xa0a   : > { %v4061_v31 = vrot.slane %v4057_v10, 7  ;;  %v4073_v37 = vrot.slane %v4057_v10, 1  ;;  %v4058_v34 = vmax.f32 %v4052_v28, 0.0 }
 0xa0c   : > { %v4062_v3 = vrot.slane %v4058_v34, 7  ;;  %v4074_v8 = vrot.slane %v4058_v34, 1  ;;  %v4076_v22 = vsel %vm9272_vm13, %v4072_v63, %v4073_v37  ;;  %v4084_v16 = vpack.c.bf16 %v4058_v34, %v4057_v10  ;;  %vm9281_vm13 = vmmov %vm9276_vm6 }
 0xa0d   : > { %v5553_v49 = vpack.c.bf16 %v4076_v22, %v4077_v20  ;;  %v4064_v53 = vsel %vm9273_vm9, %v4060_v21, %v4061_v31  ;;  %vm9282_vm9 = vmmov %vm9276_vm6 }
 0xa0e   : > { %v4066_v36 = vsel %vm9274_vm11, %v4062_v3, %v4059_v25  ;;  %v4075_v39 = vsel %vm9265_vm5, %v4073_v37, %v4074_v8  ;;  %v4078_v56 = vsel %vm9275_vm2, %v4074_v8, %v4071_v46  ;;  %v4063_v62 = vsel %vm9276_vm6, %v4061_v31, %v4062_v3 }
 0xa0f   : > { %v5547_v42 = vpack.c.bf16 %v4065_v24, %v4066_v36  ;;  %6370 = vmatprep.mubr.msk.bf16.mxu1 %vm8631_vm0, %v5553_v49  ;;  %v5556_v45 = vpack.c.bf16 %v4078_v56, %v4075_v39  ;;  %v5550_v26 = vpack.c.bf16 %v4063_v62, %v4064_v53  ;;  %vm9278_vm0 = vmmov %vm9275_vm2  ;;  %vm4463_vm5 = vcmask 261120  }
 0xa10   : > { %vm9283_vm11 = vmmov %vm9278_vm0 }
 0xa11   : > { %5548 = vmatmul.mubr.msk.bf16.vlgmr.msra.gmra.mrb[144].mxu0 %vm8621_vm10, %v5547_v42  ;;  %6371 = vmatmul.mubr.msk.bf16.vlgmr.msra.gmra.mrb[108].mxu1 %vm8642_vm4, %v5556_v45  ;;  %vm9277_vm10 = vmmov %vm9276_vm6 }
 0xa12   : > { %4330 = vmatprep.mubr.bf16.mxu0 %v4084_v16  ;;  %vm9279_vm4 = vmmov %vm9278_vm0 }
 0xa19   : > { %5551 = vmatmul.mubr.msk.bf16.gmra.mrb[148].mxu0 %vm8673_vm12, %v5550_v26  ;;  %vm9280_vm12 = vmmov %vm9276_vm6 }
 0xae4   : > { %v6076_v4 = vpop.f32.mrb[144].mxu0  ;;  %v6372_v50 = vpop.f32.mrb[108].mxu1 }
 0xae5   : > { %v6077_v33 = vpop.f32.mrb[145].mxu0  ;;  %v4373_v12 = vpop.f32.mrb[109].mxu1 }
 0xae6   : > { %v6078_v2 = vadd.f32 %v6077_v33, %v6076_v4  ;;  %v6079_v57 = vpop.f32.mrb[146].mxu0  ;;  %v6373_v48 = vpop.f32.mrb[110].mxu1  ;;  %v6674_v4 = vmov 0.0   ;;  %v6659_v33 = vld [vmem:[%s8975_s6 + $0x10] sm:$0xff]  }
 0xae7   : > { %v6080_v54 = vpop.f32.mrb[147].mxu0  ;;  %v4376_v17 = vpop.f32.mrb[111].mxu1  ;;  %6374 = vmatprep.subr.bf16.mxu1 %v6674_v4  ;;  %6382 = vmatprep.subr.bf16.mxu0 %v6674_v4 }
 0xae8   : > { %v4325_v29 = vadd.f32 %v6078_v2, %v5521_v5  ;;  %v6081_v38 = vadd.f32 %v6080_v54, %v6079_v57  ;;  %v6662_v2 = vld [vmem:[%s8975_s6 + $0x28] sm:$0xff]   ;;  %v6663_v57 = vld [vmem:[%s8975_s6 + $0x30] sm:$0xff]  }
 0xaea   : > { %v4374_v43 = vadd.f32 %v4373_v12, %v4325_v29  ;;  %v4328_v0 = vadd.f32 %v6081_v38, %v5521_v5  ;;  %v6661_v12 = vld [vmem:[%s8975_s6 + $0x20] sm:$0xff]  }
 0xaec   : > { %v4388_v27 = vmax.f32 %v4374_v43, 0.0  ;;  %v4377_v1 = vadd.f32 %v4376_v17, %v4328_v0  ;;  %v6082_v58 = vpop.f32.mrb[148].mxu0 }
 0xaed   : > { %v6083_v60 = vpop.f32.mrb[149].mxu0 }
 0xaee   : > { %v4389_v13 = vmax.f32 %v4377_v1, 0.0  ;;  %v6084_v7 = vadd.f32 %v6083_v60, %v6082_v58  ;;  %v6085_v52 = vpop.f32.mrb[150].mxu0  ;;  %v4392_v35 = vrot.slane %v4388_v27, 7  ;;  %v4404_v44 = vrot.slane %v4388_v27, 1 }
 0xaef   : > { %v6086_v40 = vpop.f32.mrb[151].mxu0 }
 0xaf0   : > { %v4393_v61 = vrot.slane %v4389_v13, 7  ;;  %v4405_v25 = vrot.slane %v4389_v13, 1  ;;  %v4333_v46 = vadd.f32 %v6084_v7, %v5521_v5  ;;  %v6087_v14 = vadd.f32 %v6086_v40, %v6085_v52 }
 0xaf2   : > { %v4382_v21 = vadd.f32 %v6372_v50, %v4333_v46  ;;  %v4336_v63 = vadd.f32 %v6087_v14, %v5521_v5  ;;  %v4398_v30 = vsel %vm9277_vm10, %v4392_v35, %v4393_v61  ;;  %v4410_v11 = vsel %vm9278_vm0, %v4404_v44, %v4405_v25  ;;  %v6658_v50 = vld [vmem:[%s8975_s6 + $0x8] sm:$0xff]   ;;  %v6660_v5 = vld [vmem:[%s8975_s6 + $0x18] sm:$0xff]  }
 0xaf3   : > { %v4401_v34 = vsel %vm8583_vm8, %v4398_v30, 0.0  ;;  %v4412_v3 = vsel %vm8587_vm3, %v4410_v11, 0.0  ;;  %vm9284_vm8 = vmmov %vm9278_vm0  ;;  %vm9285_vm3 = vnez %v9241_v55 }
 0xaf4   : > { %v4390_v6 = vmax.f32 %v4382_v21, 0.0  ;;  %v4385_v24 = vadd.f32 %v6373_v48, %v4336_v63  ;;  %v9287_v48 = vlaneseq }
 0xaf6   : > { %v4394_v47 = vrot.slane %v4390_v6, 7  ;;  %v4406_v41 = vrot.slane %v4390_v6, 1  ;;  %v4391_v20 = vmax.f32 %v4385_v24, 0.0  ;;  %v4425_v54 = vand.u32 127, %v9287_v48 }
 0xaf8   : > { %v4395_v10 = vrot.slane %v4391_v20, 7  ;;  %v4407_v28 = vrot.slane %v4391_v20, 1  ;;  %v4409_v31 = vsel %vm9279_vm4, %v4405_v25, %v4406_v41  ;;  %v4397_v37 = vsel %vm9280_vm12, %v4393_v61, %v4394_v47 }
 0xaf9   : > { %v4413_v8 = vsel %vm8591_vm14, %v4409_v31, 0.0  ;;  %v4402_v22 = vsel %vm8658_vm7, %v4397_v37, 0.0  ;;  %vm9286_vm14 = vnez %v9243_v9  ;;  %v6657_v9 = vld [vmem:[%s8975_s6] sm:$0xff]   ;;  %vm4426_vm7 = vcmp.lt.s32.totalorder %v4425_v54, 96  ;;  %v6664_v37 = vld [vmem:[%s8975_s6 + $0x38] sm:$0xff]  }
 0xafa   : > { %v4399_v16 = vsel %vm9281_vm13, %v4395_v10, %v4392_v35  ;;  %v4417_v49 = vmax.f32 %v4401_v34, %v4413_v8  ;;  %v4396_v53 = vsel %vm9282_vm9, %v4394_v47, %v4395_v10  ;;  %v4408_v18 = vsel %vm9283_vm11, %v4406_v41, %v4407_v28  ;;  %6383 = vmatpush3.bf16.msra.mxu0 %v6657_v9  ;;  %v4460_v31 = vld [vmem:[%s8974_s5] sm:$0xf] }
 0xafb   : > { %v4400_v59 = vsel %vm8579_vm15, %v4399_v16, 0.0  ;;  %v4403_v19 = vsel %vm8662_vm1, %v4396_v53, 0.0  ;;  %v4411_v51 = vsel %vm9284_vm8, %v4407_v28, %v4404_v44  ;;  %v4414_v36 = vsel %vm9285_vm3, %v4408_v18, 0.0  ;;  %6384 = vmatprep.subr.bf16.mxu0 %v6674_v4 }
 0xafc   : > { %v4416_v39 = vmax.f32 %v4400_v59, %v4412_v3  ;;  %v8896_v56 = vmax.f32 %v4389_v13, %v4417_v49  ;;  %v4415_v62 = vsel %vm9286_vm14, %v4411_v51, 0.0  ;;  %v4418_v42 = vmax.f32 %v4402_v22, %v4414_v36  ;;  %v5559_v49 = vld [vmem:[%s8976_s7] ss:$0 sm:$0xff] }
 0xafd   : > { %v4419_v45 = vmax.f32 %v4403_v19, %v4415_v62  ;;  %vm6677_vm15 = vmmov 0   ;;  %vm4439_vm1 = vcmp.ge.s32.totalorder %v4425_v54, 32 }
 0xafe   : > { %v8900_v26 = vmax.f32 %v4388_v27, %v4416_v39  ;;  %v8902_v23 = vmax.f32 %v4390_v6, %v4418_v42  ;;  %6378 = vmatprep.mubr.msk.bf16.mxu1 %vm6677_vm15, %v6674_v4  ;;  %6398 = vmatprep.mubr.msk.bf16.mxu0 %vm6677_vm15, %v6674_v4 }
 0xaff   : > { %v8904_v32 = vmax.f32 %v4391_v20, %v4419_v45  ;;  %6385 = vmatpush3.bf16.msra.mxu0 %v6658_v50 }
 0xb00   : > { %v6415_v15 = vpack.i.bf16 %v8896_v56, %v8900_v26  ;;  %6386 = vmatprep.subr.bf16.mxu0 %v6674_v4 }
 0xb01   : > { %v6425_v55 = vpack.i.bf16 %v8904_v32, %v8902_v23 }
 0xb02   : > { %6416 = vrot.lane.b32.xlu0 %v6415_v15, %s6675_s14 }
 0xb03   : > { %6426 = vrot.lane.b32.xlu1 %v6425_v55, %s6675_s14  ;;  %6387 = vmatpush3.bf16.msra.mxu0 %v6659_v33  ;;  %s4680_s14 = sshll.u32 %s9291_s28, 3 }
 0xb04   : > { %6388 = vmatprep.subr.bf16.mxu0 %v6674_v4  ;;  %s305_s19 = scalar_lea.vmem %s8977_s8, %s4680_s14 }
 0xb06   : > { %6421 = vrot.lane.b32.xlu0 %v6415_v15, %s6676_s15 }
 0xb07   : > { %6431 = vrot.lane.b32.xlu1 %v6425_v55, %s6676_s15  ;;  %6389 = vmatpush3.bf16.msra.mxu0 %v6660_v5 }
 0xb08   : > { %6390 = vmatprep.subr.bf16.mxu0 %v6674_v4 }
 0xb0b   : > { %6391 = vmatpush3.bf16.msra.mxu0 %v6661_v12 }
 0xb0c   : > { %6392 = vmatprep.subr.bf16.mxu0 %v6674_v4 }
 0xb0f   : > { %6393 = vmatpush3.bf16.msra.mxu0 %v6662_v2 }
 0xb10   : > { %6394 = vmatprep.subr.bf16.mxu0 %v6674_v4 }
 0xb13   : > { %6395 = vmatpush3.bf16.msra.mxu0 %v6663_v57 }
 0xb14   : > { %6396 = vmatprep.subr.bf16.mxu0 %v6674_v4 }
 0xb17   : > { %6397 = vmatpush3.bf16.msra.mxu0 %v6664_v37 }
 0xb74   : > { %v6417_v17 = vpop.permute.xlu0 %6416 }
 0xb75   : > { %v6427_v29 = vpop.permute.xlu1 %6426  ;;  %v6419_v38 = vunpack.i.h.bf16 %v6417_v17  ;;  %v6418_v43 = vunpack.i.l.bf16 %v6417_v17 }
 0xb76   : > { %v6429_v0 = vunpack.i.h.bf16 %v6427_v29  ;;  %v6428_v27 = vunpack.i.l.bf16 %v6427_v29 }
 0xb77   : > { %v4436_v7 = vsel %vm4426_vm7, %v6419_v38, 0.0  ;;  %v4435_v52 = vsel %vm4426_vm7, %v6418_v43, 0.0 }
 0xb78   : > { %v6422_v1 = vpop.permute.xlu0 %6421  ;;  %v4438_v40 = vsel %vm4426_vm7, %v6429_v0, 0.0  ;;  %v4437_v61 = vsel %vm4426_vm7, %v6428_v27, 0.0 }
 0xb79   : > { %v6424_v58 = vunpack.i.h.bf16 %v6422_v1  ;;  %v6423_v60 = vunpack.i.l.bf16 %v6422_v1  ;;  %v6432_v13 = vpop.permute.xlu1 %6431 }
 0xb7a   : > { %v6434_v35 = vunpack.i.h.bf16 %v6432_v13  ;;  %v6433_v44 = vunpack.i.l.bf16 %v6432_v13 }
 0xb7b   : > { %v4449_v25 = vsel %vm4439_vm1, %v6424_v58, 0.0  ;;  %v4448_v46 = vsel %vm4439_vm1, %v6423_v60, 0.0 }
 0xb7c   : > { %v4452_v14 = vmax.f32 %v4435_v52, %v4448_v46  ;;  %v4453_v21 = vmax.f32 %v4436_v7, %v4449_v25  ;;  %v4451_v63 = vsel %vm4439_vm1, %v6434_v35, 0.0  ;;  %v4450_v30 = vsel %vm4439_vm1, %v6433_v44, 0.0 }
 0xb7d   : > { %v4454_v11 = vmax.f32 %v4437_v61, %v4450_v30  ;;  %v4455_v6 = vmax.f32 %v4438_v40, %v4451_v63 }
 0xb7e   : > { %v4456_v24 = vmax.f32 %v8900_v26, %v4452_v14  ;;  %v4457_v47 = vmax.f32 %v8896_v56, %v4453_v21 }
 0xb7f   : > { %v4458_v41 = vmax.f32 %v8902_v23, %v4454_v11  ;;  %v4459_v20 = vmax.f32 %v8904_v32, %v4455_v6 }
 0xb80   : > { %v4461_v10 = vpack.c.bf16 %v4457_v47, %v4456_v24 }
 0xb81   : > { %v4462_v28 = vpack.c.bf16 %v4459_v20, %v4458_v41 }
 0xb82   : > { %6375 = vmatpush3.bf16.msra.mxu1 %v4461_v10 }
 0xb83   : > { %6376 = vmatprep.subr.bf16.mxu1 %v6674_v4 }
 0xb86   : > { %6377 = vmatpush3.bf16.msra.mxu1 %v4462_v28 }
 0xb89   : > { %6379 = vmatmul.mubr.msk.bf16.vlgmr.msra.gmra.mrb[112].mxu1 %vm4463_vm5, %v4460_v31 }
 0xc5c   : > { %v4501_v34 = vpop.f32.mrb[112].mxu1 }
 0xc5d   : > { %v4507_v3 = vpack.c.bf16 %v4501_v34, %v4501_v34  ;;  %v6380_v8 = vpop.f32.mrb[113].mxu1 }
 0xc5e   : > { %v4504_v22 = vpop.f32.mrb[114].mxu1 }
 0xc5f   : > { %v6381_v16 = vpop.f32.mrb[115].mxu1  ;;  %6399 = vmatmul.mubr.bf16.vlgmr.msra.gmra.mrb[152].mxu0 %v4507_v3 }
 0xd32   : > { %v4613_v53 = vpop.f32.mrb[152].mxu0 }
 0xd33   : > { %v4614_v18 = vadd.f32 %v5559_v49, %v4613_v53  ;;  %v6400_v59 = vpop.f32.mrb[153].mxu0 }
 0xd34   : > { %v4616_v19 = vpop.f32.mrb[154].mxu0 }
 0xd35   : > { %4619 = vst [vmem:[%s305_s19] sm:$0xff] %v4614_v18  ;;  %v6401_v51 = vpop.f32.mrb[155].mxu0 }
 0xd36 PF: > { %s18_s27 = sadd.s32 1, %s6671_s27  }
 0xd37   : > { %p15_p5 = scmp.ge.s32.totalorder %s18_s27, 4  }
 0xd39   :  { %17 = sbr.rel (!%p15_p5) target bundleno = 1 (0x1), region = 98 }

</bundles_post_ra>
